<compile_context>
chip_gen: v7x
topology: tpu7x:2x2x1
jax: 0.10.0
libtpu: 0.0.40
codegen_flags: <defaults>
</compile_context>

<pallas_src>
import math
import functools

import jax
import jax.numpy as jnp
from jax.experimental import pallas as pl
from jax.experimental.pallas import tpu as pltpu

LN_EPS = 1e-5                    # nn.LayerNorm default eps
COMPUTE_DTYPE = jnp.bfloat16     # MXU input dtype; accumulation stays f32


# ----------------------------- in-kernel helpers -----------------------------

def _layernorm(x, w, b):
    x = x.astype(jnp.float32)
    mean = jnp.mean(x, axis=-1, keepdims=True)
    var = jnp.mean(jnp.square(x - mean), axis=-1, keepdims=True)
    return (x - mean) * jax.lax.rsqrt(var + LN_EPS) * w + b


def _gelu_exact(x):
    # PyTorch nn.GELU default (erf-based, exact), f32 math
    return 0.5 * x * (1.0 + jax.lax.erf(x * (1.0 / math.sqrt(2.0))))


def _softmax_lastdim(a):
    m = jnp.max(a, axis=-1, keepdims=True)
    e = jnp.exp(a - m)
    s = jnp.sum(e, axis=-1, keepdims=True)
    return e * pl.reciprocal(s, approx=True)


# ------------------------------- fused kernel --------------------------------

def _decoder_kernel(num_heads, depth, ret_tokens,
                    x_ref,
                    n1w_ref, n1b_ref, wq_ref, wk_ref, wv_ref, wproj_ref,
                    projb_ref, n2w_ref, n2b_ref, fc1w_ref, fc1b_ref,
                    fc2w_ref, fc2b_ref,
                    normw_ref, normb_ref, headw_ref, headb_ref,
                    o_ref,
                    x_scr):
    """Grid = (batch_tile, layer).  x_scr keeps the residual stream in VMEM."""
    l = pl.program_id(1)
    Bt, N, D = x_scr.shape
    H = num_heads
    hd = D // H
    scale = hd ** -0.5                       # qk_scale=None default

    @pl.when(l == 0)
    def _():
        x_scr[...] = x_ref[...].astype(jnp.float32)

    x = x_scr[...]                           # (Bt, N, D) f32 residual stream

    # ---------------- Attention branch (head-batched dot_generals) -----------
    xn = _layernorm(x, n1w_ref[0, 0], n1b_ref[0, 0])
    xn_c = xn.astype(COMPUTE_DTYPE)
    wq = wq_ref[0]                           # (H, D, hd) bf16
    wk = wk_ref[0]
    wv = wv_ref[0]
    wp = wproj_ref[0]                        # (H, hd, D) bf16
    pb = projb_ref[0, 0].astype(jnp.float32)

    for b in range(Bt):                      # static, small; heads are batched
        xb = jnp.broadcast_to(xn_c[b], (H, N, D))
        q = jnp.einsum('hnd,hde->hne', xb, wq,
                       preferred_element_type=jnp.float32) * scale
        k = jnp.einsum('hnd,hde->hne', xb, wk,
                       preferred_element_type=jnp.float32)
        v = jnp.einsum('hnd,hde->hne', xb, wv,
                       preferred_element_type=jnp.float32)
        att = jnp.einsum('hqd,hkd->hqk',
                         q.astype(COMPUTE_DTYPE), k.astype(COMPUTE_DTYPE),
                         preferred_element_type=jnp.float32)
        att = _softmax_lastdim(att)          # f32 softmax, EUP reciprocal
        ctx = jnp.einsum('hqk,hkd->hqd',
                         att.astype(COMPUTE_DTYPE), v.astype(COMPUTE_DTYPE),
                         preferred_element_type=jnp.float32)    # (H, N, hd)
        po = jnp.einsum('hnd,hdk->hnk',
                        ctx.astype(COMPUTE_DTYPE), wp,
                        preferred_element_type=jnp.float32)     # (H, N, D)
        attn_b = jnp.sum(po, axis=0) + pb                       # (N, D)
        x_scr[b] = x[b] + attn_b             # drop_path=0, gamma_1=None

    x = x_scr[...]

    # ---------------- MLP branch (all Bt*N rows fused into one matmul) -------
    xn2 = _layernorm(x, n2w_ref[0, 0], n2b_ref[0, 0])
    x2d = xn2.reshape(Bt * N, D).astype(COMPUTE_DTYPE)
    hid = jnp.dot(x2d, fc1w_ref[0], preferred_element_type=jnp.float32)
    hid = hid + fc1b_ref[0, 0].astype(jnp.float32)
    hid = _gelu_exact(hid)
    mlp = jnp.dot(hid.astype(COMPUTE_DTYPE), fc2w_ref[0],
                  preferred_element_type=jnp.float32)
    mlp = mlp + fc2b_ref[0, 0].astype(jnp.float32)
    x = x + mlp.reshape(Bt, N, D)
    x_scr[...] = x

    # ---------------- final norm + head, fused into the last layer -----------
    @pl.when(l == depth - 1)
    def _():
        xt = x[:, N - ret_tokens:, :]                            # tail tokens
        xt = _layernorm(xt, normw_ref[0], normb_ref[0])
        y = jnp.dot(xt.reshape(Bt * ret_tokens, D).astype(COMPUTE_DTYPE),
                    headw_ref[...], preferred_element_type=jnp.float32)
        y = y + headb_ref[0].astype(jnp.float32)
        o_ref[...] = y.reshape(Bt, ret_tokens, -1).astype(o_ref.dtype)


# --------------------------------- wrapper ------------------------------------

def decoder_forward(x, params, return_token_num, num_heads, *, batch_tile=None):
    """PretrainVisionTransformerDecoder.forward"""
    B, N, D = x.shape
    depth = params['wq'].shape[0]
    Cpad = params['head_w'].shape[1]
    C = params['num_classes']
    T = return_token_num if return_token_num > 0 else N
    Bt = batch_tile if batch_tile is not None else B
    assert B % Bt == 0 and D % num_heads == 0
    grid = (B // Bt, depth)

    def layer_spec(arr):                 # (depth, ...) -> block (1, ...)
        nz = (0,) * (arr.ndim - 1)
        return pl.BlockSpec((1,) + arr.shape[1:], lambda bi, l: (l,) + nz)

    def fixed_spec(arr):                 # whole array, same block every step
        z = (0,) * arr.ndim
        return pl.BlockSpec(arr.shape, lambda bi, l: z)

    layer_ws = [params[k] for k in ('n1_w', 'n1_b', 'wq', 'wk', 'wv', 'wproj',
                                    'proj_b', 'n2_w', 'n2_b', 'fc1_w', 'fc1_b',
                                    'fc2_w', 'fc2_b')]
    fixed_ws = [params[k] for k in ('norm_w', 'norm_b', 'head_w', 'head_b')]

    kern = functools.partial(_decoder_kernel, num_heads, depth, T)
    out = pl.pallas_call(
        kern,
        out_shape=jax.ShapeDtypeStruct((B, T, Cpad), jnp.float32),
        grid=grid,
        in_specs=[pl.BlockSpec((Bt, N, D), lambda bi, l: (bi, 0, 0))]
                 + [layer_spec(w) for w in layer_ws]
                 + [fixed_spec(w) for w in fixed_ws],
        out_specs=pl.BlockSpec((Bt, T, Cpad), lambda bi, l: (bi, 0, 0)),
        scratch_shapes=[pltpu.VMEM((Bt, N, D), jnp.float32)],
        compiler_params=pltpu.CompilerParams(
            dimension_semantics=("parallel", "arbitrary"),
            vmem_limit_bytes=64 * 1024 * 1024),
    )(x, *layer_ws, *fixed_ws)
    return out[:, :, :C]                 # drop the lane-padding of the head


# ----------------------------- parameter creation ------------------------------

def _xavier(key, fan_in, fan_out):
    # nn.init.xavier_uniform_, returned in (in, out) layout (== torch weight.T)
    limit = math.sqrt(6.0 / (fan_in + fan_out))
    return jax.random.uniform(key, (fan_in, fan_out), jnp.float32, -limit, limit)


def init_params(key, depth, embed_dim, num_heads, mlp_ratio, num_classes,
                param_dtype=COMPUTE_DTYPE):
    D, H = embed_dim, num_heads
    hd = D // H
    hidden = int(D * mlp_ratio)
    Cpad = ((num_classes + 127) // 128) * 128
    Cpad = max(Cpad, 128)

    acc = {k: [] for k in ('n1_w', 'n1_b', 'wq', 'wk', 'wv', 'wproj', 'proj_b',
                           'n2_w', 'n2_b', 'fc1_w', 'fc1_b', 'fc2_w', 'fc2_b')}
    for _ in range(depth):
        key, k_qkv, k_proj, k_fc1, k_fc2 = jax.random.split(key, 5)
        qkv_w = _xavier(k_qkv, D, 3 * D).reshape(D, 3, H, hd)   # qkv_bias=False
        acc['wq'].append(jnp.transpose(qkv_w[:, 0], (1, 0, 2)))  # (H, D, hd)
        acc['wk'].append(jnp.transpose(qkv_w[:, 1], (1, 0, 2)))
        acc['wv'].append(jnp.transpose(qkv_w[:, 2], (1, 0, 2)))
        acc['wproj'].append(_xavier(k_proj, D, D).reshape(H, hd, D))
        acc['proj_b'].append(jnp.zeros((1, D), jnp.float32))
        acc['n1_w'].append(jnp.ones((1, D), jnp.float32))
        acc['n1_b'].append(jnp.zeros((1, D), jnp.float32))
        acc['n2_w'].append(jnp.ones((1, D), jnp.float32))
        acc['n2_b'].append(jnp.zeros((1, D), jnp.float32))
        acc['fc1_w'].append(_xavier(k_fc1, D, hidden))
        acc['fc1_b'].append(jnp.zeros((1, hidden), jnp.float32))
        acc['fc2_w'].append(_xavier(k_fc2, hidden, D))
        acc['fc2_b'].append(jnp.zeros((1, D), jnp.float32))

    key, k_head = jax.random.split(key)
    head_w = _xavier(k_head, D, num_classes)
    head_w = jnp.pad(head_w, ((0, 0), (0, Cpad - num_classes)))  # lane-dense

    params = {k: jnp.stack(v, axis=0) for k, v in acc.items()}
    for k in ('wq', 'wk', 'wv', 'wproj', 'fc1_w', 'fc2_w'):      # MXU operands
        params[k] = params[k].astype(param_dtype)
    params.update(
        norm_w=jnp.ones((1, D), jnp.float32),
        norm_b=jnp.zeros((1, D), jnp.float32),
        head_w=head_w.astype(param_dtype),
        head_b=jnp.zeros((1, Cpad), jnp.float32),
        num_classes=num_classes,
    )
    return params


# ------------------------------------ main -------------------------------------

if __name__ == "__main__":
    # Small, forward-consistent shapes
    B, N, D = 2, 8, 32           # batch, tokens, embed_dim
    num_heads = 4                # head_dim = 8
    depth = 2
    mlp_ratio = 4.0
    num_classes = 48
    return_token_num = 4

    key = jax.random.PRNGKey(0)
    key, kx = jax.random.split(key)
    x = jax.random.normal(kx, (B, N, D), jnp.float32)

    params = init_params(key, depth, D, num_heads, mlp_ratio, num_classes)

    out = decoder_forward(x, params, return_token_num, num_heads)
    out = jax.block_until_ready(out)
    assert out.shape == (B, return_token_num, num_classes), out.shape
    print("KERNEL_OK")
</pallas_src>

<mosaic_0001>
module attributes {stable_mosaic.version = 11 : i64} {
  func.func @_decoder_kernel(%arg0: i32, %arg1: i32, %arg2: memref<2x8x32xf32, #tpu.memory_space<vmem>>, %arg3: memref<1x1x32xf32, #tpu.memory_space<vmem>>, %arg4: memref<1x1x32xf32, #tpu.memory_space<vmem>>, %arg5: memref<1x4x32x8xbf16, #tpu.memory_space<vmem>>, %arg6: memref<1x4x32x8xbf16, #tpu.memory_space<vmem>>, %arg7: memref<1x4x32x8xbf16, #tpu.memory_space<vmem>>, %arg8: memref<1x4x8x32xbf16, #tpu.memory_space<vmem>>, %arg9: memref<1x1x32xf32, #tpu.memory_space<vmem>>, %arg10: memref<1x1x32xf32, #tpu.memory_space<vmem>>, %arg11: memref<1x1x32xf32, #tpu.memory_space<vmem>>, %arg12: memref<1x32x128xbf16, #tpu.memory_space<vmem>>, %arg13: memref<1x1x128xf32, #tpu.memory_space<vmem>>, %arg14: memref<1x128x32xbf16, #tpu.memory_space<vmem>>, %arg15: memref<1x1x32xf32, #tpu.memory_space<vmem>>, %arg16: memref<1x32xf32, #tpu.memory_space<vmem>>, %arg17: memref<1x32xf32, #tpu.memory_space<vmem>>, %arg18: memref<32x128xbf16, #tpu.memory_space<vmem>>, %arg19: memref<1x128xf32, #tpu.memory_space<vmem>>, %arg20: memref<2x4x128xf32, #tpu.memory_space<vmem>>, %arg21: memref<2x8x32xf32, #tpu.memory_space<vmem>>) attributes {dimension_semantics = [#tpu.dimension_semantics<parallel>, #tpu.dimension_semantics<arbitrary>], iteration_bounds = array<i64: 1, 2>, scalar_prefetch = 0 : i64, scratch_operands = 1 : i64, tpu.core_type = #tpu.core_type<tc>, window_params = [{transform_indices = @transform_0, window_bounds = array<i64: 2, 8, 32>}, {transform_indices = @transform_1, window_bounds = array<i64: 1, 1, 32>}, {transform_indices = @transform_2, window_bounds = array<i64: 1, 1, 32>}, {transform_indices = @transform_3, window_bounds = array<i64: 1, 4, 32, 8>}, {transform_indices = @transform_4, window_bounds = array<i64: 1, 4, 32, 8>}, {transform_indices = @transform_5, window_bounds = array<i64: 1, 4, 32, 8>}, {transform_indices = @transform_6, window_bounds = array<i64: 1, 4, 8, 32>}, {transform_indices = @transform_7, window_bounds = array<i64: 1, 1, 32>}, {transform_indices = @transform_8, window_bounds = array<i64: 1, 1, 32>}, {transform_indices = @transform_9, window_bounds = array<i64: 1, 1, 32>}, {transform_indices = @transform_10, window_bounds = array<i64: 1, 32, 128>}, {transform_indices = @transform_11, window_bounds = array<i64: 1, 1, 128>}, {transform_indices = @transform_12, window_bounds = array<i64: 1, 128, 32>}, {transform_indices = @transform_13, window_bounds = array<i64: 1, 1, 32>}, {pipeline_mode = #tpu.pipeline_mode<synchronous>, transform_indices = @transform_14, window_bounds = array<i64: 1, 32>}, {pipeline_mode = #tpu.pipeline_mode<synchronous>, transform_indices = @transform_15, window_bounds = array<i64: 1, 32>}, {pipeline_mode = #tpu.pipeline_mode<synchronous>, transform_indices = @transform_16, window_bounds = array<i64: 32, 128>}, {pipeline_mode = #tpu.pipeline_mode<synchronous>, transform_indices = @transform_17, window_bounds = array<i64: 1, 128>}, {transform_indices = @transform_18, window_bounds = array<i64: 2, 4, 128>}]} {
    %c0_i32 = arith.constant 0 : i32
    %0 = arith.cmpi eq, %arg1, %c0_i32 : i32
    %1 = arith.extui %0 : i1 to i32
    %c0_i32_0 = arith.constant 0 : i32
    %2 = arith.cmpi ne, %1, %c0_i32_0 : i32
    scf.if %2 {
      %c0_92 = arith.constant 0 : index
      %c0_93 = arith.constant 0 : index
      %c0_94 = arith.constant 0 : index
      %179 = vector.load %arg2[%c0_92, %c0_93, %c0_94] : memref<2x8x32xf32, #tpu.memory_space<vmem>>, vector<2x8x32xf32>
      %c0_95 = arith.constant 0 : index
      %c0_96 = arith.constant 0 : index
      %c0_97 = arith.constant 0 : index
      %180 = vector.load %arg21[%c0_95, %c0_96, %c0_97] : memref<2x8x32xf32, #tpu.memory_space<vmem>>, vector<2x8x32xf32>
      tpu.vector_store %arg21[%c0_95, %c0_96, %c0_97], %179 {strides = array<i32>} : memref<2x8x32xf32, #tpu.memory_space<vmem>>, vector<2x8x32xf32>,
    } else {
    }
    %c0 = arith.constant 0 : index
    %c0_1 = arith.constant 0 : index
    %c0_2 = arith.constant 0 : index
    %3 = vector.load %arg21[%c0, %c0_1, %c0_2] : memref<2x8x32xf32, #tpu.memory_space<vmem>>, vector<2x8x32xf32>
    %c0_3 = arith.constant 0 : index
    %c0_4 = arith.constant 0 : index
    %c0_5 = arith.constant 0 : index
    %4 = vector.load %arg3[%c0_3, %c0_4, %c0_5] : memref<1x1x32xf32, #tpu.memory_space<vmem>>, vector<1x1x32xf32>
    %5 = vector.shape_cast %4 : vector<1x1x32xf32> to vector<32xf32>
    %c0_6 = arith.constant 0 : index
    %c0_7 = arith.constant 0 : index
    %c0_8 = arith.constant 0 : index
    %6 = vector.load %arg4[%c0_6, %c0_7, %c0_8] : memref<1x1x32xf32, #tpu.memory_space<vmem>>, vector<1x1x32xf32>
    %7 = vector.shape_cast %6 : vector<1x1x32xf32> to vector<32xf32>
    %cst = arith.constant dense<0.000000e+00> : vector<2x8xf32>
    %8 = vector.multi_reduction <add>, %3, %cst [2] : vector<2x8x32xf32> to vector<2x8xf32>
    %9 = vector.shape_cast %8 : vector<2x8xf32> to vector<2x8x1xf32>
    %cst_9 = arith.constant 3.200000e+01 : f32
    %10 = vector.broadcast %cst_9 : f32 to vector<2x8x1xf32>
    %11 = arith.divf %9, %10 : vector<2x8x1xf32>
    %12 = vector.broadcast %11 : vector<2x8x1xf32> to vector<2x8x32xf32>
    %13 = arith.subf %3, %12 : vector<2x8x32xf32>
    %14 = arith.mulf %13, %13 : vector<2x8x32xf32>
    %cst_10 = arith.constant dense<0.000000e+00> : vector<2x8xf32>
    %15 = vector.multi_reduction <add>, %14, %cst_10 [2] : vector<2x8x32xf32> to vector<2x8xf32>
    %16 = vector.shape_cast %15 : vector<2x8xf32> to vector<2x8x1xf32>
    %cst_11 = arith.constant 3.200000e+01 : f32
    %17 = vector.broadcast %cst_11 : f32 to vector<2x8x1xf32>
    %18 = arith.divf %16, %17 : vector<2x8x1xf32>
    %19 = vector.broadcast %11 : vector<2x8x1xf32> to vector<2x8x32xf32>
    %20 = arith.subf %3, %19 : vector<2x8x32xf32>
    %cst_12 = arith.constant 9.99999974E-6 : f32
    %21 = vector.broadcast %cst_12 : f32 to vector<2x8x1xf32>
    %22 = arith.addf %18, %21 : vector<2x8x1xf32>
    %23 = math.rsqrt %22 : vector<2x8x1xf32>
    %24 = vector.broadcast %23 : vector<2x8x1xf32> to vector<2x8x32xf32>
    %25 = arith.mulf %20, %24 : vector<2x8x32xf32>
    %26 = vector.shape_cast %5 : vector<32xf32> to vector<1x1x32xf32>
    %27 = vector.broadcast %26 : vector<1x1x32xf32> to vector<2x8x32xf32>
    %28 = arith.mulf %25, %27 : vector<2x8x32xf32>
    %29 = vector.shape_cast %7 : vector<32xf32> to vector<1x1x32xf32>
    %30 = vector.broadcast %29 : vector<1x1x32xf32> to vector<2x8x32xf32>
    %31 = arith.addf %28, %30 : vector<2x8x32xf32>
    %32 = arith.truncf %31 : vector<2x8x32xf32> to vector<2x8x32xbf16>
    %c0_13 = arith.constant 0 : index
    %c0_14 = arith.constant 0 : index
    %c0_15 = arith.constant 0 : index
    %c0_16 = arith.constant 0 : index
    %33 = vector.load %arg5[%c0_13, %c0_14, %c0_15, %c0_16] : memref<1x4x32x8xbf16, #tpu.memory_space<vmem>>, vector<1x4x32x8xbf16>
    %34 = vector.shape_cast %33 : vector<1x4x32x8xbf16> to vector<4x32x8xbf16>
    %c0_17 = arith.constant 0 : index
    %c0_18 = arith.constant 0 : index
    %c0_19 = arith.constant 0 : index
    %c0_20 = arith.constant 0 : index
    %35 = vector.load %arg6[%c0_17, %c0_18, %c0_19, %c0_20] : memref<1x4x32x8xbf16, #tpu.memory_space<vmem>>, vector<1x4x32x8xbf16>
    %36 = vector.shape_cast %35 : vector<1x4x32x8xbf16> to vector<4x32x8xbf16>
    %c0_21 = arith.constant 0 : index
    %c0_22 = arith.constant 0 : index
    %c0_23 = arith.constant 0 : index
    %c0_24 = arith.constant 0 : index
    %37 = vector.load %arg7[%c0_21, %c0_22, %c0_23, %c0_24] : memref<1x4x32x8xbf16, #tpu.memory_space<vmem>>, vector<1x4x32x8xbf16>
    %38 = vector.shape_cast %37 : vector<1x4x32x8xbf16> to vector<4x32x8xbf16>
    %c0_25 = arith.constant 0 : index
    %c0_26 = arith.constant 0 : index
    %c0_27 = arith.constant 0 : index
    %c0_28 = arith.constant 0 : index
    %39 = vector.load %arg8[%c0_25, %c0_26, %c0_27, %c0_28] : memref<1x4x8x32xbf16, #tpu.memory_space<vmem>>, vector<1x4x8x32xbf16>
    %40 = vector.shape_cast %39 : vector<1x4x8x32xbf16> to vector<4x8x32xbf16>
    %c0_29 = arith.constant 0 : index
    %c0_30 = arith.constant 0 : index
    %c0_31 = arith.constant 0 : index
    %41 = vector.load %arg9[%c0_29, %c0_30, %c0_31] : memref<1x1x32xf32, #tpu.memory_space<vmem>>, vector<1x1x32xf32>
    %42 = vector.shape_cast %41 : vector<1x1x32xf32> to vector<32xf32>
    %43 = vector.extract_strided_slice %32 {offsets = [0, 0, 0], sizes = [1, 8, 32], strides = [1, 1, 1]} : vector<2x8x32xbf16> to vector<1x8x32xbf16>
    %44 = vector.shape_cast %43 : vector<1x8x32xbf16> to vector<8x32xbf16>
    %45 = vector.shape_cast %44 : vector<8x32xbf16> to vector<1x8x32xbf16>
    %46 = vector.broadcast %45 : vector<1x8x32xbf16> to vector<4x8x32xbf16>
    "tpu.trace_start"() <{level = 10 : i32, message = "hnd,hde->hne"}> : () -> ()
    %cst_32 = arith.constant dense<0.000000e+00> : vector<4x8x8xf32>
    %47 = tpu.matmul %46, %34, %cst_32 {dimension_numbers = #tpu.dot_dimension_numbers<[2], [1], [1], [2], [0, 0, 0, 1, 1, 2], [0], [0]>} : vector<4x8x32xbf16>, vector<4x32x8xbf16>, vector<4x8x8xf32> -> vector<4x8x8xf32>
    "tpu.trace_stop"() : () -> ()
    %cst_33 = arith.constant 0.353553385 : f32
    %48 = vector.broadcast %cst_33 : f32 to vector<4x8x8xf32>
    %49 = arith.mulf %47, %48 : vector<4x8x8xf32>
    "tpu.trace_start"() <{level = 10 : i32, message = "hnd,hde->hne"}> : () -> ()
    %cst_34 = arith.constant dense<0.000000e+00> : vector<4x8x8xf32>
    %50 = tpu.matmul %46, %36, %cst_34 {dimension_numbers = #tpu.dot_dimension_numbers<[2], [1], [1], [2], [0, 0, 0, 1, 1, 2], [0], [0]>} : vector<4x8x32xbf16>, vector<4x32x8xbf16>, vector<4x8x8xf32> -> vector<4x8x8xf32>
    %cst_35 = arith.constant dense<0.000000e+00> : vector<4x8x8xf32>
    %51 = tpu.matmul %46, %38, %cst_35 {dimension_numbers = #tpu.dot_dimension_numbers<[2], [1], [1], [2], [0, 0, 0, 1, 1, 2], [0], [0]>} : vector<4x8x32xbf16>, vector<4x32x8xbf16>, vector<4x8x8xf32> -> vector<4x8x8xf32>
    "tpu.trace_stop"() : () -> ()
    %52 = arith.truncf %49 : vector<4x8x8xf32> to vector<4x8x8xbf16>
    %53 = arith.truncf %50 : vector<4x8x8xf32> to vector<4x8x8xbf16>
    "tpu.trace_start"() <{level = 10 : i32, message = "hqd,hkd->hqk"}> : () -> ()
    %cst_36 = arith.constant dense<0.000000e+00> : vector<4x8x8xf32>
    %54 = tpu.matmul %52, %53, %cst_36 {dimension_numbers = #tpu.dot_dimension_numbers<[2], [2], [1], [1], [0, 0, 0, 1, 1, 1], [0], [0]>} : vector<4x8x8xbf16>, vector<4x8x8xbf16>, vector<4x8x8xf32> -> vector<4x8x8xf32>
    "tpu.trace_stop"() : () -> ()
    %cst_37 = arith.constant dense<0xFF800000> : vector<4x8xf32>
    %55 = vector.multi_reduction <maximumf>, %54, %cst_37 [2] : vector<4x8x8xf32> to vector<4x8xf32>
    %56 = vector.shape_cast %55 : vector<4x8xf32> to vector<4x8x1xf32>
    %57 = vector.broadcast %56 : vector<4x8x1xf32> to vector<4x8x8xf32>
    %58 = arith.subf %54, %57 : vector<4x8x8xf32>
    %59 = math.exp %58 : vector<4x8x8xf32>
    %cst_38 = arith.constant dense<0.000000e+00> : vector<4x8xf32>
    %60 = vector.multi_reduction <add>, %59, %cst_38 [2] : vector<4x8x8xf32> to vector<4x8xf32>
    %61 = vector.shape_cast %60 : vector<4x8xf32> to vector<4x8x1xf32>
    %62 = tpu.reciprocal %61 {approx = true} : vector<4x8x1xf32> -> vector<4x8x1xf32>
    %63 = vector.broadcast %62 : vector<4x8x1xf32> to vector<4x8x8xf32>
    %64 = arith.mulf %59, %63 : vector<4x8x8xf32>
    %65 = arith.truncf %64 : vector<4x8x8xf32> to vector<4x8x8xbf16>
    %66 = arith.truncf %51 : vector<4x8x8xf32> to vector<4x8x8xbf16>
    "tpu.trace_start"() <{level = 10 : i32, message = "hqk,hkd->hqd"}> : () -> ()
    %cst_39 = arith.constant dense<0.000000e+00> : vector<4x8x8xf32>
    %67 = tpu.matmul %65, %66, %cst_39 {dimension_numbers = #tpu.dot_dimension_numbers<[2], [1], [1], [2], [0, 0, 0, 1, 1, 2], [0], [0]>} : vector<4x8x8xbf16>, vector<4x8x8xbf16>, vector<4x8x8xf32> -> vector<4x8x8xf32>
    "tpu.trace_stop"() : () -> ()
    %68 = arith.truncf %67 : vector<4x8x8xf32> to vector<4x8x8xbf16>
    "tpu.trace_start"() <{level = 10 : i32, message = "hnd,hdk->hnk"}> : () -> ()
    %cst_40 = arith.constant dense<0.000000e+00> : vector<4x8x32xf32>
    %69 = tpu.matmul %68, %40, %cst_40 {dimension_numbers = #tpu.dot_dimension_numbers<[2], [1], [1], [2], [0, 0, 0, 1, 1, 2], [0], [0]>} : vector<4x8x8xbf16>, vector<4x8x32xbf16>, vector<4x8x32xf32> -> vector<4x8x32xf32>
    "tpu.trace_stop"() : () -> ()
    %cst_41 = arith.constant dense<0.000000e+00> : vector<8x32xf32>
    %70 = vector.multi_reduction <add>, %69, %cst_41 [0] : vector<4x8x32xf32> to vector<8x32xf32>
    %71 = vector.shape_cast %42 : vector<32xf32> to vector<1x32xf32>
    %72 = vector.broadcast %71 : vector<1x32xf32> to vector<8x32xf32>
    %73 = arith.addf %70, %72 : vector<8x32xf32>
    %74 = vector.extract_strided_slice %3 {offsets = [0, 0, 0], sizes = [1, 8, 32], strides = [1, 1, 1]} : vector<2x8x32xf32> to vector<1x8x32xf32>
    %75 = vector.shape_cast %74 : vector<1x8x32xf32> to vector<8x32xf32>
    %76 = arith.addf %75, %73 : vector<8x32xf32>
    %c0_42 = arith.constant 0 : index
    %c0_43 = arith.constant 0 : index
    %c0_44 = arith.constant 0 : index
    %77 = vector.load %arg21[%c0_42, %c0_43, %c0_44] : memref<2x8x32xf32, #tpu.memory_space<vmem>>, vector<1x8x32xf32>
    %78 = vector.shape_cast %77 : vector<1x8x32xf32> to vector<8x32xf32>
    %79 = vector.shape_cast %76 : vector<8x32xf32> to vector<1x8x32xf32>
    tpu.vector_store %arg21[%c0_42, %c0_43, %c0_44], %79 {strides = array<i32>} : memref<2x8x32xf32, #tpu.memory_space<vmem>>, vector<1x8x32xf32>,
    %80 = vector.extract_strided_slice %32 {offsets = [1, 0, 0], sizes = [1, 8, 32], strides = [1, 1, 1]} : vector<2x8x32xbf16> to vector<1x8x32xbf16>
    %81 = vector.shape_cast %80 : vector<1x8x32xbf16> to vector<8x32xbf16>
    %82 = vector.shape_cast %81 : vector<8x32xbf16> to vector<1x8x32xbf16>
    %83 = vector.broadcast %82 : vector<1x8x32xbf16> to vector<4x8x32xbf16>
    "tpu.trace_start"() <{level = 10 : i32, message = "hnd,hde->hne"}> : () -> ()
    %cst_45 = arith.constant dense<0.000000e+00> : vector<4x8x8xf32>
    %84 = tpu.matmul %83, %34, %cst_45 {dimension_numbers = #tpu.dot_dimension_numbers<[2], [1], [1], [2], [0, 0, 0, 1, 1, 2], [0], [0]>} : vector<4x8x32xbf16>, vector<4x32x8xbf16>, vector<4x8x8xf32> -> vector<4x8x8xf32>
    "tpu.trace_stop"() : () -> ()
    %cst_46 = arith.constant 0.353553385 : f32
    %85 = vector.broadcast %cst_46 : f32 to vector<4x8x8xf32>
    %86 = arith.mulf %84, %85 : vector<4x8x8xf32>
    "tpu.trace_start"() <{level = 10 : i32, message = "hnd,hde->hne"}> : () -> ()
    %cst_47 = arith.constant dense<0.000000e+00> : vector<4x8x8xf32>
    %87 = tpu.matmul %83, %36, %cst_47 {dimension_numbers = #tpu.dot_dimension_numbers<[2], [1], [1], [2], [0, 0, 0, 1, 1, 2], [0], [0]>} : vector<4x8x32xbf16>, vector<4x32x8xbf16>, vector<4x8x8xf32> -> vector<4x8x8xf32>
    %cst_48 = arith.constant dense<0.000000e+00> : vector<4x8x8xf32>
    %88 = tpu.matmul %83, %38, %cst_48 {dimension_numbers = #tpu.dot_dimension_numbers<[2], [1], [1], [2], [0, 0, 0, 1, 1, 2], [0], [0]>} : vector<4x8x32xbf16>, vector<4x32x8xbf16>, vector<4x8x8xf32> -> vector<4x8x8xf32>
    "tpu.trace_stop"() : () -> ()
    %89 = arith.truncf %86 : vector<4x8x8xf32> to vector<4x8x8xbf16>
    %90 = arith.truncf %87 : vector<4x8x8xf32> to vector<4x8x8xbf16>
    "tpu.trace_start"() <{level = 10 : i32, message = "hqd,hkd->hqk"}> : () -> ()
    %cst_49 = arith.constant dense<0.000000e+00> : vector<4x8x8xf32>
    %91 = tpu.matmul %89, %90, %cst_49 {dimension_numbers = #tpu.dot_dimension_numbers<[2], [2], [1], [1], [0, 0, 0, 1, 1, 1], [0], [0]>} : vector<4x8x8xbf16>, vector<4x8x8xbf16>, vector<4x8x8xf32> -> vector<4x8x8xf32>
    "tpu.trace_stop"() : () -> ()
    %cst_50 = arith.constant dense<0xFF800000> : vector<4x8xf32>
    %92 = vector.multi_reduction <maximumf>, %91, %cst_50 [2] : vector<4x8x8xf32> to vector<4x8xf32>
    %93 = vector.shape_cast %92 : vector<4x8xf32> to vector<4x8x1xf32>
    %94 = vector.broadcast %93 : vector<4x8x1xf32> to vector<4x8x8xf32>
    %95 = arith.subf %91, %94 : vector<4x8x8xf32>
    %96 = math.exp %95 : vector<4x8x8xf32>
    %cst_51 = arith.constant dense<0.000000e+00> : vector<4x8xf32>
    %97 = vector.multi_reduction <add>, %96, %cst_51 [2] : vector<4x8x8xf32> to vector<4x8xf32>
    %98 = vector.shape_cast %97 : vector<4x8xf32> to vector<4x8x1xf32>
    %99 = tpu.reciprocal %98 {approx = true} : vector<4x8x1xf32> -> vector<4x8x1xf32>
    %100 = vector.broadcast %99 : vector<4x8x1xf32> to vector<4x8x8xf32>
    %101 = arith.mulf %96, %100 : vector<4x8x8xf32>
    %102 = arith.truncf %101 : vector<4x8x8xf32> to vector<4x8x8xbf16>
    %103 = arith.truncf %88 : vector<4x8x8xf32> to vector<4x8x8xbf16>
    "tpu.trace_start"() <{level = 10 : i32, message = "hqk,hkd->hqd"}> : () -> ()
    %cst_52 = arith.constant dense<0.000000e+00> : vector<4x8x8xf32>
    %104 = tpu.matmul %102, %103, %cst_52 {dimension_numbers = #tpu.dot_dimension_numbers<[2], [1], [1], [2], [0, 0, 0, 1, 1, 2], [0], [0]>} : vector<4x8x8xbf16>, vector<4x8x8xbf16>, vector<4x8x8xf32> -> vector<4x8x8xf32>
    "tpu.trace_stop"() : () -> ()
    %105 = arith.truncf %104 : vector<4x8x8xf32> to vector<4x8x8xbf16>
    "tpu.trace_start"() <{level = 10 : i32, message = "hnd,hdk->hnk"}> : () -> ()
    %cst_53 = arith.constant dense<0.000000e+00> : vector<4x8x32xf32>
    %106 = tpu.matmul %105, %40, %cst_53 {dimension_numbers = #tpu.dot_dimension_numbers<[2], [1], [1], [2], [0, 0, 0, 1, 1, 2], [0], [0]>} : vector<4x8x8xbf16>, vector<4x8x32xbf16>, vector<4x8x32xf32> -> vector<4x8x32xf32>
    "tpu.trace_stop"() : () -> ()
    %cst_54 = arith.constant dense<0.000000e+00> : vector<8x32xf32>
    %107 = vector.multi_reduction <add>, %106, %cst_54 [0] : vector<4x8x32xf32> to vector<8x32xf32>
    %108 = vector.shape_cast %42 : vector<32xf32> to vector<1x32xf32>
    %109 = vector.broadcast %108 : vector<1x32xf32> to vector<8x32xf32>
    %110 = arith.addf %107, %109 : vector<8x32xf32>
    %111 = vector.extract_strided_slice %3 {offsets = [1, 0, 0], sizes = [1, 8, 32], strides = [1, 1, 1]} : vector<2x8x32xf32> to vector<1x8x32xf32>
    %112 = vector.shape_cast %111 : vector<1x8x32xf32> to vector<8x32xf32>
    %113 = arith.addf %112, %110 : vector<8x32xf32>
    %c1 = arith.constant 1 : index
    %c0_55 = arith.constant 0 : index
    %c0_56 = arith.constant 0 : index
    %114 = vector.load %arg21[%c1, %c0_55, %c0_56] : memref<2x8x32xf32, #tpu.memory_space<vmem>>, vector<1x8x32xf32>
    %115 = vector.shape_cast %114 : vector<1x8x32xf32> to vector<8x32xf32>
    %116 = vector.shape_cast %113 : vector<8x32xf32> to vector<1x8x32xf32>
    tpu.vector_store %arg21[%c1, %c0_55, %c0_56], %116 {strides = array<i32>} : memref<2x8x32xf32, #tpu.memory_space<vmem>>, vector<1x8x32xf32>,
    %c0_57 = arith.constant 0 : index
    %c0_58 = arith.constant 0 : index
    %c0_59 = arith.constant 0 : index
    %117 = vector.load %arg21[%c0_57, %c0_58, %c0_59] : memref<2x8x32xf32, #tpu.memory_space<vmem>>, vector<2x8x32xf32>
    %c0_60 = arith.constant 0 : index
    %c0_61 = arith.constant 0 : index
    %c0_62 = arith.constant 0 : index
    %118 = vector.load %arg10[%c0_60, %c0_61, %c0_62] : memref<1x1x32xf32, #tpu.memory_space<vmem>>, vector<1x1x32xf32>
    %119 = vector.shape_cast %118 : vector<1x1x32xf32> to vector<32xf32>
    %c0_63 = arith.constant 0 : index
    %c0_64 = arith.constant 0 : index
    %c0_65 = arith.constant 0 : index
    %120 = vector.load %arg11[%c0_63, %c0_64, %c0_65] : memref<1x1x32xf32, #tpu.memory_space<vmem>>, vector<1x1x32xf32>
    %121 = vector.shape_cast %120 : vector<1x1x32xf32> to vector<32xf32>
    %cst_66 = arith.constant dense<0.000000e+00> : vector<2x8xf32>
    %122 = vector.multi_reduction <add>, %117, %cst_66 [2] : vector<2x8x32xf32> to vector<2x8xf32>
    %123 = vector.shape_cast %122 : vector<2x8xf32> to vector<2x8x1xf32>
    %cst_67 = arith.constant 3.200000e+01 : f32
    %124 = vector.broadcast %cst_67 : f32 to vector<2x8x1xf32>
    %125 = arith.divf %123, %124 : vector<2x8x1xf32>
    %126 = vector.broadcast %125 : vector<2x8x1xf32> to vector<2x8x32xf32>
    %127 = arith.subf %117, %126 : vector<2x8x32xf32>
    %128 = arith.mulf %127, %127 : vector<2x8x32xf32>
    %cst_68 = arith.constant dense<0.000000e+00> : vector<2x8xf32>
    %129 = vector.multi_reduction <add>, %128, %cst_68 [2] : vector<2x8x32xf32> to vector<2x8xf32>
    %130 = vector.shape_cast %129 : vector<2x8xf32> to vector<2x8x1xf32>
    %cst_69 = arith.constant 3.200000e+01 : f32
    %131 = vector.broadcast %cst_69 : f32 to vector<2x8x1xf32>
    %132 = arith.divf %130, %131 : vector<2x8x1xf32>
    %133 = vector.broadcast %125 : vector<2x8x1xf32> to vector<2x8x32xf32>
    %134 = arith.subf %117, %133 : vector<2x8x32xf32>
    %cst_70 = arith.constant 9.99999974E-6 : f32
    %135 = vector.broadcast %cst_70 : f32 to vector<2x8x1xf32>
    %136 = arith.addf %132, %135 : vector<2x8x1xf32>
    %137 = math.rsqrt %136 : vector<2x8x1xf32>
    %138 = vector.broadcast %137 : vector<2x8x1xf32> to vector<2x8x32xf32>
    %139 = arith.mulf %134, %138 : vector<2x8x32xf32>
    %140 = vector.shape_cast %119 : vector<32xf32> to vector<1x1x32xf32>
    %141 = vector.broadcast %140 : vector<1x1x32xf32> to vector<2x8x32xf32>
    %142 = arith.mulf %139, %141 : vector<2x8x32xf32>
    %143 = vector.shape_cast %121 : vector<32xf32> to vector<1x1x32xf32>
    %144 = vector.broadcast %143 : vector<1x1x32xf32> to vector<2x8x32xf32>
    %145 = arith.addf %142, %144 : vector<2x8x32xf32>
    %146 = vector.shape_cast %145 : vector<2x8x32xf32> to vector<16x32xf32>
    %147 = arith.truncf %146 : vector<16x32xf32> to vector<16x32xbf16>
    %c0_71 = arith.constant 0 : index
    %c0_72 = arith.constant 0 : index
    %c0_73 = arith.constant 0 : index
    %148 = vector.load %arg12[%c0_71, %c0_72, %c0_73] : memref<1x32x128xbf16, #tpu.memory_space<vmem>>, vector<1x32x128xbf16>
    %149 = vector.shape_cast %148 : vector<1x32x128xbf16> to vector<32x128xbf16>
    %cst_74 = arith.constant dense<0.000000e+00> : vector<16x128xf32>
    %150 = tpu.matmul %147, %149, %cst_74 {dimension_numbers = #tpu.dot_dimension_numbers<[1], [0], [0], [1], [0, 0, 1, 1], [], []>} : vector<16x32xbf16>, vector<32x128xbf16>, vector<16x128xf32> -> vector<16x128xf32>
    %c0_75 = arith.constant 0 : index
    %c0_76 = arith.constant 0 : index
    %c0_77 = arith.constant 0 : index
    %151 = vector.load %arg13[%c0_75, %c0_76, %c0_77] : memref<1x1x128xf32, #tpu.memory_space<vmem>>, vector<1x1x128xf32>
    %152 = vector.shape_cast %151 : vector<1x1x128xf32> to vector<128xf32>
    %153 = vector.shape_cast %152 : vector<128xf32> to vector<1x128xf32>
    %154 = vector.broadcast %153 : vector<1x128xf32> to vector<16x128xf32>
    %155 = arith.addf %150, %154 : vector<16x128xf32>
    %cst_78 = arith.constant 5.000000e-01 : f32
    %156 = vector.broadcast %cst_78 : f32 to vector<16x128xf32>
    %157 = arith.mulf %156, %155 : vector<16x128xf32>
    %cst_79 = arith.constant 0.707106769 : f32
    %158 = vector.broadcast %cst_79 : f32 to vector<16x128xf32>
    %159 = arith.mulf %155, %158 : vector<16x128xf32>
    %160 = math.erf %159 : vector<16x128xf32>
    %cst_80 = arith.constant 1.000000e+00 : f32
    %161 = vector.broadcast %cst_80 : f32 to vector<16x128xf32>
    %162 = arith.addf %161, %160 : vector<16x128xf32>
    %163 = arith.mulf %157, %162 : vector<16x128xf32>
    %164 = arith.truncf %163 : vector<16x128xf32> to vector<16x128xbf16>
    %c0_81 = arith.constant 0 : index
    %c0_82 = arith.constant 0 : index
    %c0_83 = arith.constant 0 : index
    %165 = vector.load %arg14[%c0_81, %c0_82, %c0_83] : memref<1x128x32xbf16, #tpu.memory_space<vmem>>, vector<1x128x32xbf16>
    %166 = vector.shape_cast %165 : vector<1x128x32xbf16> to vector<128x32xbf16>
    %cst_84 = arith.constant dense<0.000000e+00> : vector<16x32xf32>
    %167 = tpu.matmul %164, %166, %cst_84 {dimension_numbers = #tpu.dot_dimension_numbers<[1], [0], [0], [1], [0, 0, 1, 1], [], []>} : vector<16x128xbf16>, vector<128x32xbf16>, vector<16x32xf32> -> vector<16x32xf32>
    %c0_85 = arith.constant 0 : index
    %c0_86 = arith.constant 0 : index
    %c0_87 = arith.constant 0 : index
    %168 = vector.load %arg15[%c0_85, %c0_86, %c0_87] : memref<1x1x32xf32, #tpu.memory_space<vmem>>, vector<1x1x32xf32>
    %169 = vector.shape_cast %168 : vector<1x1x32xf32> to vector<32xf32>
    %170 = vector.shape_cast %169 : vector<32xf32> to vector<1x32xf32>
    %171 = vector.broadcast %170 : vector<1x32xf32> to vector<16x32xf32>
    %172 = arith.addf %167, %171 : vector<16x32xf32>
    %173 = vector.shape_cast %172 : vector<16x32xf32> to vector<2x8x32xf32>
    %174 = arith.addf %117, %173 : vector<2x8x32xf32>
    %c0_88 = arith.constant 0 : index
    %c0_89 = arith.constant 0 : index
    %c0_90 = arith.constant 0 : index
    %175 = vector.load %arg21[%c0_88, %c0_89, %c0_90] : memref<2x8x32xf32, #tpu.memory_space<vmem>>, vector<2x8x32xf32>
    tpu.vector_store %arg21[%c0_88, %c0_89, %c0_90], %174 {strides = array<i32>} : memref<2x8x32xf32, #tpu.memory_space<vmem>>, vector<2x8x32xf32>,
    %c1_i32 = arith.constant 1 : i32
    %176 = arith.cmpi eq, %arg1, %c1_i32 : i32
    %177 = arith.extui %176 : i1 to i32
    %c0_i32_91 = arith.constant 0 : i32
    %178 = arith.cmpi ne, %177, %c0_i32_91 : i32
    scf.if %178 {
      %179 = vector.extract_strided_slice %174 {offsets = [0, 4, 0], sizes = [2, 4, 32], strides = [1, 1, 1]} : vector<2x8x32xf32> to vector<2x4x32xf32>
      %c0_92 = arith.constant 0 : index
      %c0_93 = arith.constant 0 : index
      %180 = vector.load %arg16[%c0_92, %c0_93] : memref<1x32xf32, #tpu.memory_space<vmem>>, vector<1x32xf32>
      %181 = vector.shape_cast %180 : vector<1x32xf32> to vector<32xf32>
      %c0_94 = arith.constant 0 : index
      %c0_95 = arith.constant 0 : index
      %182 = vector.load %arg17[%c0_94, %c0_95] : memref<1x32xf32, #tpu.memory_space<vmem>>, vector<1x32xf32>
      %183 = vector.shape_cast %182 : vector<1x32xf32> to vector<32xf32>
      %cst_96 = arith.constant dense<0.000000e+00> : vector<2x4xf32>
      %184 = vector.multi_reduction <add>, %179, %cst_96 [2] : vector<2x4x32xf32> to vector<2x4xf32>
      %185 = vector.shape_cast %184 : vector<2x4xf32> to vector<2x4x1xf32>
      %cst_97 = arith.constant 3.200000e+01 : f32
      %186 = vector.broadcast %cst_97 : f32 to vector<2x4x1xf32>
      %187 = arith.divf %185, %186 : vector<2x4x1xf32>
      %188 = vector.broadcast %187 : vector<2x4x1xf32> to vector<2x4x32xf32>
      %189 = arith.subf %179, %188 : vector<2x4x32xf32>
      %190 = arith.mulf %189, %189 : vector<2x4x32xf32>
      %cst_98 = arith.constant dense<0.000000e+00> : vector<2x4xf32>
      %191 = vector.multi_reduction <add>, %190, %cst_98 [2] : vector<2x4x32xf32> to vector<2x4xf32>
      %192 = vector.shape_cast %191 : vector<2x4xf32> to vector<2x4x1xf32>
      %cst_99 = arith.constant 3.200000e+01 : f32
      %193 = vector.broadcast %cst_99 : f32 to vector<2x4x1xf32>
      %194 = arith.divf %192, %193 : vector<2x4x1xf32>
      %195 = vector.broadcast %187 : vector<2x4x1xf32> to vector<2x4x32xf32>
      %196 = arith.subf %179, %195 : vector<2x4x32xf32>
      %cst_100 = arith.constant 9.99999974E-6 : f32
      %197 = vector.broadcast %cst_100 : f32 to vector<2x4x1xf32>
      %198 = arith.addf %194, %197 : vector<2x4x1xf32>
      %199 = math.rsqrt %198 : vector<2x4x1xf32>
      %200 = vector.broadcast %199 : vector<2x4x1xf32> to vector<2x4x32xf32>
      %201 = arith.mulf %196, %200 : vector<2x4x32xf32>
      %202 = vector.shape_cast %181 : vector<32xf32> to vector<1x1x32xf32>
      %203 = vector.broadcast %202 : vector<1x1x32xf32> to vector<2x4x32xf32>
      %204 = arith.mulf %201, %203 : vector<2x4x32xf32>
      %205 = vector.shape_cast %183 : vector<32xf32> to vector<1x1x32xf32>
      %206 = vector.broadcast %205 : vector<1x1x32xf32> to vector<2x4x32xf32>
      %207 = arith.addf %204, %206 : vector<2x4x32xf32>
      %208 = vector.shape_cast %207 : vector<2x4x32xf32> to vector<8x32xf32>
      %209 = arith.truncf %208 : vector<8x32xf32> to vector<8x32xbf16>
      %c0_101 = arith.constant 0 : index
      %c0_102 = arith.constant 0 : index
      %210 = vector.load %arg18[%c0_101, %c0_102] : memref<32x128xbf16, #tpu.memory_space<vmem>>, vector<32x128xbf16>
      %cst_103 = arith.constant dense<0.000000e+00> : vector<8x128xf32>
      %211 = tpu.matmul %209, %210, %cst_103 {dimension_numbers = #tpu.dot_dimension_numbers<[1], [0], [0], [1], [0, 0, 1, 1], [], []>} : vector<8x32xbf16>, vector<32x128xbf16>, vector<8x128xf32> -> vector<8x128xf32>
      %c0_104 = arith.constant 0 : index
      %c0_105 = arith.constant 0 : index
      %212 = vector.load %arg19[%c0_104, %c0_105] : memref<1x128xf32, #tpu.memory_space<vmem>>, vector<1x128xf32>
      %213 = vector.shape_cast %212 : vector<1x128xf32> to vector<128xf32>
      %214 = vector.shape_cast %213 : vector<128xf32> to vector<1x128xf32>
      %215 = vector.broadcast %214 : vector<1x128xf32> to vector<8x128xf32>
      %216 = arith.addf %211, %215 : vector<8x128xf32>
      %217 = vector.shape_cast %216 : vector<8x128xf32> to vector<2x4x128xf32>
      %c0_106 = arith.constant 0 : index
      %c0_107 = arith.constant 0 : index
      %c0_108 = arith.constant 0 : index
      %218 = vector.load %arg20[%c0_106, %c0_107, %c0_108] : memref<2x4x128xf32, #tpu.memory_space<vmem>>, vector<2x4x128xf32>
      tpu.vector_store %arg20[%c0_106, %c0_107, %c0_108], %217 {strides = array<i32>} : memref<2x4x128xf32, #tpu.memory_space<vmem>>, vector<2x4x128xf32>,
    } else {
    }
    return
  }
  func.func @transform_0(%arg0: i32, %arg1: i32) -> (i32, i32, i32) {
    %c0_i32 = arith.constant 0 : i32
    %c0_i32_0 = arith.constant 0 : i32
    %c0_i32_1 = arith.constant 0 : i32
    return %arg0, %c0_i32, %c0_i32_0 : i32, i32, i32
  }
  func.func @transform_1(%arg0: i32, %arg1: i32) -> (i32, i32, i32) {
    %c0_i32 = arith.constant 0 : i32
    %c0_i32_0 = arith.constant 0 : i32
    %c0_i32_1 = arith.constant 0 : i32
    return %arg1, %c0_i32, %c0_i32_0 : i32, i32, i32
  }
  func.func @transform_2(%arg0: i32, %arg1: i32) -> (i32, i32, i32) {
    %c0_i32 = arith.constant 0 : i32
    %c0_i32_0 = arith.constant 0 : i32
    %c0_i32_1 = arith.constant 0 : i32
    return %arg1, %c0_i32, %c0_i32_0 : i32, i32, i32
  }
  func.func @transform_3(%arg0: i32, %arg1: i32) -> (i32, i32, i32, i32) {
    %c0_i32 = arith.constant 0 : i32
    %c0_i32_0 = arith.constant 0 : i32
    %c0_i32_1 = arith.constant 0 : i32
    %c0_i32_2 = arith.constant 0 : i32
    return %arg1, %c0_i32, %c0_i32_0, %c0_i32_1 : i32, i32, i32, i32
  }
  func.func @transform_4(%arg0: i32, %arg1: i32) -> (i32, i32, i32, i32) {
    %c0_i32 = arith.constant 0 : i32
    %c0_i32_0 = arith.constant 0 : i32
    %c0_i32_1 = arith.constant 0 : i32
    %c0_i32_2 = arith.constant 0 : i32
    return %arg1, %c0_i32, %c0_i32_0, %c0_i32_1 : i32, i32, i32, i32
  }
  func.func @transform_5(%arg0: i32, %arg1: i32) -> (i32, i32, i32, i32) {
    %c0_i32 = arith.constant 0 : i32
    %c0_i32_0 = arith.constant 0 : i32
    %c0_i32_1 = arith.constant 0 : i32
    %c0_i32_2 = arith.constant 0 : i32
    return %arg1, %c0_i32, %c0_i32_0, %c0_i32_1 : i32, i32, i32, i32
  }
  func.func @transform_6(%arg0: i32, %arg1: i32) -> (i32, i32, i32, i32) {
    %c0_i32 = arith.constant 0 : i32
    %c0_i32_0 = arith.constant 0 : i32
    %c0_i32_1 = arith.constant 0 : i32
    %c0_i32_2 = arith.constant 0 : i32
    return %arg1, %c0_i32, %c0_i32_0, %c0_i32_1 : i32, i32, i32, i32
  }
  func.func @transform_7(%arg0: i32, %arg1: i32) -> (i32, i32, i32) {
    %c0_i32 = arith.constant 0 : i32
    %c0_i32_0 = arith.constant 0 : i32
    %c0_i32_1 = arith.constant 0 : i32
    return %arg1, %c0_i32, %c0_i32_0 : i32, i32, i32
  }
  func.func @transform_8(%arg0: i32, %arg1: i32) -> (i32, i32, i32) {
    %c0_i32 = arith.constant 0 : i32
    %c0_i32_0 = arith.constant 0 : i32
    %c0_i32_1 = arith.constant 0 : i32
    return %arg1, %c0_i32, %c0_i32_0 : i32, i32, i32
  }
  func.func @transform_9(%arg0: i32, %arg1: i32) -> (i32, i32, i32) {
    %c0_i32 = arith.constant 0 : i32
    %c0_i32_0 = arith.constant 0 : i32
    %c0_i32_1 = arith.constant 0 : i32
    return %arg1, %c0_i32, %c0_i32_0 : i32, i32, i32
  }
  func.func @transform_10(%arg0: i32, %arg1: i32) -> (i32, i32, i32) {
    %c0_i32 = arith.constant 0 : i32
    %c0_i32_0 = arith.constant 0 : i32
    %c0_i32_1 = arith.constant 0 : i32
    return %arg1, %c0_i32, %c0_i32_0 : i32, i32, i32
  }
  func.func @transform_11(%arg0: i32, %arg1: i32) -> (i32, i32, i32) {
    %c0_i32 = arith.constant 0 : i32
    %c0_i32_0 = arith.constant 0 : i32
    %c0_i32_1 = arith.constant 0 : i32
    return %arg1, %c0_i32, %c0_i32_0 : i32, i32, i32
  }
  func.func @transform_12(%arg0: i32, %arg1: i32) -> (i32, i32, i32) {
    %c0_i32 = arith.constant 0 : i32
    %c0_i32_0 = arith.constant 0 : i32
    %c0_i32_1 = arith.constant 0 : i32
    return %arg1, %c0_i32, %c0_i32_0 : i32, i32, i32
  }
  func.func @transform_13(%arg0: i32, %arg1: i32) -> (i32, i32, i32) {
    %c0_i32 = arith.constant 0 : i32
    %c0_i32_0 = arith.constant 0 : i32
    %c0_i32_1 = arith.constant 0 : i32
    return %arg1, %c0_i32, %c0_i32_0 : i32, i32, i32
  }
  func.func @transform_14(%arg0: i32, %arg1: i32) -> (i32, i32) {
    %c0_i32 = arith.constant 0 : i32
    %c0_i32_0 = arith.constant 0 : i32
    %c0_i32_1 = arith.constant 0 : i32
    return %c0_i32, %c0_i32_0 : i32, i32
  }
  func.func @transform_15(%arg0: i32, %arg1: i32) -> (i32, i32) {
    %c0_i32 = arith.constant 0 : i32
    %c0_i32_0 = arith.constant 0 : i32
    %c0_i32_1 = arith.constant 0 : i32
    return %c0_i32, %c0_i32_0 : i32, i32
  }
  func.func @transform_16(%arg0: i32, %arg1: i32) -> (i32, i32) {
    %c0_i32 = arith.constant 0 : i32
    %c0_i32_0 = arith.constant 0 : i32
    %c0_i32_1 = arith.constant 0 : i32
    return %c0_i32, %c0_i32_0 : i32, i32
  }
  func.func @transform_17(%arg0: i32, %arg1: i32) -> (i32, i32) {
    %c0_i32 = arith.constant 0 : i32
    %c0_i32_0 = arith.constant 0 : i32
    %c0_i32_1 = arith.constant 0 : i32
    return %c0_i32, %c0_i32_0 : i32, i32
  }
  func.func @transform_18(%arg0: i32, %arg1: i32) -> (i32, i32, i32) {
    %c0_i32 = arith.constant 0 : i32
    %c0_i32_0 = arith.constant 0 : i32
    %c0_i32_1 = arith.constant 0 : i32
    return %arg0, %c0_i32, %c0_i32_0 : i32, i32, i32
  }
}

</mosaic_0001>

<bundles_post_ra>
// kernel: tpu_custom_call.1
= control target key start
LH: loop header
LB: loop body
LE: loop exit
PB: predicated region body
PF: predicated region fallthrough
CT: control target
= control target key end

     0   :  { %s7263_s0 = inlined_call_operand.hbm [shape: f32[2,8,32], index: 0, kind: input, shape index: {}]   ;;  %s7264_s1 = inlined_call_operand.hbm [shape: f32[2,1,32], index: 1, kind: input, shape index: {}]   ;;  %s7265_s2 = inlined_call_operand.hbm [shape: f32[2,1,32], index: 2, kind: input, shape index: {}]   ;;  %s7266_s3 = inlined_call_operand.hbm [shape: bf16[2,4,32,8], index: 3, kind: input, shape index: {}]   ;;  %s7267_s4 = inlined_call_operand.hbm [shape: bf16[2,4,32,8], index: 4, kind: input, shape index: {}]   ;;  %s7268_s5 = inlined_call_operand.hbm [shape: bf16[2,4,32,8], index: 5, kind: input, shape index: {}]   ;;  %s7269_s6 = inlined_call_operand.hbm [shape: bf16[2,4,8,32], index: 6, kind: input, shape index: {}]   ;;  %s7270_s7 = inlined_call_operand.hbm [shape: f32[2,1,32], index: 7, kind: input, shape index: {}]   ;;  %s7271_s8 = inlined_call_operand.hbm [shape: f32[2,1,32], index: 8, kind: input, shape index: {}]   ;;  %s7272_s9 = inlined_call_operand.hbm [shape: f32[2,1,32], index: 9, kind: input, shape index: {}]   ;;  %s7273_s10 = inlined_call_operand.hbm [shape: bf16[2,32,128], index: 10, kind: input, shape index: {}]   ;;  %s7274_s11 = inlined_call_operand.hbm [shape: f32[2,1,128], index: 11, kind: input, shape index: {}]   ;;  %s7275_s12 = inlined_call_operand.hbm [shape: bf16[2,128,32], index: 12, kind: input, shape index: {}]   ;;  %s7276_s13 = inlined_call_operand.hbm [shape: f32[2,1,32], index: 13, kind: input, shape index: {}]   ;;  %s7277_s14 = inlined_call_operand.hbm [shape: f32[1,32], index: 14, kind: input, shape index: {}]   ;;  %s7278_s15 = inlined_call_operand.hbm [shape: f32[1,32], index: 15, kind: input, shape index: {}]   ;;  %s7279_s16 = inlined_call_operand.hbm [shape: bf16[32,128], index: 16, kind: input, shape index: {}]   ;;  %s7280_s17 = inlined_call_operand.hbm [shape: f32[1,128], index: 17, kind: input, shape index: {}]   ;;  %s7281_s18 = inlined_call_operand.hbm [shape: f32[2,4,128], index: 18, kind: output, shape index: {}]  }
   0x1   :  { %7324 = sst [smem:[#allocation54_spill]] %s7263_s0 }
   0x2   :  { %7325 = sst [smem:[#allocation55_spill]] %s7264_s1 }
   0x3   :  { %7326 = sst [smem:[#allocation56_spill]] %s7265_s2 }
   0x4   :  { %7327 = sst [smem:[#allocation57_spill]] %s7266_s3 }
   0x5   :  { %7328 = sst [smem:[#allocation58_spill]] %s7268_s5 }
   0x6   :  { %7329 = sst [smem:[#allocation59_spill]] %s7270_s7 }
   0x7   :  { %7330 = sst [smem:[#allocation60_spill]] %s7271_s8 }
   0x8   :  { %7331 = sst [smem:[#allocation61_spill]] %s7272_s9 }
   0x9   :  { %7332 = sst [smem:[#allocation62_spill]] %s7273_s10 }
   0xa   :  { %7333 = sst [smem:[#allocation63_spill]] %s7274_s11 }
   0xb   :  { %7334 = sst [smem:[#allocation64_spill]] %s7275_s12 }
   0xc   :  { %7335 = sst [smem:[#allocation65_spill]] %s7276_s13 }
   0xd   :  { %7336 = sst [smem:[#allocation66_spill]] %s7277_s14 }
   0xe   :  { %7337 = sst [smem:[#allocation67_spill]] %s7278_s15 }
   0xf   :  { %7338 = sst [smem:[#allocation68_spill]] %s7281_s18 }
  0x10   :  { %23 = vsyncpa [#allocation4], 0 }
  0x11   :  { %24 = vsyncpa [#allocation7], 0 }
  0x12   :  { %26 = vsyncpa [#allocation7 + $0x1], 0 }
  0x13   :  { %27 = vsyncpa [#allocation10], 0 }
  0x14   :  { %29 = vsyncpa [#allocation10 + $0x1], 0 }
  0x15   :  { %30 = vsyncpa [#allocation13], 0 }
  0x16   :  { %32 = vsyncpa [#allocation13 + $0x1], 0 }
  0x17   :  { %33 = vsyncpa [#allocation16], 0 }
  0x18   :  { %35 = vsyncpa [#allocation16 + $0x1], 0 }
  0x19   :  { %36 = vsyncpa [#allocation19], 0 }
  0x1a   :  { %38 = vsyncpa [#allocation19 + $0x1], 0 }
  0x1b   :  { %39 = vsyncpa [#allocation22], 0 }
  0x1c   :  { %41 = vsyncpa [#allocation22 + $0x1], 0 }
  0x1d   :  { %42 = vsyncpa [#allocation25], 0 }
  0x1e   :  { %44 = vsyncpa [#allocation25 + $0x1], 0 }
  0x1f   :  { %45 = vsyncpa [#allocation28], 0 }
  0x20   :  { %46 = vsyncpa [#allocation31], 0 }
  0x21   :  { %47 = vsyncpa [#allocation5], 0  ;;  %s6011_s27 = smov 0   ;;  %s6013_s28 = smov 0  }
  0x22   :  { %s6015_s29 = smov 0   ;;  %s6017_s30 = smov 0  }
  0x23   :  { %s6019_s0 = smov 0   ;;  %s6021_s19 = smov 0  }
  0x24 LB: > { %7339 = sst [smem:[#allocation45_spill]] %s5869_s28  ;;  %s6040_s1 = sadd.s32 4294967295, %s5885_s19   ;;  %s5885_s19 = sphi %s6021_s19, %s53_s19   ;;  %s5881_s0 = sphi %s6019_s0, %s7415_s0   ;;  %s5877_s30 = sphi %s6017_s30, %s7414_s30   ;;  %s5873_s29 = sphi %s6015_s29, %s7412_s29   ;;  %s5869_s28 = sphi %s6013_s28, %s7411_s28   ;;  %s5865_s27 = sphi %s6011_s27, %s7410_s27  }
  0x25   : > { %7340 = sst [smem:[#allocation46_spill]] %s5873_s29  ;;  %p105_p0 = scmp.ne.s32.totalorder %s5873_s29, %s5869_s28 }
  0x26   : > { %7341 = sst [smem:[#allocation47_spill]] %s5877_s30  ;;  %p106_p1 = scmp.eq.s32.totalorder %s5885_s19, 0 }
  0x27   : > { %7342 = sst [smem:[#allocation48_spill]] %s5885_s19  ;;  %p111_p2 = scmp.ne.s32.totalorder %s5869_s28, %s5865_s27 }
  0x28   : > { %7343 = sst [smem:[#allocation49_spill]] %s6040_s1  ;;  %p7293_p3 = scmp.eq.s32.totalorder %s6040_s1, 0 }
  0x29   : > { %p107_p4 = por %p106_p1, %p105_p0  ;;  %p4307_p5 = scmp.ge.s32.totalorder %s5885_s19, 1 }
  0x2a   : > { %p6051_p6 = por %p7293_p3, %p111_p2  ;;  %p544_p7 = scmp.lt.s32.totalorder %s5885_s19, 3 }
  0x2b   : > { %s5887_s2 = smov [#allocation26]   ;;  %p5078_p10 = scmp.lt.s32.totalorder %s5885_s19, 2 }
  0x2c   : > { %s7344_s21 = scalar_select %p6051_p6, 1, 0 }
  0x2d   : > { %p6056_p8 = pnand %p4307_p5, %p544_p7  ;;  %s573_s23 = sshll.u32 %s5887_s2, 4  ;;  %s574_s23 = int_to_ptr.vmem [resolvable:$true] %s573_s23 }
  0x2e   : > { %7345 = sst [smem:[#allocation50_spill]] %s7344_s21  ;;  %p6069_p12 = pnand %p5078_p10, %p107_p4 }
  0x2f   : > { %s7346_s22 = scalar_select %p6056_p8, 1, 0 }
  0x30   : > { %p5017_p9 = pneg %p6056_p8  ;;  %s5888_s26 = smov [#allocation27]  }
  0x31   : > { %7347 = sst [smem:[#allocation51_spill]] %s7346_s22  ;;  %s584_s27 = sshll.u32 %s5888_s26, 4  ;;  %s585_s27 = int_to_ptr.vmem [resolvable:$true] %s584_s27 }
  0x32   : > { %p6065_p11 = pnand %p5017_p9, %p7293_p3  ;;  %s7350_s14 = sld [smem:[#allocation66_spill]] }
  0x33   : > { %s7349_s25 = scalar_select %p6069_p12, 1, 0 }
  0x34   : > { %s7348_s24 = scalar_select %p6065_p11, 1, 0 }
  0x35   : > { %p6081_p0 = pneg %p6065_p11 }
  0x37   : > { %s7351_s28 = scalar_select %p6081_p0, 1, 0 }
  0x38   : > { %s5235_s2 = scalar_lea.hbm %s7350_s14, 16 }
  0x39   : > { %p5236_p13 = scmp.ne.s32.totalorder %s7350_s14, %s5235_s2  ;;  %p5242_p4 = scmp.lt.u32.totalorder %s5235_s2, %s7350_s14 }
  0x3b   : > { %p5238_p1 = pnand %p6081_p0, %p5236_p13 }
  0x3d   : > { %p5239_p2 = pneg %p5238_p1 }
  0x3f   : > { %p5244_p5 = pnand %p5242_p4, %p5239_p2 }
  0x41   : > { %5247 = shalt.err (!%p5244_p5)
}
  0x42   : > { %s5248_s18 = scalar_lea.vmem %s574_s23, 16  ;;  %s5255_s30 = scalar_lea.vmem %s574_s23, 32 }
  0x43   : > { %p5249_p7 = scmp.ne.s32.totalorder %s574_s23, %s5248_s18  ;;  %p5256_p3 = scmp.lt.s32.totalorder %s574_s23, %s574_s23 }
  0x44   : > { %p5257_p6 = scmp.lt.s32.totalorder %s5255_s30, %s5248_s18 }
  0x45   : > { %p5251_p9 = pnand %p5249_p7, %p6081_p0 }
  0x46   : > { %p5258_p8 = por %p5257_p6, %p5256_p3 }
  0x47   : > { %p5252_p10 = pneg %p5251_p9 }
  0x49   : > { %p5259_p12 = pnand %p5258_p8, %p5252_p10 }
  0x4b   : > { %5262 = shalt.err (!%p5259_p12)
}
  0x4c   : > { %5023 = dma.hbm_to_vmem [thread:$0]  (!%p6065_p11), %s7350_s14, 16, %s574_s23, [#allocation25]  }
  0x4d   : > { %s62_s1 = sadd.s32 1, %s5881_s0  ;;  %s7352_s15 = sld [smem:[#allocation67_spill]] }
  0x53   : > { %s5263_s2 = scalar_lea.hbm %s7352_s15, 16 }
  0x54   : > { %p5264_p3 = scmp.ne.s32.totalorder %s7352_s15, %s5263_s2  ;;  %p5270_p12 = scmp.lt.u32.totalorder %s5263_s2, %s7352_s15 }
  0x56   : > { %p5266_p6 = pnand %p5264_p3, %p6081_p0 }
  0x58   : > { %p5267_p8 = pneg %p5266_p6 }
  0x5a   : > { %p5272_p13 = pnand %p5270_p12, %p5267_p8 }
  0x5c   : > { %5275 = shalt.err (!%p5272_p13)
}
  0x5d   : > { %s5276_s23 = scalar_lea.vmem %s585_s27, 16  ;;  %s5283_s20 = scalar_lea.vmem %s585_s27, 32 }
  0x5e   : > { %p5277_p1 = scmp.ne.s32.totalorder %s585_s27, %s5276_s23  ;;  %p5284_p5 = scmp.lt.s32.totalorder %s585_s27, %s585_s27 }
  0x5f   : > { %p5285_p7 = scmp.lt.s32.totalorder %s5283_s20, %s5276_s23 }
  0x60   : > { %p5279_p2 = pnand %p5277_p1, %p6081_p0 }
  0x61   : > { %p5286_p9 = por %p5285_p7, %p5284_p5 }
  0x62   : > { %p5280_p4 = pneg %p5279_p2 }
  0x64   : > { %p5287_p10 = pnand %p5286_p9, %p5280_p4 }
  0x66   : > { %5290 = shalt.err (!%p5287_p10)
}
  0x67   : > { %5026 = dma.hbm_to_vmem [thread:$0]  (!%p6065_p11), %s7352_s15, 16, %s585_s27, [#allocation28]  }
  0x68   : > { %p63_p3 = scmp.ge.s32.totalorder %s62_s1, 2  ;;  %s6117_s21 = sand.u32 1, %s5885_s19  }
  0x69   : > { %s6120_s22 = sand.u32 1, %s5873_s29   ;;  %s6125_s26 = sshll.u32 %s5881_s0, 4 }
  0x6a   : > { %s7417_s1 = smov (%p63_p3, %s62_s1), 0  ;;  %s7354_s23 = sld [smem:[#allocation55_spill]] }
  0x6b   : > { %7353 = sst [smem:[#allocation52_spill]] %s7417_s1  ;;  %s95_s2 = ssub.s32 %s5881_s0, %s7417_s1 }
  0x6c   : > { %p96_p6 = scmp.eq.s32.totalorder %s95_s2, 0  ;;  %s622_s27 = scalar_lea.vmem [#allocation6], %s6120_s22 }
  0x6d   : > { %s629_s12 = sshll.u32 %s622_s27, 4  ;;  %s7355_s13 = sadd.s32 1, %s5873_s29  ;;  %s6136_s12 = int_to_ptr.vmem [resolvable:$true] %s629_s12 }
  0x6e   : > { %s6141_s14 = scalar_select %p96_p6, %s5873_s29, %s7355_s13  }
  0x6f   : > { %s7306_s15 = scalar_lea.sflag [#allocation7], %s6117_s21  ;;  %p7357_p12 = scmp.ne.s32.totalorder %s7349_s25, 0 }
  0x70   : > { %s6133_s20 = scalar_lea.hbm %s7354_s23, %s6125_s26  ;;  %7356 = sst [smem:[#allocation53_spill]] %s6141_s14 }
  0x71   : > { %s5291_s19 = scalar_lea.hbm %s6133_s20, 16  ;;  %p6148_p13 = pneg %p7357_p12 }
  0x72   : > { %p5292_p8 = scmp.ne.s32.totalorder %s6133_s20, %s5291_s19  ;;  %s5296_s27 = scalar_lea.hbm %s7354_s23, 32 }
  0x73   : > { %s7358_s18 = scalar_select %p6148_p13, 1, 0 }
  0x74   : > { %p5294_p1 = pnand %p6148_p13, %p5292_p8  ;;  %p5297_p4 = scmp.lt.u32.totalorder %s6133_s20, %s7354_s23 }
  0x75   : > { %p5298_p5 = scmp.lt.u32.totalorder %s5296_s27, %s5291_s19  ;;  %p5300_p9 = scmp.lt.u32.totalorder %s5291_s19, %s6133_s20 }
  0x76   : > { %p5295_p2 = pneg %p5294_p1 }
  0x77   : > { %p5299_p7 = por %p5298_p5, %p5297_p4 }
  0x79   : > { %p5301_p10 = por %p5300_p9, %p5299_p7 }
  0x7b   : > { %p5302_p3 = pnand %p5301_p10, %p5295_p2 }
  0x7d   : > { %5305 = shalt.err (!%p5302_p3)
}
  0x7e   : > { %s5306_s13 = scalar_lea.vmem %s6136_s12, 16  ;;  %s5889_s2 = smov [#allocation6]  }
  0x7f   : > { %p5307_p6 = scmp.ne.s32.totalorder %s6136_s12, %s5306_s13  ;;  %s5311_s30 = sshll.u32 %s5889_s2, 4  ;;  %s5312_s30 = int_to_ptr.vmem [resolvable:$false] %s5311_s30 }
  0x80   : > { %s5313_s10 = scalar_lea.vmem %s5312_s30, 32  ;;  %p5314_p11 = scmp.lt.s32.totalorder %s6136_s12, %s5312_s30 }
  0x81   : > { %p5309_p8 = pnand %p5307_p6, %p6148_p13  ;;  %p5315_p0 = scmp.lt.s32.totalorder %s5313_s10, %s5306_s13 }
  0x83   : > { %p5310_p1 = pneg %p5309_p8  ;;  %p5316_p4 = por %p5315_p0, %p5314_p11 }
  0x85   : > { %p5317_p5 = pnand %p5316_p4, %p5310_p1 }
  0x87   : > { %5320 = shalt.err (!%p5317_p5)
}
  0x88   : > { %5036 = dma.hbm_to_vmem [thread:$0]  (!%p7357_p12), %s6133_s20, 16, %s6136_s12, %s7306_s15  }
  0x89   : > { %s6174_s19 = sshll.u32 %s6120_s22, 6  ;;  %s6177_s1 = sshll.u32 %s5881_s0, 10 }
  0x8a   : > { %s7359_s3 = sld [smem:[#allocation57_spill]]  ;;  %s657_s30 = scalar_lea.vmem [#allocation9], %s6174_s19 }
  0x8b   : > { %s664_s10 = sshll.u32 %s657_s30, 4  ;;  %s7309_s20 = scalar_lea.sflag [#allocation10], %s6117_s21  ;;  %s6186_s10 = int_to_ptr.vmem [resolvable:$true] %s664_s10 }
  0x90   : > { %s6183_s2 = scalar_lea.hbm %s7359_s3, %s6177_s1  ;;  %s5326_s27 = scalar_lea.hbm %s7359_s3, 2048 }
  0x91   : > { %s5321_s12 = scalar_lea.hbm %s6183_s2, 1024  ;;  %p5327_p7 = scmp.lt.u32.totalorder %s6183_s2, %s7359_s3 }
  0x92   : > { %p5322_p11 = scmp.ne.s32.totalorder %s6183_s2, %s5321_s12  ;;  %p5328_p9 = scmp.lt.u32.totalorder %s5326_s27, %s5321_s12 }
  0x93   : > { %p5330_p3 = scmp.lt.u32.totalorder %s5321_s12, %s6183_s2 }
  0x94   : > { %p5324_p0 = pnand %p5322_p11, %p6148_p13  ;;  %p5329_p10 = por %p5328_p9, %p5327_p7 }
  0x96   : > { %p5325_p2 = pneg %p5324_p0  ;;  %p5331_p6 = por %p5330_p3, %p5329_p10 }
  0x98   : > { %p5332_p8 = pnand %p5331_p6, %p5325_p2 }
  0x9a   : > { %5335 = shalt.err (!%p5332_p8)
}
  0x9b   : > { %s5336_s30 = scalar_lea.vmem %s6186_s10, 1024  ;;  %s5890_s15 = smov [#allocation9]  }
  0x9c   : > { %p5337_p1 = scmp.ne.s32.totalorder %s6186_s10, %s5336_s30  ;;  %s5341_s23 = sshll.u32 %s5890_s15, 4  ;;  %s5342_s23 = int_to_ptr.vmem [resolvable:$false] %s5341_s23 }
  0x9d   : > { %s5343_s14 = scalar_lea.vmem %s5342_s23, 2048  ;;  %p5344_p11 = scmp.lt.s32.totalorder %s6186_s10, %s5342_s23 }
  0x9e   : > { %p5339_p4 = pnand %p5337_p1, %p6148_p13  ;;  %p5345_p0 = scmp.lt.s32.totalorder %s5343_s14, %s5336_s30 }
  0xa0   : > { %p5340_p5 = pneg %p5339_p4  ;;  %p5346_p7 = por %p5345_p0, %p5344_p11 }
  0xa2   : > { %p5347_p9 = pnand %p5346_p7, %p5340_p5 }
  0xa4   : > { %5350 = shalt.err (!%p5347_p9)
}
  0xa5   : > { %s7311_s12 = smov 64   ;;  %s7316_s27 = smov 4  }
  0xa6   : > { %5042 = dma.hbm_to_vmem [thread:$0]  (!%p7357_p12), %s6183_s2, 1024, %s6186_s10, %s7309_s20, %s7311_s12, %s7311_s12, %s7316_s27  }
  0xa7   : > { %s7360_s5 = sld [smem:[#allocation58_spill]]  ;;  %s699_s23 = scalar_lea.vmem [#allocation12], %s6174_s19 }
  0xa8   : > { %s706_s14 = sshll.u32 %s699_s23, 4  ;;  %s7310_s3 = scalar_lea.sflag [#allocation13], %s6117_s21  ;;  %s6222_s14 = int_to_ptr.vmem [resolvable:$true] %s706_s14 }
  0xad   : > { %s6219_s15 = scalar_lea.hbm %s7360_s5, %s6177_s1  ;;  %s5356_s13 = scalar_lea.hbm %s7360_s5, 2048 }
  0xae   : > { %s5351_s29 = scalar_lea.hbm %s6219_s15, 1024  ;;  %p5357_p6 = scmp.lt.u32.totalorder %s6219_s15, %s7360_s5 }
  0xaf   : > { %p5352_p2 = scmp.ne.s32.totalorder %s6219_s15, %s5351_s29  ;;  %p5358_p8 = scmp.lt.u32.totalorder %s5356_s13, %s5351_s29 }
  0xb0   : > { %p5360_p4 = scmp.lt.u32.totalorder %s5351_s29, %s6219_s15 }
  0xb1   : > { %p5354_p10 = pnand %p5352_p2, %p6148_p13  ;;  %p5359_p1 = por %p5358_p8, %p5357_p6 }
  0xb3   : > { %p5355_p3 = pneg %p5354_p10  ;;  %p5361_p5 = por %p5360_p4, %p5359_p1 }
  0xb5   : > { %p5362_p11 = pnand %p5361_p5, %p5355_p3 }
  0xb7   : > { %5365 = shalt.err (!%p5362_p11)
}
  0xb8   : > { %s5366_s23 = scalar_lea.vmem %s6222_s14, 1024  ;;  %s5893_s2 = smov [#allocation12]  }
  0xb9   : > { %p5367_p0 = scmp.ne.s32.totalorder %s6222_s14, %s5366_s23  ;;  %s5371_s10 = sshll.u32 %s5893_s2, 4  ;;  %s5372_s10 = int_to_ptr.vmem [resolvable:$false] %s5371_s10 }
  0xba   : > { %s5373_s20 = scalar_lea.vmem %s5372_s10, 2048  ;;  %p5374_p2 = scmp.lt.s32.totalorder %s6222_s14, %s5372_s10 }
  0xbb   : > { %p5369_p7 = pnand %p5367_p0, %p6148_p13  ;;  %p5375_p10 = scmp.lt.s32.totalorder %s5373_s20, %s5366_s23 }
  0xbd   : > { %p5370_p9 = pneg %p5369_p7  ;;  %p5376_p6 = por %p5375_p10, %p5374_p2 }
  0xbf   : > { %p5377_p8 = pnand %p5376_p6, %p5370_p9 }
  0xc1   : > { %5380 = shalt.err (!%p5377_p8)
}
  0xc2   : > { %5048 = dma.hbm_to_vmem [thread:$0]  (!%p7357_p12), %s6219_s15, 1024, %s6222_s14, %s7310_s3, %s7311_s12, %s7311_s12, %s7316_s27  }
  0xc3   : > { %s7361_s7 = sld [smem:[#allocation59_spill]]  ;;  %s740_s23 = scalar_lea.vmem [#allocation15], %s6120_s22 }
  0xc4   : > { %s747_s2 = sshll.u32 %s740_s23, 4  ;;  %s7314_s10 = scalar_lea.sflag [#allocation16], %s6117_s21  ;;  %s748_s2 = int_to_ptr.vmem [resolvable:$true] %s747_s2 }
  0xc9   : > { %s6255_s30 = scalar_lea.hbm %s7361_s7, %s6125_s26  ;;  %s5386_s14 = scalar_lea.hbm %s7361_s7, 32 }
  0xca   : > { %s5381_s20 = scalar_lea.hbm %s6255_s30, 16  ;;  %p5387_p5 = scmp.lt.u32.totalorder %s6255_s30, %s7361_s7 }
  0xcb   : > { %p5382_p3 = scmp.ne.s32.totalorder %s6255_s30, %s5381_s20  ;;  %p5388_p11 = scmp.lt.u32.totalorder %s5386_s14, %s5381_s20 }
  0xcc   : > { %p5390_p7 = scmp.lt.u32.totalorder %s5381_s20, %s6255_s30 }
  0xcd   : > { %p5384_p1 = pnand %p5382_p3, %p6148_p13  ;;  %p5389_p0 = por %p5388_p11, %p5387_p5 }
  0xcf   : > { %p5385_p4 = pneg %p5384_p1  ;;  %p5391_p9 = por %p5390_p7, %p5389_p0 }
  0xd1   : > { %p5392_p2 = pnand %p5391_p9, %p5385_p4 }
  0xd3   : > { %5395 = shalt.err (!%p5392_p2)
}
  0xd4   : > { %s5396_s23 = scalar_lea.vmem %s748_s2, 16  ;;  %s5894_s3 = smov [#allocation15]  }
  0xd5   : > { %p5397_p10 = scmp.ne.s32.totalorder %s748_s2, %s5396_s23  ;;  %s5401_s12 = sshll.u32 %s5894_s3, 4  ;;  %s5402_s12 = int_to_ptr.vmem [resolvable:$false] %s5401_s12 }
  0xd6   : > { %s5403_s5 = scalar_lea.vmem %s5402_s12, 32  ;;  %p5404_p3 = scmp.lt.s32.totalorder %s748_s2, %s5402_s12 }
  0xd7   : > { %p5399_p6 = pnand %p5397_p10, %p6148_p13  ;;  %p5405_p1 = scmp.lt.s32.totalorder %s5403_s5, %s5396_s23 }
  0xd9   : > { %p5400_p8 = pneg %p5399_p6  ;;  %p5406_p12 = por %p5405_p1, %p5404_p3 }
  0xdb   : > { %p5407_p5 = pnand %p5406_p12, %p5400_p8 }
  0xdd   : > { %5410 = shalt.err (!%p5407_p5)
}
  0xde   : > { %p7362_p11 = scmp.ne.s32.totalorder %s7349_s25, 0  ;;  %s7363_s9 = sld [smem:[#allocation61_spill]] }
  0xdf   : > { %s774_s12 = scalar_lea.vmem [#allocation18], %s6120_s22  ;;  %s7315_s29 = scalar_lea.sflag [#allocation19], %s6117_s21 }
  0xe0   : > { %5054 = dma.hbm_to_vmem [thread:$0]  (!%p7362_p11), %s6255_s30, 16, %s748_s2, %s7314_s10  }
  0xe1   : > { %s781_s14 = sshll.u32 %s774_s12, 4  ;;  %s782_s14 = int_to_ptr.vmem [resolvable:$true] %s781_s14 }
  0xe4   : > { %s6282_s3 = scalar_lea.hbm %s7363_s9, %s6125_s26  ;;  %s5416_s2 = scalar_lea.hbm %s7363_s9, 32 }
  0xe5   : > { %s5411_s13 = scalar_lea.hbm %s6282_s3, 16  ;;  %p5417_p7 = scmp.lt.u32.totalorder %s6282_s3, %s7363_s9 }
  0xe6   : > { %p5412_p12 = scmp.ne.s32.totalorder %s6282_s3, %s5411_s13  ;;  %p5418_p9 = scmp.lt.u32.totalorder %s5416_s2, %s5411_s13 }
  0xe7   : > { %p5420_p10 = scmp.lt.u32.totalorder %s5411_s13, %s6282_s3 }
  0xe8   : > { %p5414_p4 = pnand %p5412_p12, %p6148_p13  ;;  %p5419_p2 = por %p5418_p9, %p5417_p7 }
  0xea   : > { %p5415_p0 = pneg %p5414_p4  ;;  %p5421_p6 = por %p5420_p10, %p5419_p2 }
  0xec   : > { %p5422_p8 = pnand %p5421_p6, %p5415_p0 }
  0xee   : > { %5425 = shalt.err (!%p5422_p8)
}
  0xef   : > { %s5426_s15 = scalar_lea.vmem %s782_s14, 16  ;;  %s5895_s12 = smov [#allocation18]  }
  0xf0   : > { %p5427_p3 = scmp.ne.s32.totalorder %s782_s14, %s5426_s15  ;;  %s5431_s10 = sshll.u32 %s5895_s12, 4  ;;  %s5432_s10 = int_to_ptr.vmem [resolvable:$false] %s5431_s10 }
  0xf1   : > { %s5433_s23 = scalar_lea.vmem %s5432_s10, 32  ;;  %p5434_p12 = scmp.lt.s32.totalorder %s782_s14, %s5432_s10 }
  0xf2   : > { %p5429_p1 = pnand %p5427_p3, %p6148_p13  ;;  %p5435_p4 = scmp.lt.s32.totalorder %s5433_s23, %s5426_s15 }
  0xf4   : > { %p5430_p5 = pneg %p5429_p1  ;;  %p5436_p11 = por %p5435_p4, %p5434_p12 }
  0xf6   : > { %p5437_p7 = pnand %p5436_p11, %p5430_p5 }
  0xf8   : > { %5440 = shalt.err (!%p5437_p7)
}
  0xf9   : > { %p7364_p9 = scmp.ne.s32.totalorder %s7349_s25, 0  ;;  %s7365_s11 = sld [smem:[#allocation63_spill]] }
  0xfa   : > { %s812_s10 = scalar_lea.vmem [#allocation21], %s6120_s22  ;;  %s7318_s20 = scalar_lea.sflag [#allocation22], %s6117_s21 }
  0xfb   : > { %5060 = dma.hbm_to_vmem [thread:$0]  (!%p7364_p9), %s6282_s3, 16, %s782_s14, %s7315_s29  }
  0xfc   : > { %s819_s5 = sshll.u32 %s812_s10, 4  ;;  %s820_s5 = int_to_ptr.vmem [resolvable:$true] %s819_s5 }
  0xff   : > { %s6309_s2 = scalar_lea.hbm %s7365_s11, %s6125_s26  ;;  %s5446_s14 = scalar_lea.hbm %s7365_s11, 32 }
 0x100   : > { %s5441_s15 = scalar_lea.hbm %s6309_s2, 16  ;;  %p5447_p10 = scmp.lt.u32.totalorder %s6309_s2, %s7365_s11 }
 0x101   : > { %p5442_p11 = scmp.ne.s32.totalorder %s6309_s2, %s5441_s15  ;;  %p5448_p6 = scmp.lt.u32.totalorder %s5446_s14, %s5441_s15 }
 0x102   : > { %p5450_p3 = scmp.lt.u32.totalorder %s5441_s15, %s6309_s2 }
 0x103   : > { %p5444_p0 = pnand %p5442_p11, %p6148_p13  ;;  %p5449_p8 = por %p5448_p6, %p5447_p10 }
 0x105   : > { %p5445_p2 = pneg %p5444_p0  ;;  %p5451_p1 = por %p5450_p3, %p5449_p8 }
 0x107   : > { %p5452_p5 = pnand %p5451_p1, %p5445_p2 }
 0x109   : > { %5455 = shalt.err (!%p5452_p5)
}
 0x10a   : > { %s5456_s30 = scalar_lea.vmem %s820_s5, 16  ;;  %s5896_s10 = smov [#allocation21]  }
 0x10b   : > { %p5457_p12 = scmp.ne.s32.totalorder %s820_s5, %s5456_s30  ;;  %s5461_s29 = sshll.u32 %s5896_s10, 4  ;;  %s5462_s29 = int_to_ptr.vmem [resolvable:$false] %s5461_s29 }
 0x10c   : > { %s5463_s12 = scalar_lea.vmem %s5462_s29, 32  ;;  %p5464_p11 = scmp.lt.s32.totalorder %s820_s5, %s5462_s29 }
 0x10d   : > { %p5459_p4 = pnand %p5457_p12, %p6148_p13  ;;  %p5465_p0 = scmp.lt.s32.totalorder %s5463_s12, %s5456_s30 }
 0x10f   : > { %p5460_p7 = pneg %p5459_p4  ;;  %p5466_p9 = por %p5465_p0, %p5464_p11 }
 0x111   : > { %p5467_p6 = pnand %p5466_p9, %p5460_p7 }
 0x113   : > { %5470 = shalt.err (!%p5467_p6)
}
 0x114   : > { %p7366_p10 = scmp.ne.s32.totalorder %s7349_s25, 0  ;;  %s5897_s15 = smov [#allocation3]  }
 0x115   : > { %s559_s3 = sshll.u32 %s5897_s15, 4  ;;  %s7367_s13 = sld [smem:[#allocation54_spill]]  ;;  %s560_s3 = int_to_ptr.vmem [resolvable:$true] %s559_s3 }
 0x116   : > { %5066 = dma.hbm_to_vmem [thread:$0]  (!%p7366_p10), %s6309_s2, 16, %s820_s5, %s7318_s20  }
 0x117   : > { %p7368_p9 = scmp.ne.s32.totalorder %s7351_s28, 0 }
 0x11b   : > { %s5471_s10 = scalar_lea.hbm %s7367_s13, 256 }
 0x11c   : > { %p5472_p2 = scmp.ne.s32.totalorder %s7367_s13, %s5471_s10  ;;  %p5478_p1 = scmp.lt.u32.totalorder %s5471_s10, %s7367_s13 }
 0x11e   : > { %p5474_p8 = pnand %p5472_p2, %p7368_p9 }
 0x120   : > { %p5475_p3 = pneg %p5474_p8 }
 0x122   : > { %p5480_p5 = pnand %p5478_p1, %p5475_p3 }
 0x124   : > { %5483 = shalt.err (!%p5480_p5)
}
 0x125   : > { %s5484_s2 = scalar_lea.vmem %s560_s3, 256  ;;  %p5492_p11 = scmp.lt.s32.totalorder %s560_s3, %s560_s3 }
 0x126   : > { %p5485_p12 = scmp.ne.s32.totalorder %s560_s3, %s5484_s2  ;;  %p5493_p0 = scmp.lt.s32.totalorder %s5484_s2, %s5484_s2 }
 0x128   : > { %p5487_p4 = pnand %p5485_p12, %p7368_p9  ;;  %p5494_p6 = por %p5493_p0, %p5492_p11 }
 0x12a   : > { %p5488_p7 = pneg %p5487_p4 }
 0x12c   : > { %p5495_p10 = pnand %p5494_p6, %p5488_p7 }
 0x12e   : > { %5498 = shalt.err (!%p5495_p10)
}
 0x12f   : > { %s5898_s27 = smov 128   ;;  %s5899_s5 = smov 8  }
 0x130   : > { %p7369_p2 = scmp.ne.s32.totalorder %s7348_s24, 0  ;;  %s5900_s23 = smov [#allocation29]  }
 0x131   : > { %s594_s10 = sshll.u32 %s5900_s23, 4  ;;  %s5901_s29 = smov [#allocation30]   ;;  %s595_s10 = int_to_ptr.vmem [resolvable:$true] %s594_s10 }
 0x132   : > { %5020 = dma.hbm_to_vmem [thread:$0]  (!%p7369_p2), %s7367_s13, 256, %s560_s3, [#allocation4], %s5898_s27, %s5898_s27, %s5899_s5  }
 0x133   : > { %s608_s30 = sshll.u32 %s5901_s29, 4  ;;  %s5499_s2 = scalar_lea.hbm %s7279_s16, 256  ;;  %s609_s30 = int_to_ptr.vmem [resolvable:$true] %s608_s30 }
 0x134   : > { %p5500_p10 = scmp.ne.s32.totalorder %s7279_s16, %s5499_s2  ;;  %p5506_p1 = scmp.lt.u32.totalorder %s5499_s2, %s7279_s16 }
 0x136   : > { %p5502_p8 = pnand %p5500_p10, %p7368_p9 }
 0x138   : > { %p5503_p3 = pneg %p5502_p8 }
 0x13a   : > { %p5508_p5 = pnand %p5506_p1, %p5503_p3 }
 0x13c   : > { %5511 = shalt.err (!%p5508_p5)
}
 0x13d   : > { %s5512_s3 = scalar_lea.vmem %s595_s10, 256  ;;  %p5520_p11 = scmp.lt.s32.totalorder %s595_s10, %s595_s10 }
 0x13e   : > { %p5513_p12 = scmp.ne.s32.totalorder %s595_s10, %s5512_s3  ;;  %p5521_p0 = scmp.lt.s32.totalorder %s5512_s3, %s5512_s3 }
 0x140   : > { %p5515_p4 = pnand %p5513_p12, %p7368_p9  ;;  %p5522_p6 = por %p5521_p0, %p5520_p11 }
 0x142   : > { %p5516_p7 = pneg %p5515_p4 }
 0x144   : > { %p5523_p13 = pnand %p5522_p6, %p5516_p7 }
 0x146   : > { %5526 = shalt.err (!%p5523_p13)
}
 0x147   : > { %s7370_s7 = smov 4   ;;  %s7371_s9 = smov 64  }
 0x148   : > { %5029 = dma.hbm_to_vmem [thread:$0]  (!%p7369_p2), %s7279_s16, 256, %s595_s10, [#allocation28], %s7371_s9, %s7371_s9, %s7370_s7  }
 0x149   : > { %s5527_s5 = scalar_lea.hbm %s7280_s17, 16 }
 0x14a   : > { %p5528_p10 = scmp.ne.s32.totalorder %s7280_s17, %s5527_s5  ;;  %p5534_p3 = scmp.lt.u32.totalorder %s5527_s5, %s7280_s17 }
 0x14c   : > { %p5530_p13 = pnand %p5528_p10, %p7368_p9 }
 0x14e   : > { %p5531_p8 = pneg %p5530_p13 }
 0x150   : > { %p5536_p1 = pnand %p5534_p3, %p5531_p8 }
 0x152   : > { %5539 = shalt.err (!%p5536_p1)
}
 0x153   : > { %s5540_s12 = scalar_lea.vmem %s609_s30, 16  ;;  %s5547_s10 = scalar_lea.vmem %s609_s30, 32 }
 0x154   : > { %p5541_p5 = scmp.ne.s32.totalorder %s609_s30, %s5540_s12  ;;  %p5548_p7 = scmp.lt.s32.totalorder %s609_s30, %s609_s30 }
 0x155   : > { %p5549_p11 = scmp.lt.s32.totalorder %s5547_s10, %s5540_s12 }
 0x156   : > { %p5543_p12 = pnand %p5541_p5, %p7368_p9 }
 0x157   : > { %p5550_p0 = por %p5549_p11, %p5548_p7 }
 0x158   : > { %p5544_p4 = pneg %p5543_p12 }
 0x15a   : > { %p5551_p6 = pnand %p5550_p0, %p5544_p4 }
 0x15c   : > { %5554 = shalt.err (!%p5551_p6)
}
 0x15d   : > { %5032 = dma.hbm_to_vmem [thread:$0]  (!%p7369_p2), %s7280_s17, 16, %s609_s30, [#allocation31]  }
 0x15e   : > { %s7372_s28 = sld [smem:[#allocation56_spill]]  ;;  %s639_s5 = scalar_lea.vmem [#allocation8], %s6120_s22 }
 0x15f   : > { %s646_s15 = sshll.u32 %s639_s5, 4  ;;  %p7374_p10 = scmp.ne.s32.totalorder %s7358_s18, 0  ;;  %s647_s15 = int_to_ptr.vmem [resolvable:$true] %s646_s15 }
 0x164   : > { %s7373_s20 = smov %s7372_s28  ;;  %s6393_s27 = scalar_lea.hbm %s7372_s28, %s6125_s26 }
 0x165   : > { %s5555_s24 = scalar_lea.hbm %s6393_s27, 16  ;;  %s5560_s30 = scalar_lea.hbm %s7373_s20, 32 }
 0x166   : > { %p5556_p9 = scmp.ne.s32.totalorder %s6393_s27, %s5555_s24  ;;  %p5561_p2 = scmp.lt.u32.totalorder %s6393_s27, %s7373_s20 }
 0x167   : > { %p5562_p3 = scmp.lt.u32.totalorder %s5560_s30, %s5555_s24  ;;  %p5564_p5 = scmp.lt.u32.totalorder %s5555_s24, %s6393_s27 }
 0x168   : > { %p5558_p13 = pnand %p5556_p9, %p7374_p10 }
 0x169   : > { %p5563_p1 = por %p5562_p3, %p5561_p2 }
 0x16a   : > { %p5559_p8 = pneg %p5558_p13 }
 0x16b   : > { %p5565_p12 = por %p5564_p5, %p5563_p1 }
 0x16d   : > { %p5566_p4 = pnand %p5565_p12, %p5559_p8 }
 0x16f   : > { %5569 = shalt.err (!%p5566_p4)
}
 0x170   : > { %s5570_s10 = scalar_lea.vmem %s647_s15, 16  ;;  %s5902_s2 = smov [#allocation8]  }
 0x171   : > { %p5571_p7 = scmp.ne.s32.totalorder %s647_s15, %s5570_s10  ;;  %s5575_s3 = sshll.u32 %s5902_s2, 4  ;;  %s5576_s3 = int_to_ptr.vmem [resolvable:$false] %s5575_s3 }
 0x172   : > { %s5577_s8 = scalar_lea.vmem %s5576_s3, 32  ;;  %p5578_p6 = scmp.lt.s32.totalorder %s647_s15, %s5576_s3 }
 0x173   : > { %p5573_p11 = pnand %p5571_p7, %p7374_p10  ;;  %p5579_p9 = scmp.lt.s32.totalorder %s5577_s8, %s5570_s10 }
 0x175   : > { %p5574_p0 = pneg %p5573_p11  ;;  %p5580_p13 = por %p5579_p9, %p5578_p6 }
 0x177   : > { %p5581_p2 = pnand %p5580_p13, %p5574_p0 }
 0x179   : > { %5584 = shalt.err (!%p5581_p2)
}
 0x17a   : > { %p7375_p3 = scmp.ne.s32.totalorder %s7349_s25, 0  ;;  %s7376_s11 = scalar_lea.sflag [#allocation7], %s6117_s21 }
 0x17b   : > { %s6419_s24 = scalar_lea.hbm %s7267_s4, %s6177_s1  ;;  %s678_s14 = scalar_lea.vmem [#allocation11], %s6174_s19 }
 0x17c   : > { %5039 = dma.hbm_to_vmem [thread:$0]  (!%p7375_p3), %s6393_s27, 16, %s647_s15, %s7376_s11  }
 0x17d   : > { %s685_s23 = sshll.u32 %s678_s14, 4  ;;  %s4325_s30 = sshll.u32 %s6120_s22, 4  ;;  %s6422_s23 = int_to_ptr.vmem [resolvable:$true] %s685_s23 }
 0x17e   : > { %s5585_s29 = scalar_lea.hbm %s6419_s24, 1024  ;;  %s5590_s12 = scalar_lea.hbm %s7267_s4, 2048 }
 0x17f   : > { %p5586_p8 = scmp.ne.s32.totalorder %s6419_s24, %s5585_s29  ;;  %p5591_p12 = scmp.lt.u32.totalorder %s6419_s24, %s7267_s4 }
 0x180   : > { %p5592_p4 = scmp.lt.u32.totalorder %s5590_s12, %s5585_s29  ;;  %p5594_p11 = scmp.lt.u32.totalorder %s5585_s29, %s6419_s24 }
 0x181   : > { %p5588_p1 = pnand %p5586_p8, %p7374_p10 }
 0x182   : > { %p5593_p7 = por %p5592_p4, %p5591_p12 }
 0x183   : > { %p5589_p5 = pneg %p5588_p1 }
 0x184   : > { %p5595_p0 = por %p5594_p11, %p5593_p7 }
 0x186   : > { %p5596_p6 = pnand %p5595_p0, %p5589_p5 }
 0x188   : > { %5599 = shalt.err (!%p5596_p6)
}
 0x189   : > { %s5600_s3 = scalar_lea.vmem %s6422_s23, 1024  ;;  %s5903_s8 = smov [#allocation11]  }
 0x18a   : > { %p5601_p9 = scmp.ne.s32.totalorder %s6422_s23, %s5600_s3  ;;  %s5605_s11 = sshll.u32 %s5903_s8, 4  ;;  %s5606_s11 = int_to_ptr.vmem [resolvable:$false] %s5605_s11 }
 0x18b   : > { %s5607_s28 = scalar_lea.vmem %s5606_s11, 2048  ;;  %p5608_p8 = scmp.lt.s32.totalorder %s6422_s23, %s5606_s11 }
 0x18c   : > { %p5603_p13 = pnand %p5601_p9, %p7374_p10  ;;  %p5609_p1 = scmp.lt.s32.totalorder %s5607_s28, %s5600_s3 }
 0x18e   : > { %p5604_p2 = pneg %p5603_p13  ;;  %p5610_p12 = por %p5609_p1, %p5608_p8 }
 0x190   : > { %p5611_p4 = pnand %p5610_p12, %p5604_p2 }
 0x192   : > { %5614 = shalt.err (!%p5611_p4)
}
 0x193   : > { %s7377_s5 = scalar_lea.sflag [#allocation10], %s6117_s21  ;;  %s4457_s14 = sshll.u32 %s5881_s0, 8 }
 0x194   : > { %5045 = dma.hbm_to_vmem [thread:$0]  (!%p7375_p3), %s6419_s24, 1024, %s6422_s23, %s7377_s5, %s7371_s9, %s7371_s9, %s7370_s7  }
 0x195   : > { %s6457_s15 = scalar_lea.hbm %s7269_s6, %s4457_s14  ;;  %s720_s12 = scalar_lea.vmem [#allocation14], %s4325_s30 }
 0x196   : > { %s727_s10 = sshll.u32 %s720_s12, 4  ;;  %s5615_s2 = scalar_lea.hbm %s6457_s15, 256  ;;  %s6461_s10 = int_to_ptr.vmem [resolvable:$true] %s727_s10 }
 0x197   : > { %p5616_p5 = scmp.ne.s32.totalorder %s6457_s15, %s5615_s2  ;;  %s5620_s3 = scalar_lea.hbm %s7269_s6, 512 }
 0x198   : > { %p5621_p0 = scmp.lt.u32.totalorder %s6457_s15, %s7269_s6  ;;  %p5622_p6 = scmp.lt.u32.totalorder %s5620_s3, %s5615_s2 }
 0x199   : > { %p5618_p7 = pnand %p5616_p5, %p7374_p10  ;;  %p5624_p13 = scmp.lt.u32.totalorder %s5615_s2, %s6457_s15 }
 0x19a   : > { %p5623_p9 = por %p5622_p6, %p5621_p0 }
 0x19b   : > { %p5619_p11 = pneg %p5618_p7 }
 0x19c   : > { %p5625_p2 = por %p5624_p13, %p5623_p9 }
 0x19e   : > { %p5626_p8 = pnand %p5625_p2, %p5619_p11 }
 0x1a0   : > { %5629 = shalt.err (!%p5626_p8)
}
 0x1a1   : > { %s5630_s28 = scalar_lea.vmem %s6461_s10, 256  ;;  %s5904_s5 = smov [#allocation14]  }
 0x1a2   : > { %p5631_p1 = scmp.ne.s32.totalorder %s6461_s10, %s5630_s28  ;;  %s5635_s29 = sshll.u32 %s5904_s5, 4  ;;  %s5636_s29 = int_to_ptr.vmem [resolvable:$false] %s5635_s29 }
 0x1a3   : > { %s5637_s27 = scalar_lea.vmem %s5636_s29, 512  ;;  %p5638_p5 = scmp.lt.s32.totalorder %s6461_s10, %s5636_s29 }
 0x1a4   : > { %p5633_p12 = pnand %p5631_p1, %p7374_p10  ;;  %p5639_p7 = scmp.lt.s32.totalorder %s5637_s27, %s5630_s28 }
 0x1a6   : > { %p5634_p4 = pneg %p5633_p12  ;;  %p5640_p0 = por %p5639_p7, %p5638_p5 }
 0x1a8   : > { %p5641_p6 = pnand %p5640_p0, %p5634_p4 }
 0x1aa   : > { %5644 = shalt.err (!%p5641_p6)
}
 0x1ab   : > { %s7378_s12 = scalar_lea.sflag [#allocation13], %s6117_s21  ;;  %s7379_s23 = sld [smem:[#allocation60_spill]] }
 0x1ac   : > { %5051 = dma.hbm_to_vmem [thread:$0]  (!%p7375_p3), %s6457_s15, 256, %s6461_s10, %s7378_s12, %s7371_s9, %s7371_s9, %s7370_s7  }
 0x1ad   : > { %s757_s8 = scalar_lea.vmem [#allocation17], %s6120_s22 }
 0x1ae   : > { %s764_s11 = sshll.u32 %s757_s8, 4  ;;  %s765_s11 = int_to_ptr.vmem [resolvable:$true] %s764_s11 }
 0x1b1   : > { %s6493_s3 = scalar_lea.hbm %s7379_s23, %s6125_s26  ;;  %s5650_s15 = scalar_lea.hbm %s7379_s23, 32 }
 0x1b2   : > { %s5645_s28 = scalar_lea.hbm %s6493_s3, 16  ;;  %p5651_p2 = scmp.lt.u32.totalorder %s6493_s3, %s7379_s23 }
 0x1b3   : > { %p5646_p11 = scmp.ne.s32.totalorder %s6493_s3, %s5645_s28  ;;  %p5652_p8 = scmp.lt.u32.totalorder %s5650_s15, %s5645_s28 }
 0x1b4   : > { %p5654_p12 = scmp.lt.u32.totalorder %s5645_s28, %s6493_s3 }
 0x1b5   : > { %p5648_p9 = pnand %p5646_p11, %p7374_p10  ;;  %p5653_p1 = por %p5652_p8, %p5651_p2 }
 0x1b7   : > { %p5649_p13 = pneg %p5648_p9  ;;  %p5655_p4 = por %p5654_p12, %p5653_p1 }
 0x1b9   : > { %p5656_p5 = pnand %p5655_p4, %p5649_p13 }
 0x1bb   : > { %5659 = shalt.err (!%p5656_p5)
}
 0x1bc   : > { %s5660_s12 = scalar_lea.vmem %s765_s11, 16  ;;  %s5905_s2 = smov [#allocation17]  }
 0x1bd   : > { %p5661_p7 = scmp.ne.s32.totalorder %s765_s11, %s5660_s12  ;;  %s5665_s24 = sshll.u32 %s5905_s2, 4  ;;  %s5666_s24 = int_to_ptr.vmem [resolvable:$false] %s5665_s24 }
 0x1be   : > { %s5667_s8 = scalar_lea.vmem %s5666_s24, 32  ;;  %p5668_p11 = scmp.lt.s32.totalorder %s765_s11, %s5666_s24 }
 0x1bf   : > { %p5663_p0 = pnand %p5661_p7, %p7374_p10  ;;  %p5669_p9 = scmp.lt.s32.totalorder %s5667_s8, %s5660_s12 }
 0x1c1   : > { %p5664_p6 = pneg %p5663_p0  ;;  %p5670_p3 = por %p5669_p9, %p5668_p11 }
 0x1c3   : > { %p5671_p2 = pnand %p5670_p3, %p5664_p6 }
 0x1c5   : > { %5674 = shalt.err (!%p5671_p2)
}
 0x1c6   : > { %p7380_p8 = scmp.ne.s32.totalorder %s7349_s25, 0  ;;  %s7381_s28 = scalar_lea.sflag [#allocation16], %s6117_s21 }
 0x1c7   : > { %s7382_s15 = sld [smem:[#allocation62_spill]]  ;;  %s792_s27 = scalar_lea.vmem [#allocation20], %s4325_s30 }
 0x1c8   : > { %5057 = dma.hbm_to_vmem [thread:$0]  (!%p7380_p8), %s6493_s3, 16, %s765_s11, %s7381_s28  }
 0x1c9   : > { %s799_s12 = sshll.u32 %s792_s27, 4  ;;  %s6524_s12 = int_to_ptr.vmem [resolvable:$true] %s799_s12 }
 0x1cd   : > { %s6520_s10 = scalar_lea.hbm %s7382_s15, %s4457_s14  ;;  %s5680_s24 = scalar_lea.hbm %s7382_s15, 512 }
 0x1ce   : > { %s5675_s2 = scalar_lea.hbm %s6520_s10, 256  ;;  %p5681_p12 = scmp.lt.u32.totalorder %s6520_s10, %s7382_s15 }
 0x1cf   : > { %p5676_p3 = scmp.ne.s32.totalorder %s6520_s10, %s5675_s2  ;;  %p5682_p4 = scmp.lt.u32.totalorder %s5680_s24, %s5675_s2 }
 0x1d0   : > { %p5684_p7 = scmp.lt.u32.totalorder %s5675_s2, %s6520_s10 }
 0x1d1   : > { %p5678_p13 = pnand %p5676_p3, %p7374_p10  ;;  %p5683_p5 = por %p5682_p4, %p5681_p12 }
 0x1d3   : > { %p5679_p1 = pneg %p5678_p13  ;;  %p5685_p0 = por %p5684_p7, %p5683_p5 }
 0x1d5   : > { %p5686_p6 = pnand %p5685_p0, %p5679_p1 }
 0x1d7   : > { %5689 = shalt.err (!%p5686_p6)
}
 0x1d8   : > { %s5690_s30 = scalar_lea.vmem %s6524_s12, 256  ;;  %s5906_s28 = smov [#allocation20]  }
 0x1d9   : > { %p5691_p11 = scmp.ne.s32.totalorder %s6524_s12, %s5690_s30  ;;  %s5695_s5 = sshll.u32 %s5906_s28, 4  ;;  %s5696_s5 = int_to_ptr.vmem [resolvable:$false] %s5695_s5 }
 0x1da   : > { %s5697_s29 = scalar_lea.vmem %s5696_s5, 512  ;;  %p5698_p3 = scmp.lt.s32.totalorder %s6524_s12, %s5696_s5 }
 0x1db   : > { %p5693_p9 = pnand %p5691_p11, %p7374_p10  ;;  %p5699_p13 = scmp.lt.s32.totalorder %s5697_s29, %s5690_s30 }
 0x1dd   : > { %p5694_p2 = pneg %p5693_p9  ;;  %p5700_p12 = por %p5699_p13, %p5698_p3 }
 0x1df   : > { %p5701_p4 = pnand %p5700_p12, %p5694_p2 }
 0x1e1   : > { %5704 = shalt.err (!%p5701_p4)
}
 0x1e2   : > { %s7383_s27 = scalar_lea.sflag [#allocation19], %s6117_s21  ;;  %s7384_s11 = sld [smem:[#allocation64_spill]] }
 0x1e3   : > { %5063 = dma.hbm_to_vmem [thread:$0]  (!%p7380_p8), %s6520_s10, 256, %s6524_s12, %s7383_s27, %s7371_s9, %s7371_s9, %s7370_s7  }
 0x1e4   : > { %s830_s14 = scalar_lea.vmem [#allocation23], %s6174_s19 }
 0x1e5   : > { %s837_s8 = sshll.u32 %s830_s14, 4  ;;  %s6559_s8 = int_to_ptr.vmem [resolvable:$true] %s837_s8 }
 0x1e8   : > { %s6556_s24 = scalar_lea.hbm %s7384_s11, %s6177_s1  ;;  %s5710_s12 = scalar_lea.hbm %s7384_s11, 2048 }
 0x1e9   : > { %s5705_s30 = scalar_lea.hbm %s6556_s24, 1024  ;;  %p5711_p0 = scmp.lt.u32.totalorder %s6556_s24, %s7384_s11 }
 0x1ea   : > { %p5706_p1 = scmp.ne.s32.totalorder %s6556_s24, %s5705_s30  ;;  %p5712_p6 = scmp.lt.u32.totalorder %s5710_s12, %s5705_s30 }
 0x1eb   : > { %p5714_p9 = scmp.lt.u32.totalorder %s5705_s30, %s6556_s24 }
 0x1ec   : > { %p5708_p5 = pnand %p5706_p1, %p7374_p10  ;;  %p5713_p11 = por %p5712_p6, %p5711_p0 }
 0x1ee   : > { %p5709_p7 = pneg %p5708_p5  ;;  %p5715_p2 = por %p5714_p9, %p5713_p11 }
 0x1f0   : > { %p5716_p3 = pnand %p5715_p2, %p5709_p7 }
 0x1f2   : > { %5719 = shalt.err (!%p5716_p3)
}
 0x1f3   : > { %s5720_s19 = scalar_lea.vmem %s6559_s8, 1024  ;;  %s5907_s29 = smov [#allocation23]  }
 0x1f4   : > { %p5721_p13 = scmp.ne.s32.totalorder %s6559_s8, %s5720_s19  ;;  %s5725_s27 = sshll.u32 %s5907_s29, 4  ;;  %s5726_s27 = int_to_ptr.vmem [resolvable:$false] %s5725_s27 }
 0x1f5   : > { %s5727_s2 = scalar_lea.vmem %s5726_s27, 2048  ;;  %p5728_p1 = scmp.lt.s32.totalorder %s6559_s8, %s5726_s27 }
 0x1f6   : > { %p5723_p12 = pnand %p5721_p13, %p7374_p10  ;;  %p5729_p5 = scmp.lt.s32.totalorder %s5727_s2, %s5720_s19 }
 0x1f8   : > { %p5724_p4 = pneg %p5723_p12  ;;  %p5730_p0 = por %p5729_p5, %p5728_p1 }
 0x1fa   : > { %p5731_p6 = pnand %p5730_p0, %p5724_p4 }
 0x1fc   : > { %5734 = shalt.err (!%p5731_p6)
}
 0x1fd   : > { %s7385_s3 = scalar_lea.sflag [#allocation22], %s6117_s21  ;;  %s7386_s28 = sld [smem:[#allocation65_spill]] }
 0x1fe   : > { %5069 = dma.hbm_to_vmem [thread:$0]  (!%p7380_p8), %s6556_s24, 1024, %s6559_s8, %s7385_s3, %s7371_s9, %s7371_s9, %s7370_s7  }
 0x1ff   : > { %s850_s5 = scalar_lea.vmem [#allocation24], %s6120_s22  ;;  %s848_s19 = scalar_lea.sflag [#allocation25], %s6117_s21 }
 0x200   : > { %s857_s1 = sshll.u32 %s850_s5, 4  ;;  %s858_s1 = int_to_ptr.vmem [resolvable:$true] %s857_s1 }
 0x203   : > { %s7387_s10 = smov %s7386_s28  ;;  %s6591_s12 = scalar_lea.hbm %s7386_s28, %s6125_s26 }
 0x204   : > { %s5735_s29 = scalar_lea.hbm %s6591_s12, 16  ;;  %s5740_s9 = scalar_lea.hbm %s7387_s10, 32 }
 0x205   : > { %p5736_p7 = scmp.ne.s32.totalorder %s6591_s12, %s5735_s29  ;;  %p5741_p2 = scmp.lt.u32.totalorder %s6591_s12, %s7387_s10 }
 0x206   : > { %p5742_p3 = scmp.lt.u32.totalorder %s5740_s9, %s5735_s29  ;;  %p5744_p12 = scmp.lt.u32.totalorder %s5735_s29, %s6591_s12 }
 0x207   : > { %p5738_p11 = pnand %p5736_p7, %p7374_p10 }
 0x208   : > { %p5743_p13 = por %p5742_p3, %p5741_p2 }
 0x209   : > { %p5739_p9 = pneg %p5738_p11 }
 0x20a   : > { %p5745_p4 = por %p5744_p12, %p5743_p13 }
 0x20c   : > { %p5746_p1 = pnand %p5745_p4, %p5739_p9 }
 0x20e   : > { %5749 = shalt.err (!%p5746_p1)
}
 0x20f   : > { %s5750_s21 = scalar_lea.vmem %s858_s1, 16  ;;  %s5908_s22 = smov [#allocation24]  }
 0x210   : > { %p5751_p5 = scmp.ne.s32.totalorder %s858_s1, %s5750_s21  ;;  %s5755_s8 = sshll.u32 %s5908_s22, 4  ;;  %s5756_s8 = int_to_ptr.vmem [resolvable:$false] %s5755_s8 }
 0x211   : > { %s5757_s2 = scalar_lea.vmem %s5756_s8, 32  ;;  %p5758_p7 = scmp.lt.s32.totalorder %s858_s1, %s5756_s8 }
 0x212   : > { %p5753_p0 = pnand %p5751_p5, %p7374_p10  ;;  %p5759_p11 = scmp.lt.s32.totalorder %s5757_s2, %s5750_s21 }
 0x214   : > { %p5754_p6 = pneg %p5753_p0  ;;  %p5760_p8 = por %p5759_p11, %p5758_p7 }
 0x216   : > { %p5761_p2 = pnand %p5760_p8, %p5754_p6 }
 0x218   : > { %5764 = shalt.err (!%p5761_p2)
}
 0x219   : > { %p7388_p3 = scmp.ne.s32.totalorder %s7349_s25, 0  ;;  %s7389_s3 = sld [smem:[#allocation51_spill]] }
 0x21b   : > { %5072 = dma.hbm_to_vmem [thread:$0]  (!%p7388_p3), %s6591_s12, 16, %s858_s1, %s848_s19  }
 0x21f   : > { %p7390_p9 = scmp.ne.s32.totalorder %s7389_s3, 0 }
 0x220   : > { %s7391_s14 = sld [smem:[#allocation49_spill]] (!%p7390_p9) }
 0x221   : > { %866 = sbr.rel (%p7390_p9) target bundleno = 4481 (0x1181), region = 92 }
 0x226   : > { %p7392_p13 = scmp.eq.s32.totalorder (!%p7390_p9), %s7391_s14, 0 }
 0x228   : > { %5816 = dma.done.wait (%p7392_p13), [#allocation4], 256   ;;  %p7393_p10 = pmov %p7392_p13 }
 0x229   : > { %s7394_s18 = sld [smem:[#allocation45_spill]]  ;;  %s7395_s30 = sld [smem:[#allocation50_spill]] }
 0x22a   : > { %5818 = vsyncadd (%p7393_p10), [#allocation4], 4294967040  ;;  %s6619_s28 = sand.u32 1, %s7391_s14  }
 0x22b   : > { %s873_s25 = scalar_lea.sflag [#allocation7], %s6619_s28 }
 0x22f   : > { %s6622_s5 = sand.u32 1, %s7394_s18   ;;  %p7396_p8 = scmp.ne.s32.totalorder %s7395_s30, 0 }
 0x230   : > { %s875_s12 = scalar_lea.vmem [#allocation6], %s6622_s5 }
 0x231   : > { %5820 = dma.done.wait (%p7396_p8), %s873_s25, 32  }
 0x232   : > { %5822 = vsyncadd (%p7396_p8), %s873_s25, 4294967264  ;;  %s4341_s1 = sshll.u32 %s6622_s5, 6  ;;  %s883_s19 = scalar_lea.vmem [#allocation8], %s6622_s5 }
 0x233   : > { %s889_s29 = scalar_lea.sflag [#allocation10], %s6619_s28  ;;  %s6633_s27 = scalar_lea.vmem [#allocation9], %s4341_s1 }
 0x234   : > { %5824 = dma.done.wait (%p7396_p8), %s889_s29, 2048  }
 0x235   : > { %5826 = vsyncadd (%p7396_p8), %s889_s29, 4294965248  ;;  %s6639_s7 = scalar_lea.vmem [#allocation11], %s4341_s1  ;;  %s907_s9 = scalar_lea.sflag [#allocation13], %s6619_s28 }
 0x236   : > { %s6642_s24 = scalar_lea.vmem [#allocation12], %s4341_s1 }
 0x237   : > { %5828 = dma.done.wait (%p7396_p8), %s907_s9, 1280  }
 0x238   : > { %5830 = vsyncadd (%p7396_p8), %s907_s9, 4294966016  ;;  %s4344_s26 = sshll.u32 %s6622_s5, 4  ;;  %s925_s22 = scalar_lea.sflag [#allocation16], %s6619_s28 }
 0x239   : > { %s6649_s21 = scalar_lea.vmem [#allocation14], %s4344_s26  ;;  %s927_s8 = scalar_lea.vmem [#allocation15], %s6622_s5 }
 0x23a   : > { %5832 = dma.done.wait (%p7396_p8), %s925_s22, 32  }
 0x23b   : > { %5834 = vsyncadd (%p7396_p8), %s925_s22, 4294967264  ;;  %s941_s3 = scalar_lea.sflag [#allocation19], %s6619_s28 }
 0x23c   : > { %5836 = dma.done.wait (%p7396_p8), %s941_s3, 272  }
 0x23d   : > { %5838 = vsyncadd (%p7396_p8), %s941_s3, 4294967024  ;;  %s6664_s25 = scalar_lea.vmem [#allocation20], %s4344_s26  ;;  %s958_s29 = scalar_lea.sflag [#allocation22], %s6619_s28 }
 0x23e   : > { %s960_s9 = scalar_lea.vmem [#allocation21], %s6622_s5 }
 0x23f   : > { %5840 = dma.done.wait (%p7396_p8), %s958_s29, 1040  }
 0x240   : > { %5842 = vsyncadd (%p7396_p8), %s958_s29, 4294966256  ;;  %s6672_s22 = scalar_lea.vmem [#allocation23], %s4341_s1  ;;  %s975_s18 = scalar_lea.sflag [#allocation25], %s6619_s28 }
 0x241   : > { %s977_s2 = scalar_lea.vmem [#allocation24], %s6622_s5 }
 0x242   : > { %5844 = dma.done.wait (%p7396_p8), %s975_s18, 16  }
 0x243   : > { %5846 = vsyncadd (%p7396_p8), %s975_s18, 4294967280  ;;  %p7397_p12 = pmov %p7393_p10 }
 0x244   : > { %p7398_p4 = pmov %p7393_p10 }
 0x245   : > { %5848 = dma.done.wait (%p7397_p12), [#allocation25], 16  }
 0x246   : > { %5850 = vsyncadd (%p7398_p4), [#allocation25], 4294967280  ;;  %p7399_p1 = pmov %p7398_p4 }
 0x248   : > { %5852 = dma.done.wait (%p7399_p1), [#allocation28], 272   ;;  %p7400_p5 = pmov %p7399_p1 }
 0x249   : > { %p7401_p0 = pmov %p7399_p1 }
 0x24a   : > { %5854 = vsyncadd (%p7400_p5), [#allocation28], 4294967024 }
 0x24b   : > { %5856 = dma.done.wait (%p7401_p0), [#allocation31], 16   ;;  %p7402_p6 = pmov %p7401_p0 }
 0x24c   : > { %s7403_s30 = sld [smem:[#allocation47_spill]] }
 0x24d   : > { %5858 = vsyncadd (%p7402_p6), [#allocation31], 4294967280 }
 0x252   : > { %p4351_p7 = scmp.ne.s32.totalorder %s7403_s30, 0 }
 0x253   : > { %v1101_v0 = vld [vmem:[#allocation3] sm:$0xff] (!%p4351_p7)  ;;  %vm1103_vm0 = vcmask (!%p4351_p7), 261120   ;;  %v1102_v1 = vld [vmem:[#allocation3 + $0x8] sm:$0xff] (!%p4351_p7) }
 0x254   : > { %1100 = sbr.rel (%p4351_p7) target bundleno = 603 (0x25b), region = 168  ;;  %1104 = vst.msk [vmem:[#allocation2] sm:$0xff] (!%p4351_p7), %vm1103_vm0, %v1101_v0  ;;  %1105 = vst.msk [vmem:[#allocation2 + $0x8] sm:$0xff] (!%p4351_p7), %vm1103_vm0, %v1102_v1 }
 0x25b PF: > { %v1106_v2 = vld [vmem:[#allocation2] sm:$0xff]  ;;  %vm1110_vm1 = vcmask 261120   ;;  %v6699_v10 = vld [vmem:[%s6633_s27 + $0x30] sm:$0xff]   ;;  %v5909_v11 = vmov 0.0   ;;  %v6708_v12 = vld [vmem:[%s6633_s27 + $0x8] sm:$0xff]   ;;  %vm5910_vm2 = vmmov 0  }
 0x25c   : > { %v1111_v3 = vsel %vm1110_vm1, %v1106_v2, 0.0  ;;  %v6696_v9 = vld [vmem:[%s6633_s27] sm:$0xff]   ;;  %4595 = vmatprep.subr.bf16.mxu0 %v5909_v11  ;;  %4619 = vmatprep.subr.bf16.mxu1 %v5909_v11  ;;  %v6711_v13 = vld [vmem:[%s6633_s27 + $0x38] sm:$0xff]   ;;  %v6732_v23 = vld [vmem:[%s6633_s27 + $0x10] sm:$0xff]   ;;  %vm1848_vm3 = vcmask 64512   ;;  %vm2088_vm4 = vcmask 1043456  }
 0x25d   : > { %1112 = vadd.xlane.f32.xlu0 %v1111_v3  ;;  %4596 = vmatpush3.bf16.msra.mxu0 %v6696_v9  ;;  %v6723_v18 = vld [vmem:[%s875_s12] ss:$0 sm:$0xff]  ;;  %v6735_v24 = vld [vmem:[%s6639_s7 + $0x10] sm:$0xff]   ;;  %v6760_v28 = vld [vmem:[%s6633_s27 + $0x20] sm:$0xff]   ;;  %s7404_s14 = scalar_lea.vmem [#allocation17], %s6622_s5  ;;  %s7405_s28 = scalar_lea.vmem [#allocation18], %s6622_s5 }
 0x25e   : > { %4620 = vmatpush3.bf16.msra.mxu1 %v6699_v10  ;;  %4597 = vmatprep.subr.bf16.mxu0 %v5909_v11  ;;  %v6727_v20 = vld [vmem:[%s883_s19] ss:$0 sm:$0xff]  ;;  %v6763_v29 = vld [vmem:[%s6639_s7 + $0x30] sm:$0xff]   ;;  %v6774_v30 = vld [vmem:[%s6633_s27 + $0x28] sm:$0xff]   ;;  %s7406_s12 = sld [smem:[#allocation47_spill]] }
 0x25f   : > { %4621 = vmatprep.subr.bf16.mxu1 %v5909_v11  ;;  %4599 = vmatprep.mubr.msk.bf16.mxu0 %vm5910_vm2, %v5909_v11  ;;  %v6746_v26 = vld [vmem:[%s6633_s27 + $0x18] sm:$0xff]   ;;  %v6788_v32 = vld [vmem:[%s6639_s7] sm:$0xff]   ;;  %v6791_v33 = vld [vmem:[%s6642_s24 + $0x10] sm:$0xff]  }
 0x260   : > { %4623 = vmatprep.mubr.msk.bf16.mxu1 %vm5910_vm2, %v5909_v11  ;;  %v6749_v27 = vld [vmem:[%s6639_s7 + $0x18] sm:$0xff]   ;;  %v6802_v34 = vld [vmem:[%s6639_s7 + $0x8] sm:$0xff]   ;;  %v6816_v36 = vld [vmem:[%s6639_s7 + $0x20] sm:$0xff]  }
 0x261   : > { %4598 = vmatpush3.bf16.msra.mxu0 %v6708_v12  ;;  %v6777_v31 = vld [vmem:[%s6639_s7 + $0x38] sm:$0xff]   ;;  %v6819_v37 = vld [vmem:[%s6642_s24 + $0x30] sm:$0xff]   ;;  %v6830_v38 = vld [vmem:[%s6639_s7 + $0x28] sm:$0xff]  }
 0x262   : > { %4622 = vmatpush3.bf16.msra.mxu1 %v6711_v13  ;;  %4603 = vmatprep.subr.bf16.mxu0 %v5909_v11  ;;  %v6805_v35 = vld [vmem:[%s6642_s24 + $0x18] sm:$0xff]   ;;  %v6844_v40 = vld [vmem:[%s6642_s24] sm:$0xff]   ;;  %v6854_v41 = vld [vmem:[%s6642_s24 + $0x8] sm:$0xff]  }
 0x263   : > { %4635 = vmatprep.subr.bf16.mxu1 %v5909_v11  ;;  %v6833_v39 = vld [vmem:[%s6642_s24 + $0x38] sm:$0xff]   ;;  %v6863_v42 = vld [vmem:[%s6642_s24 + $0x20] sm:$0xff]   ;;  %v6870_v43 = vld [vmem:[%s6642_s24 + $0x28] sm:$0xff]  }
 0x264   : > { %p4442_p11 = scmp.ne.s32.totalorder %s7406_s12, 1 }
 0x265   : > { %vm3823_vm5 = vcmask (!%p4442_p11), 261124   ;;  %vm5912_vm6 = vmmov (!%p4442_p11), 0  }
 0x2ea   : > { %v1113_v4 = vpop.xlane.xlu0 %1112 }
 0x2eb   : > { %v1118_v5 = vmul.f32 0.03125, %v1113_v4 }
 0x2ed   : > { %v1120_v6 = vsub.f32 %v1106_v2, %v1118_v5 }
 0x2ef   : > { %v1122_v7 = vmul.f32 %v1120_v6, %v1120_v6 }
 0x2f1   : > { %v1124_v8 = vsel %vm1110_vm1, %v1122_v7, 0.0 }
 0x2f2   : > { %1125 = vadd.xlane.f32.xlu0 %v1124_v8 }
 0x37f   : > { %v1126_v14 = vpop.xlane.xlu0 %1125 }
 0x380   : > { %v1130_v15 = vmul.f32 0.03125, %v1126_v14 }
 0x382   : > { %v1132_v16 = vadd.f32 1e-05, %v1130_v15 }
 0x384   : > { %5184 = vrsqrt.f32 %v1132_v16 }
 0x38e   : > { %v5185_v17 = vpop.eup %5184 }
 0x38f   : > { %v1136_v19 = vmul.f32 %v5185_v17, %v1120_v6 }
 0x391   : > { %v1144_v21 = vmul.f32 %v6723_v18, %v1136_v19 }
 0x393   : > { %v1152_v22 = vadd.f32 %v6727_v20, %v1144_v21 }
 0x395   : > { %v6737_v25 = vpack.c.bf16 %v1152_v22, %v1152_v22 }
 0x397   : > { %4600 = vmatmul.mubr.msk.bf16.vlgmr.msra.gmra.mrb[0].mxu0 %vm1110_vm1, %v6737_v25  ;;  %4624 = vmatmul.mubr.msk.bf16.vlgmr.msra.gmra.mrb[0].mxu1 %vm1110_vm1, %v6737_v25 }
 0x398   : > { %4604 = vmatpush3.bf16.msra.mxu0 %v6732_v23  ;;  %4636 = vmatpush3.bf16.msra.mxu1 %v6735_v24 }
 0x399   : > { %4605 = vmatprep.subr.bf16.mxu0 %v5909_v11  ;;  %4637 = vmatprep.subr.bf16.mxu1 %v5909_v11 }
 0x39a   : > { %4607 = vmatprep.mubr.msk.bf16.mxu0 %vm5910_vm2, %v5909_v11  ;;  %4639 = vmatprep.mubr.msk.bf16.mxu1 %vm5910_vm2, %v5909_v11 }
 0x39c   : > { %4606 = vmatpush3.bf16.msra.mxu0 %v6746_v26  ;;  %4638 = vmatpush3.bf16.msra.mxu1 %v6749_v27 }
 0x39d   : > { %4611 = vmatprep.subr.bf16.mxu0 %v5909_v11  ;;  %4651 = vmatprep.subr.bf16.mxu1 %v5909_v11 }
 0x39f   : > { %4608 = vmatmul.mubr.msk.bf16.vlgmr.msra.gmra.mrb[4].mxu0 %vm1110_vm1, %v6737_v25  ;;  %4640 = vmatmul.mubr.msk.bf16.vlgmr.msra.gmra.mrb[4].mxu1 %vm1110_vm1, %v6737_v25 }
 0x3a0   : > { %4612 = vmatpush3.bf16.msra.mxu0 %v6760_v28  ;;  %4652 = vmatpush3.bf16.msra.mxu1 %v6763_v29 }
 0x3a1   : > { %4613 = vmatprep.subr.bf16.mxu0 %v5909_v11  ;;  %4653 = vmatprep.subr.bf16.mxu1 %v5909_v11 }
 0x3a2   : > { %4615 = vmatprep.mubr.msk.bf16.mxu0 %vm5910_vm2, %v5909_v11  ;;  %4655 = vmatprep.mubr.msk.bf16.mxu1 %vm5910_vm2, %v5909_v11 }
 0x3a4   : > { %4614 = vmatpush3.bf16.msra.mxu0 %v6774_v30  ;;  %4654 = vmatpush3.bf16.msra.mxu1 %v6777_v31 }
 0x3a5   : > { %4627 = vmatprep.subr.bf16.mxu0 %v5909_v11  ;;  %4667 = vmatprep.subr.bf16.mxu1 %v5909_v11 }
 0x3a7   : > { %4616 = vmatmul.mubr.msk.bf16.vlgmr.msra.gmra.mrb[8].mxu0 %vm1110_vm1, %v6737_v25  ;;  %4656 = vmatmul.mubr.msk.bf16.vlgmr.msra.gmra.mrb[8].mxu1 %vm1110_vm1, %v6737_v25 }
 0x3a8   : > { %4628 = vmatpush3.bf16.msra.mxu0 %v6788_v32  ;;  %4668 = vmatpush3.bf16.msra.mxu1 %v6791_v33 }
 0x3a9   : > { %4629 = vmatprep.subr.bf16.mxu0 %v5909_v11  ;;  %4669 = vmatprep.subr.bf16.mxu1 %v5909_v11 }
 0x3aa   : > { %4631 = vmatprep.mubr.msk.bf16.mxu0 %vm5910_vm2, %v5909_v11  ;;  %4671 = vmatprep.mubr.msk.bf16.mxu1 %vm5910_vm2, %v5909_v11 }
 0x3ac   : > { %4630 = vmatpush3.bf16.msra.mxu0 %v6802_v34  ;;  %4670 = vmatpush3.bf16.msra.mxu1 %v6805_v35 }
 0x3ad   : > { %4643 = vmatprep.subr.bf16.mxu0 %v5909_v11  ;;  %4683 = vmatprep.subr.bf16.mxu1 %v5909_v11 }
 0x3af   : > { %4632 = vmatmul.mubr.msk.bf16.vlgmr.msra.gmra.mrb[12].mxu0 %vm1110_vm1, %v6737_v25  ;;  %4672 = vmatmul.mubr.msk.bf16.vlgmr.msra.gmra.mrb[12].mxu1 %vm1110_vm1, %v6737_v25 }
 0x3b0   : > { %4644 = vmatpush3.bf16.msra.mxu0 %v6816_v36  ;;  %4684 = vmatpush3.bf16.msra.mxu1 %v6819_v37 }
 0x3b1   : > { %4645 = vmatprep.subr.bf16.mxu0 %v5909_v11  ;;  %4685 = vmatprep.subr.bf16.mxu1 %v5909_v11 }
 0x3b2   : > { %4647 = vmatprep.mubr.msk.bf16.mxu0 %vm5910_vm2, %v5909_v11  ;;  %4687 = vmatprep.mubr.msk.bf16.mxu1 %vm5910_vm2, %v5909_v11 }
 0x3b4   : > { %4646 = vmatpush3.bf16.msra.mxu0 %v6830_v38  ;;  %4686 = vmatpush3.bf16.msra.mxu1 %v6833_v39 }
 0x3b5   : > { %4659 = vmatprep.subr.bf16.mxu0 %v5909_v11  ;;  %4697 = vmatprep.subr.bf16.mxu1 %v5909_v11 }
 0x3b7   : > { %4648 = vmatmul.mubr.msk.bf16.vlgmr.msra.gmra.mrb[16].mxu0 %vm1110_vm1, %v6737_v25  ;;  %4688 = vmatmul.mubr.msk.bf16.vlgmr.msra.gmra.mrb[16].mxu1 %vm1110_vm1, %v6737_v25 }
 0x3b8   : > { %4660 = vmatpush3.bf16.msra.mxu0 %v6844_v40  ;;  %4663 = vmatprep.mubr.msk.bf16.mxu0 %vm5910_vm2, %v5909_v11 }
 0x3b9   : > { %4661 = vmatprep.subr.bf16.mxu0 %v5909_v11  ;;  %4699 = vmatprep.mubr.msk.bf16.mxu1 %vm5910_vm2, %v5909_v11 }
 0x3bc   : > { %4662 = vmatpush3.bf16.msra.mxu0 %v6854_v41 }
 0x3bd   : > { %4675 = vmatprep.subr.bf16.mxu0 %v5909_v11 }
 0x3bf   : > { %4664 = vmatmul.mubr.msk.bf16.vlgmr.msra.gmra.mrb[20].mxu0 %vm1110_vm1, %v6737_v25 }
 0x3c0   : > { %4676 = vmatpush3.bf16.msra.mxu0 %v6863_v42  ;;  %4679 = vmatprep.mubr.msk.bf16.mxu0 %vm5910_vm2, %v5909_v11 }
 0x3c1   : > { %4677 = vmatprep.subr.bf16.mxu0 %v5909_v11 }
 0x3c4   : > { %4678 = vmatpush3.bf16.msra.mxu0 %v6870_v43 }
 0x3c5   : > { %4691 = vmatprep.subr.bf16.mxu0 %v5909_v11 }
 0x3c7   : > { %4680 = vmatmul.mubr.msk.bf16.vlgmr.msra.gmra.mrb[24].mxu0 %vm1110_vm1, %v6737_v25 }
 0x3c8   : > { %4693 = vmatprep.mubr.msk.bf16.mxu0 %vm5910_vm2, %v5909_v11 }
 0x46a   : > { %v1258_v44 = vpop.f32.mrb[0].mxu0  ;;  %v1414_v45 = vpop.f32.mrb[0].mxu1 }
 0x46b   : > { %v4601_v46 = vpop.f32.mrb[1].mxu0  ;;  %v4625_v47 = vpop.f32.mrb[1].mxu1  ;;  %v1423_v15 = vmul.f32 0.35355338, %v1414_v45  ;;  %v1420_v45 = vmul.f32 0.35355338, %v1258_v44 }
 0x46c   : > { %v1261_v48 = vpop.f32.mrb[2].mxu0  ;;  %v1417_v49 = vpop.f32.mrb[2].mxu1 }
 0x46d   : > { %v4602_v50 = vpop.f32.mrb[3].mxu0  ;;  %v4626_v51 = vpop.f32.mrb[3].mxu1  ;;  %v1843_v19 = vpack.c.bf16 %v1423_v15, %v1423_v15 }
 0x472   : > { %v1310_v52 = vpop.f32.mrb[4].mxu0  ;;  %v1522_v53 = vpop.f32.mrb[4].mxu1 }
 0x473   : > { %v1845_v54 = vpack.c.bf16 %v1522_v53, %v1522_v53  ;;  %v4609_v55 = vpop.f32.mrb[5].mxu0  ;;  %v4641_v56 = vpop.f32.mrb[5].mxu1  ;;  %v1421_v62 = vmul.f32 0.35355338, %v1310_v52 }
 0x474   : > { %v1313_v57 = vpop.f32.mrb[6].mxu0  ;;  %v1525_v58 = vpop.f32.mrb[6].mxu1  ;;  %v1840_v55 = vpack.c.bf16 %v1420_v45, %v1420_v45 }
 0x475   : > { %v1899_v59 = vsel %vm1848_vm3, %v1845_v54, 0  ;;  %v4610_v60 = vpop.f32.mrb[7].mxu0  ;;  %v4642_v61 = vpop.f32.mrb[7].mxu1  ;;  %v1841_v1 = vpack.c.bf16 %v1421_v62, %v1421_v62 }
 0x476   : > { %4698 = vmatpush3.bf16.xpose.msra.mxu1 %v1899_v59 }
 0x477   : > { %4709 = vmatprep.subr.bf16.mxu1 %v5909_v11 }
 0x47a   : > { %v1362_v63 = vpop.f32.mrb[8].mxu0  ;;  %v1626_v0 = vpop.f32.mrb[8].mxu1 }
 0x47b   : > { %v1847_v2 = vpack.c.bf16 %v1626_v0, %v1626_v0  ;;  %v4617_v3 = vpop.f32.mrb[9].mxu0  ;;  %v4657_v4 = vpop.f32.mrb[9].mxu1  ;;  %v1422_v0 = vmul.f32 0.35355338, %v1362_v63 }
 0x47c   : > { %v1365_v5 = vpop.f32.mrb[10].mxu0  ;;  %v1629_v6 = vpop.f32.mrb[10].mxu1 }
 0x47d   : > { %v1991_v7 = vsel %vm1848_vm3, %v1847_v2, 0  ;;  %v4618_v8 = vpop.f32.mrb[11].mxu0  ;;  %v4658_v14 = vpop.f32.mrb[11].mxu1  ;;  %4700 = vmatmul.mubr.msk.bf16.vlgmr.msra.gmra.mrb[20].mxu1 %vm1848_vm3, %v1841_v1  ;;  %v1842_v2 = vpack.c.bf16 %v1422_v0, %v1422_v0 }
 0x47e   : > { %4710 = vmatpush3.bf16.xpose.msra.mxu1 %v1991_v7  ;;  %4711 = vmatprep.mubr.msk.bf16.mxu1 %vm5910_vm2, %v5909_v11 }
 0x47f   : > { %4721 = vmatprep.subr.bf16.mxu1 %v5909_v11 }
 0x482   : > { %v1470_v16 = vpop.f32.mrb[12].mxu0  ;;  %v1730_v17 = vpop.f32.mrb[12].mxu1 }
 0x483   : > { %v1844_v21 = vpack.c.bf16 %v1470_v16, %v1470_v16  ;;  %v2082_v22 = vpack.c.bf16 %v1730_v17, %v1730_v17  ;;  %v4633_v25 = vpop.f32.mrb[13].mxu0  ;;  %v4673_v46 = vpop.f32.mrb[13].mxu1 }
 0x484   : > { %v1473_v47 = vpop.f32.mrb[14].mxu0  ;;  %v1733_v48 = vpop.f32.mrb[14].mxu1 }
 0x485   : > { %v1853_v49 = vsel %vm1848_vm3, %v1844_v21, 0  ;;  %v2136_v50 = vsel %vm2088_vm4, %v2082_v22, 0  ;;  %v4634_v51 = vpop.f32.mrb[15].mxu0  ;;  %v4674_v52 = vpop.f32.mrb[15].mxu1  ;;  %4712 = vmatmul.mubr.msk.bf16.vlgmr.msra.gmra.mrb[24].mxu1 %vm1848_vm3, %v1843_v19 }
 0x486   : > { %4692 = vmatpush3.bf16.xpose.msra.mxu0 %v1853_v49  ;;  %4722 = vmatpush3.bf16.msra.mxu1 %v2136_v50 }
 0x487   : > { %4703 = vmatprep.subr.bf16.mxu0 %v5909_v11  ;;  %4723 = vmatprep.mubr.msk.bf16.mxu1 %vm5910_vm2, %v5909_v11 }
 0x488   : > { %4733 = vmatprep.subr.bf16.mxu1 %v5909_v11 }
 0x48a   : > { %v1574_v53 = vpop.f32.mrb[16].mxu0  ;;  %v6895_v54 = vpop.f32.mrb[16].mxu1 }
 0x48b   : > { %v1846_v56 = vpack.c.bf16 %v1574_v53, %v1574_v53  ;;  %v4649_v57 = vpop.f32.mrb[17].mxu0  ;;  %v4689_v58 = vpop.f32.mrb[17].mxu1 }
 0x48c   : > { %v1577_v59 = vpop.f32.mrb[18].mxu0  ;;  %v1837_v60 = vpop.f32.mrb[18].mxu1 }
 0x48d   : > { %v1945_v61 = vsel %vm1848_vm3, %v1846_v56, 0  ;;  %v4650_v62 = vpop.f32.mrb[19].mxu0  ;;  %v4690_v44 = vpop.f32.mrb[19].mxu1  ;;  %4694 = vmatmul.mubr.msk.bf16.vlgmr.msra.gmra.mrb[28].mxu0 %vm1848_vm3, %v1840_v55 }
 0x48e   : > { %4704 = vmatpush3.bf16.xpose.msra.mxu0 %v1945_v61  ;;  %4705 = vmatprep.mubr.msk.bf16.mxu0 %vm5910_vm2, %v5909_v11 }
 0x48f   : > { %4715 = vmatprep.subr.bf16.mxu0 %v5909_v11 }
 0x492   : > { %v1678_v1 = vpop.f32.mrb[20].mxu0 }
 0x493   : > { %v2081_v3 = vpack.c.bf16 %v1678_v1, %v1678_v1  ;;  %v4665_v4 = vpop.f32.mrb[21].mxu0 }
 0x494   : > { %v1681_v5 = vpop.f32.mrb[22].mxu0 }
 0x495   : > { %v2090_v6 = vsel %vm2088_vm4, %v2081_v3, 0  ;;  %v4666_v7 = vpop.f32.mrb[23].mxu0  ;;  %4706 = vmatmul.mubr.msk.bf16.vlgmr.msra.gmra.mrb[32].mxu0 %vm1848_vm3, %v1842_v2 }
 0x496   : > { %4716 = vmatpush3.bf16.msra.mxu0 %v2090_v6  ;;  %4717 = vmatprep.mubr.msk.bf16.mxu0 %vm5910_vm2, %v5909_v11 }
 0x497   : > { %4727 = vmatprep.subr.bf16.mxu0 %v5909_v11 }
 0x49a   : > { %v6907_v8 = vpop.f32.mrb[24].mxu0 }
 0x49b   : > { %v4681_v63 = vpop.f32.mrb[25].mxu0 }
 0x49c   : > { %v1785_v14 = vpop.f32.mrb[26].mxu0 }
 0x49d   : > { %v4682_v15 = vpop.f32.mrb[27].mxu0 }
 0x550   : > { %v1935_v16 = vpop.f32.mrb[20].mxu1 }
 0x551   : > { %v4701_v17 = vpop.f32.mrb[21].mxu1  ;;  %v2036_v45 = vsel %vm1848_vm3, %v1935_v16, -inf }
 0x552   : > { %v1938_v19 = vpop.f32.mrb[22].mxu1 }
 0x553   : > { %v4702_v21 = vpop.f32.mrb[23].mxu1 }
 0x558   : > { %v2027_v22 = vpop.f32.mrb[24].mxu1 }
 0x559   : > { %v4713_v25 = vpop.f32.mrb[25].mxu1  ;;  %v2042_v56 = vsel %vm1848_vm3, %v2027_v22, -inf }
 0x55a   : > { %v2030_v46 = vpop.f32.mrb[26].mxu1  ;;  %v6916_v25 = vld [vmem:[#allocation2 + $0x8] sm:$0xff] }
 0x55b   : > { %v4714_v47 = vpop.f32.mrb[27].mxu1  ;;  %v1114_v46 = vsel %vm1110_vm1, %v6916_v25, 0.0 }
 0x560   : > { %v1889_v48 = vpop.f32.mrb[28].mxu0 }
 0x561   : > { %v4695_v49 = vpop.f32.mrb[29].mxu0  ;;  %v2033_v50 = vsel %vm1848_vm3, %v1889_v48, -inf }
 0x562   : > { %2034 = vmax.xlane.f32.xlu1 %v2033_v50  ;;  %v1892_v51 = vpop.f32.mrb[30].mxu0 }
 0x563   : > { %v4696_v52 = vpop.f32.mrb[31].mxu0 }
 0x564   : > { %v2083_v52 = vpack.c.bf16 %v6907_v8, %v6907_v8 }
 0x566   : > { %2037 = vmax.xlane.f32.xlu1 %v2036_v45 }
 0x568   : > { %v1981_v53 = vpop.f32.mrb[32].mxu0 }
 0x569   : > { %v4707_v55 = vpop.f32.mrb[33].mxu0  ;;  %v2039_v57 = vsel %vm1848_vm3, %v1981_v53, -inf }
 0x56a   : > { %2043 = vmax.xlane.f32.xlu1 %v2042_v56  ;;  %2040 = vmax.xlane.f32.xlu0 %v2039_v57  ;;  %v1984_v58 = vpop.f32.mrb[34].mxu0 }
 0x56b   : > { %v4708_v59 = vpop.f32.mrb[35].mxu0  ;;  %v2084_v58 = vpack.c.bf16 %v6895_v54, %v6895_v54 }
 0x56c   : > { %v2182_v59 = vsel %vm2088_vm4, %v2083_v52, 0 }
 0x56d   : > { %v2228_v54 = vsel %vm2088_vm4, %v2084_v58, 0 }
 0x5ef   : > { %v2035_v60 = vpop.xlane.xlu1 %2034 }
 0x5f0   : > { %v2045_v61 = vsub.f32 %v1889_v48, %v2035_v60 }
 0x5f2   : > { %v2049_v62 = vmul.f32 1.442695, %v2045_v61 }
 0x5f3   : > { %v2038_v44 = vpop.xlane.xlu1 %2037 }
 0x5f4   : > { %5186 = vpow2.f32 %v2049_v62  ;;  %v2046_v0 = vsub.f32 %v1935_v16, %v2038_v44 }
 0x5f6   : > { %v2051_v1 = vmul.f32 1.442695, %v2046_v0 }
 0x5f7   : > { %v2044_v2 = vpop.xlane.xlu1 %2043  ;;  %v2041_v3 = vpop.xlane.xlu0 %2040 }
 0x5f8   : > { %5188 = vpow2.f32 %v2051_v1  ;;  %v2048_v4 = vsub.f32 %v2027_v22, %v2044_v2  ;;  %v2047_v5 = vsub.f32 %v1981_v53, %v2041_v3 }
 0x5fa   : > { %v2055_v6 = vmul.f32 1.442695, %v2048_v4  ;;  %v2053_v7 = vmul.f32 1.442695, %v2047_v5 }
 0x5fc   : > { %5190 = vpow2.f32 %v2055_v6  ;;  %v1204_v6 = vld [vmem:[%s6649_s21] sm:$0xf] }
 0x5fd   : > { %5192 = vpow2.f32 %v2053_v7  ;;  %v6945_v7 = vsel %vm2088_vm4, %v1204_v6, 0  ;;  %v5228_v6 = vld [vmem:[#allocation2] sm:$0xff] }
 0x5fe   : > { %v5187_v63 = vpop.eup %5186 }
 0x5ff   : > { %v2057_v14 = vsel %vm1848_vm3, %v5187_v63, 0.0 }
 0x600   : > { %2058 = vadd.xlane.f32.xlu0 %v2057_v14 }
 0x602   : > { %v5189_v15 = vpop.eup %5188 }
 0x603   : > { %v2060_v17 = vsel %vm1848_vm3, %v5189_v15, 0.0 }
 0x604   : > { %2061 = vadd.xlane.f32.xlu1 %v2060_v17 }
 0x606   : > { %v5191_v19 = vpop.eup %5190 }
 0x607   : > { %v5193_v16 = vpop.eup %5192  ;;  %v2066_v21 = vsel %vm1848_vm3, %v5191_v19, 0.0 }
 0x608   : > { %2067 = vadd.xlane.f32.xlu1 %v2066_v21  ;;  %v2063_v22 = vsel %vm1848_vm3, %v5193_v16, 0.0 }
 0x609   : > { %2064 = vadd.xlane.f32.xlu0 %v2063_v22 }
 0x60d   : > { %1115 = vadd.xlane.f32.xlu0 %v1114_v46 }
 0x68d   : > { %v2059_v47 = vpop.xlane.xlu0 %2058 }
 0x68e   : > { %5194 = vrcp.f32 %v2059_v47 }
 0x691   : > { %v2062_v48 = vpop.xlane.xlu1 %2061 }
 0x692   : > { %5196 = vrcp.f32 %v2062_v48 }
 0x695   : > { %v2068_v49 = vpop.xlane.xlu1 %2067 }
 0x696   : > { %5198 = vrcp.f32 %v2068_v49  ;;  %v2065_v50 = vpop.xlane.xlu0 %2064  ;;  %v1207_v49 = vld [vmem:[%s6649_s21 + $0xc] sm:$0xf] }
 0x697   : > { %5200 = vrcp.f32 %v2065_v50 }
 0x698   : > { %v5195_v51 = vpop.eup %5194 }
 0x699   : > { %v2073_v45 = vmul.f32 %v5195_v51, %v5187_v63  ;;  %v1205_v63 = vld [vmem:[%s6649_s21 + $0x4] sm:$0xf] }
 0x69a   : > { %v1116_v53 = vpop.xlane.xlu0 %1115  ;;  %v6951_v14 = vsel %vm2088_vm4, %v1205_v63, 0 }
 0x69b   : > { %v1119_v55 = vmul.f32 0.03125, %v1116_v53  ;;  %v2077_v56 = vpack.c.bf16 %v2073_v45, %v2073_v45 }
 0x69c   : > { %v5197_v57 = vpop.eup %5196 }
 0x69d   : > { %v2074_v60 = vmul.f32 %v5197_v57, %v5189_v15  ;;  %v1121_v61 = vsub.f32 %v6916_v25, %v1119_v55  ;;  %4718 = vmatmul.mubr.msk.bf16.vlgmr.msra.gmra.mrb[36].mxu0 %vm1848_vm3, %v2077_v56  ;;  %v6965_v55 = vsel %vm2088_vm4, %v1207_v49, 0 }
 0x69e   : > { %4728 = vmatpush3.bf16.msra.mxu0 %v2182_v59  ;;  %4729 = vmatprep.mubr.msk.bf16.mxu0 %vm5910_vm2, %v5909_v11 }
 0x69f   : > { %v2078_v8 = vpack.c.bf16 %v2074_v60, %v2074_v60  ;;  %v1123_v62 = vmul.f32 %v1121_v61, %v1121_v61  ;;  %4739 = vmatprep.subr.bf16.mxu0 %v5909_v11 }
 0x6a0   : > { %v5199_v44 = vpop.eup %5198 }
 0x6a1   : > { %v5201_v0 = vpop.eup %5200  ;;  %4724 = vmatmul.mubr.msk.bf16.vlgmr.msra.gmra.mrb[28].mxu1 %vm1848_vm3, %v2078_v8  ;;  %v1127_v1 = vsel %vm1110_vm1, %v1123_v62, 0.0  ;;  %v2076_v3 = vmul.f32 %v5199_v44, %v5191_v19 }
 0x6a2   : > { %v2075_v2 = vmul.f32 %v5201_v0, %v5193_v16  ;;  %4734 = vmatpush3.bf16.msra.mxu1 %v2228_v54  ;;  %1128 = vadd.xlane.f32.xlu1 %v1127_v1  ;;  %v1206_v16 = vld [vmem:[%s6649_s21 + $0x8] sm:$0xf] }
 0x6a3   : > { %4735 = vmatprep.mubr.msk.bf16.mxu1 %vm5910_vm2, %v5909_v11  ;;  %4745 = vmatprep.subr.bf16.mxu1 %v5909_v11  ;;  %v2080_v5 = vpack.c.bf16 %v2076_v3, %v2076_v3  ;;  %v6957_v47 = vsel %vm2088_vm4, %v1206_v16, 0 }
 0x6a4   : > { %v2079_v4 = vpack.c.bf16 %v2075_v2, %v2075_v2 }
 0x6a6   : > { %4730 = vmatmul.mubr.msk.bf16.vlgmr.msra.gmra.mrb[40].mxu0 %vm1848_vm3, %v2079_v4 }
 0x6a7   : > { %4741 = vmatprep.mubr.msk.bf16.mxu0 %vm5910_vm2, %v5909_v11  ;;  %4740 = vmatpush3.bf16.msra.mxu0 %v6945_v7 }
 0x6a8   : > { %4751 = vmatprep.subr.bf16.mxu0 %v5909_v11 }
 0x6a9   : > { %4736 = vmatmul.mubr.msk.bf16.vlgmr.msra.gmra.mrb[32].mxu1 %vm1848_vm3, %v2080_v5 }
 0x6aa   : > { %4747 = vmatprep.mubr.msk.bf16.mxu1 %vm5910_vm2, %v5909_v11  ;;  %4746 = vmatpush3.bf16.msra.mxu1 %v6951_v14 }
 0x6ab   : > { %4757 = vmatprep.subr.bf16.mxu1 %v5909_v11 }
 0x72f   : > { %v1129_v15 = vpop.xlane.xlu1 %1128 }
 0x730   : > { %v1131_v17 = vmul.f32 0.03125, %v1129_v15 }
 0x732   : > { %v1133_v19 = vadd.f32 1e-05, %v1131_v17 }
 0x734   : > { %5202 = vrsqrt.f32 %v1133_v19 }
 0x73e   : > { %v5203_v50 = vpop.eup %5202 }
 0x73f   : > { %v1137_v56 = vmul.f32 %v5203_v50, %v1121_v61 }
 0x741   : > { %v1145_v60 = vmul.f32 %v6723_v18, %v1137_v56 }
 0x743   : > { %v1153_v2 = vadd.f32 %v6727_v20, %v1145_v60 }
 0x770   : > { %v2126_v21 = vpop.f32.mrb[36].mxu0 }
 0x771   : > { %v2270_v22 = vpack.c.bf16 %v2126_v21, %v2126_v21  ;;  %v4719_v46 = vpop.f32.mrb[37].mxu0 }
 0x772   : > { %v2129_v48 = vpop.f32.mrb[38].mxu0 }
 0x773   : > { %v4720_v51 = vpop.f32.mrb[39].mxu0  ;;  %4742 = vmatmul.mubr.msk.bf16.vlgmr.msra.gmra.mrb[44].mxu0 %vm1848_vm3, %v2270_v22 }
 0x774   : > { %v2172_v52 = vpop.f32.mrb[28].mxu1  ;;  %4752 = vmatpush3.bf16.msra.mxu0 %v6957_v47  ;;  %4753 = vmatprep.mubr.msk.bf16.mxu0 %vm5910_vm2, %v5909_v11 }
 0x775   : > { %v2271_v45 = vpack.c.bf16 %v2172_v52, %v2172_v52  ;;  %v4725_v53 = vpop.f32.mrb[29].mxu1  ;;  %4763 = vmatprep.subr.bf16.mxu0 %v5909_v11 }
 0x776   : > { %v2175_v57 = vpop.f32.mrb[30].mxu1 }
 0x777   : > { %v4726_v58 = vpop.f32.mrb[31].mxu1  ;;  %4748 = vmatmul.mubr.msk.bf16.vlgmr.msra.gmra.mrb[36].mxu1 %vm1848_vm3, %v2271_v45 }
 0x778   : > { %4758 = vmatpush3.bf16.msra.mxu1 %v6965_v55  ;;  %4759 = vmatprep.mubr.msk.bf16.mxu1 %vm5910_vm2, %v5909_v11 }
 0x779   : > { %v2218_v59 = vpop.f32.mrb[40].mxu0  ;;  %4771 = vmatprep.subr.bf16.mxu1 %v5909_v11 }
 0x77a   : > { %v2272_v8 = vpack.c.bf16 %v2218_v59, %v2218_v59  ;;  %v4731_v62 = vpop.f32.mrb[41].mxu0 }
 0x77b   : > { %v2221_v44 = vpop.f32.mrb[42].mxu0 }
 0x77c   : > { %v4732_v0 = vpop.f32.mrb[43].mxu0  ;;  %4754 = vmatmul.mubr.msk.bf16.vlgmr.msra.gmra.mrb[48].mxu0 %vm1848_vm3, %v2272_v8  ;;  %v2264_v61 = vpop.f32.mrb[32].mxu1 }
 0x77d   : > { %v2273_v54 = vpack.c.bf16 %v2264_v61, %v2264_v61  ;;  %4764 = vmatpush3.bf16.msra.mxu0 %v6696_v9  ;;  %v4737_v1 = vpop.f32.mrb[33].mxu1  ;;  %4767 = vmatprep.mubr.msk.bf16.mxu0 %vm5910_vm2, %v5909_v11  ;;  %v6986_v9 = vpack.c.bf16 %v1153_v2, %v1153_v2 }
 0x77e   : > { %v2267_v3 = vpop.f32.mrb[34].mxu1  ;;  %4765 = vmatprep.subr.bf16.mxu0 %v5909_v11 }
 0x77f   : > { %v4738_v18 = vpop.f32.mrb[35].mxu1  ;;  %4760 = vmatmul.mubr.msk.bf16.vlgmr.msra.gmra.mrb[40].mxu1 %vm1848_vm3, %v2273_v54 }
 0x780   : > { %4772 = vmatpush3.bf16.msra.mxu1 %v6732_v23  ;;  %4775 = vmatprep.mubr.msk.bf16.mxu1 %vm5910_vm2, %v5909_v11 }
 0x781   : > { %4766 = vmatpush3.bf16.msra.mxu0 %v6708_v12  ;;  %4773 = vmatprep.subr.bf16.mxu1 %v5909_v11 }
 0x782   : > { %4779 = vmatprep.subr.bf16.mxu0 %v5909_v11 }
 0x784   : > { %4768 = vmatmul.mubr.msk.bf16.vlgmr.msra.gmra.mrb[52].mxu0 %vm1110_vm1, %v6986_v9  ;;  %4774 = vmatpush3.bf16.msra.mxu1 %v6746_v26 }
 0x785   : > { %4780 = vmatpush3.bf16.msra.mxu0 %v6760_v28  ;;  %4787 = vmatprep.subr.bf16.mxu1 %v5909_v11 }
 0x786   : > { %4781 = vmatprep.subr.bf16.mxu0 %v5909_v11  ;;  %4783 = vmatprep.mubr.msk.bf16.mxu0 %vm5910_vm2, %v5909_v11 }
 0x787   : > { %4776 = vmatmul.mubr.msk.bf16.vlgmr.msra.gmra.mrb[44].mxu1 %vm1110_vm1, %v6986_v9 }
 0x788   : > { %4788 = vmatpush3.bf16.msra.mxu1 %v6699_v10  ;;  %4791 = vmatprep.mubr.msk.bf16.mxu1 %vm5910_vm2, %v5909_v11 }
 0x789   : > { %4782 = vmatpush3.bf16.msra.mxu0 %v6774_v30  ;;  %4789 = vmatprep.subr.bf16.mxu1 %v5909_v11 }
 0x78a   : > { %4795 = vmatprep.subr.bf16.mxu0 %v5909_v11 }
 0x78c   : > { %4784 = vmatmul.mubr.msk.bf16.vlgmr.msra.gmra.mrb[56].mxu0 %vm1110_vm1, %v6986_v9  ;;  %4790 = vmatpush3.bf16.msra.mxu1 %v6711_v13 }
 0x78d   : > { %4796 = vmatpush3.bf16.msra.mxu0 %v6788_v32  ;;  %4803 = vmatprep.subr.bf16.mxu1 %v5909_v11 }
 0x78e   : > { %4797 = vmatprep.subr.bf16.mxu0 %v5909_v11  ;;  %4799 = vmatprep.mubr.msk.bf16.mxu0 %vm5910_vm2, %v5909_v11 }
 0x78f   : > { %4792 = vmatmul.mubr.msk.bf16.vlgmr.msra.gmra.mrb[48].mxu1 %vm1110_vm1, %v6986_v9 }
 0x790   : > { %4804 = vmatpush3.bf16.msra.mxu1 %v6735_v24  ;;  %4807 = vmatprep.mubr.msk.bf16.mxu1 %vm5910_vm2, %v5909_v11 }
 0x791   : > { %4798 = vmatpush3.bf16.msra.mxu0 %v6802_v34  ;;  %4805 = vmatprep.subr.bf16.mxu1 %v5909_v11 }
 0x792   : > { %4811 = vmatprep.subr.bf16.mxu0 %v5909_v11 }
 0x794   : > { %4800 = vmatmul.mubr.msk.bf16.vlgmr.msra.gmra.mrb[60].mxu0 %vm1110_vm1, %v6986_v9  ;;  %4806 = vmatpush3.bf16.msra.mxu1 %v6749_v27 }
 0x795   : > { %4812 = vmatpush3.bf16.msra.mxu0 %v6816_v36  ;;  %4819 = vmatprep.subr.bf16.mxu1 %v5909_v11 }
 0x796   : > { %4813 = vmatprep.subr.bf16.mxu0 %v5909_v11  ;;  %4815 = vmatprep.mubr.msk.bf16.mxu0 %vm5910_vm2, %v5909_v11 }
 0x797   : > { %4808 = vmatmul.mubr.msk.bf16.vlgmr.msra.gmra.mrb[52].mxu1 %vm1110_vm1, %v6986_v9 }
 0x798   : > { %4820 = vmatpush3.bf16.msra.mxu1 %v6763_v29  ;;  %4823 = vmatprep.mubr.msk.bf16.mxu1 %vm5910_vm2, %v5909_v11 }
 0x799   : > { %4814 = vmatpush3.bf16.msra.mxu0 %v6830_v38  ;;  %4821 = vmatprep.subr.bf16.mxu1 %v5909_v11  ;;  %v7084_v38 = vld [vmem:[%s927_s8] ss:$0 sm:$0xff] }
 0x79a   : > { %4827 = vmatprep.subr.bf16.mxu0 %v5909_v11 }
 0x79c   : > { %4816 = vmatmul.mubr.msk.bf16.vlgmr.msra.gmra.mrb[64].mxu0 %vm1110_vm1, %v6986_v9  ;;  %4822 = vmatpush3.bf16.msra.mxu1 %v6777_v31 }
 0x79d   : > { %4828 = vmatpush3.bf16.msra.mxu0 %v6844_v40  ;;  %4835 = vmatprep.subr.bf16.mxu1 %v5909_v11 }
 0x79e   : > { %4829 = vmatprep.subr.bf16.mxu0 %v5909_v11  ;;  %4831 = vmatprep.mubr.msk.bf16.mxu0 %vm5910_vm2, %v5909_v11 }
 0x79f   : > { %4824 = vmatmul.mubr.msk.bf16.vlgmr.msra.gmra.mrb[56].mxu1 %vm1110_vm1, %v6986_v9 }
 0x7a0   : > { %4836 = vmatpush3.bf16.msra.mxu1 %v6791_v33  ;;  %4839 = vmatprep.mubr.msk.bf16.mxu1 %vm5910_vm2, %v5909_v11 }
 0x7a1   : > { %4830 = vmatpush3.bf16.msra.mxu0 %v6854_v41  ;;  %4837 = vmatprep.subr.bf16.mxu1 %v5909_v11 }
 0x7a2   : > { %4843 = vmatprep.subr.bf16.mxu0 %v5909_v11 }
 0x7a4   : > { %4832 = vmatmul.mubr.msk.bf16.vlgmr.msra.gmra.mrb[68].mxu0 %vm1110_vm1, %v6986_v9  ;;  %4838 = vmatpush3.bf16.msra.mxu1 %v6805_v35 }
 0x7a5   : > { %4844 = vmatpush3.bf16.msra.mxu0 %v6863_v42  ;;  %4851 = vmatprep.subr.bf16.mxu1 %v5909_v11 }
 0x7a6   : > { %4845 = vmatprep.subr.bf16.mxu0 %v5909_v11  ;;  %4847 = vmatprep.mubr.msk.bf16.mxu0 %vm5910_vm2, %v5909_v11 }
 0x7a7   : > { %4840 = vmatmul.mubr.msk.bf16.vlgmr.msra.gmra.mrb[60].mxu1 %vm1110_vm1, %v6986_v9 }
 0x7a8   : > { %4852 = vmatpush3.bf16.msra.mxu1 %v6819_v37  ;;  %4855 = vmatprep.mubr.msk.bf16.mxu1 %vm5910_vm2, %v5909_v11 }
 0x7a9   : > { %4846 = vmatpush3.bf16.msra.mxu0 %v6870_v43  ;;  %4853 = vmatprep.subr.bf16.mxu1 %v5909_v11 }
 0x7aa   : > { %4859 = vmatprep.subr.bf16.mxu0 %v5909_v11 }
 0x7ac   : > { %4848 = vmatmul.mubr.msk.bf16.vlgmr.msra.gmra.mrb[72].mxu0 %vm1110_vm1, %v6986_v9  ;;  %4854 = vmatpush3.bf16.msra.mxu1 %v6833_v39 }
 0x7ad   : > { %4865 = vmatprep.subr.bf16.mxu1 %v5909_v11  ;;  %4861 = vmatprep.mubr.msk.bf16.mxu0 %vm5910_vm2, %v5909_v11 }
 0x7af   : > { %4856 = vmatmul.mubr.msk.bf16.vlgmr.msra.gmra.mrb[64].mxu1 %vm1110_vm1, %v6986_v9 }
 0x7b0   : > { %4867 = vmatprep.mubr.msk.bf16.mxu1 %vm5910_vm2, %v5909_v11 }
 0x846   : > { %v2314_v10 = vpop.f32.mrb[44].mxu0 }
 0x847   : > { %v4743_v12 = vpop.f32.mrb[45].mxu0  ;;  %v2458_v24 = vsel %vm1110_vm1, %v2314_v10, 0.0 }
 0x848   : > { %v2317_v13 = vpop.f32.mrb[46].mxu0 }
 0x849   : > { %v4744_v20 = vpop.f32.mrb[47].mxu0 }
 0x84a   : > { %v2360_v23 = vpop.f32.mrb[36].mxu1 }
 0x84b   : > { %v2459_v26 = vsel %vm1110_vm1, %v2360_v23, 0.0  ;;  %v4749_v27 = vpop.f32.mrb[37].mxu1 }
 0x84c   : > { %v2460_v28 = vadd.f32 %v2459_v26, %v2458_v24  ;;  %v2363_v29 = vpop.f32.mrb[38].mxu1 }
 0x84d   : > { %v4750_v30 = vpop.f32.mrb[39].mxu1 }
 0x84f   : > { %v2406_v31 = vpop.f32.mrb[48].mxu0 }
 0x850   : > { %v2461_v32 = vsel %vm1110_vm1, %v2406_v31, 0.0  ;;  %v4755_v33 = vpop.f32.mrb[49].mxu0 }
 0x851   : > { %v2462_v34 = vadd.f32 %v2461_v32, %v2460_v28  ;;  %v2409_v35 = vpop.f32.mrb[50].mxu0 }
 0x852   : > { %v4756_v36 = vpop.f32.mrb[51].mxu0  ;;  %v2452_v37 = vpop.f32.mrb[40].mxu1 }
 0x853   : > { %v2463_v39 = vsel %vm1110_vm1, %v2452_v37, 0.0  ;;  %v4761_v40 = vpop.f32.mrb[41].mxu1 }
 0x854   : > { %v2464_v41 = vadd.f32 %v2463_v39, %v2462_v34  ;;  %v2455_v42 = vpop.f32.mrb[42].mxu1 }
 0x855   : > { %v4762_v43 = vpop.f32.mrb[43].mxu1 }
 0x856   : > { %v2471_v4 = vadd.f32 %v7084_v38, %v2464_v41 }
 0x857   : > { %v2511_v5 = vpop.f32.mrb[52].mxu0 }
 0x858   : > { %v2472_v63 = vadd.f32 %v5228_v6, %v2471_v4  ;;  %v4769_v15 = vpop.f32.mrb[53].mxu0  ;;  %v2637_v54 = vmul.f32 0.35355338, %v2511_v5 }
 0x859   : > { %v2514_v17 = vpop.f32.mrb[54].mxu0 }
 0x85a   : > { %2473 = vst.msk [vmem:[#allocation2] sm:$0xff] %vm1110_vm1, %v2472_v63  ;;  %v4770_v19 = vpop.f32.mrb[55].mxu0  ;;  %v2551_v16 = vpop.f32.mrb[44].mxu1  ;;  %v2961_v10 = vpack.c.bf16 %v2637_v54, %v2637_v54 }
 0x85b   : > { %v4777_v21 = vpop.f32.mrb[45].mxu1  ;;  %v2638_v18 = vmul.f32 0.35355338, %v2551_v16 }
 0x85c   : > { %v2554_v22 = vpop.f32.mrb[46].mxu1 }
 0x85d   : > { %v4778_v46 = vpop.f32.mrb[47].mxu1  ;;  %v2962_v27 = vpack.c.bf16 %v2638_v18, %v2638_v18 }
 0x85f   : > { %v2591_v48 = vpop.f32.mrb[56].mxu0 }
 0x860   : > { %v4785_v49 = vpop.f32.mrb[57].mxu0  ;;  %v2639_v30 = vmul.f32 0.35355338, %v2591_v48 }
 0x861   : > { %v2594_v50 = vpop.f32.mrb[58].mxu0 }
 0x862   : > { %v4786_v51 = vpop.f32.mrb[59].mxu0  ;;  %v2631_v52 = vpop.f32.mrb[48].mxu1  ;;  %v2963_v36 = vpack.c.bf16 %v2639_v30, %v2639_v30 }
 0x863   : > { %v4793_v45 = vpop.f32.mrb[49].mxu1  ;;  %v2640_v34 = vmul.f32 0.35355338, %v2631_v52 }
 0x864   : > { %v2634_v53 = vpop.f32.mrb[50].mxu1 }
 0x865   : > { %v4794_v56 = vpop.f32.mrb[51].mxu1  ;;  %v2964_v4 = vpack.c.bf16 %v2640_v34, %v2640_v34 }
 0x867   : > { %v2675_v57 = vpop.f32.mrb[60].mxu0 }
 0x868   : > { %v2965_v58 = vpack.c.bf16 %v2675_v57, %v2675_v57  ;;  %v4801_v59 = vpop.f32.mrb[61].mxu0 }
 0x869   : > { %v2678_v60 = vpop.f32.mrb[62].mxu0 }
 0x86a   : > { %v2973_v8 = vsel %vm1848_vm3, %v2965_v58, 0  ;;  %v4802_v62 = vpop.f32.mrb[63].mxu0  ;;  %v2715_v44 = vpop.f32.mrb[52].mxu1 }
 0x86b   : > { %v2966_v0 = vpack.c.bf16 %v2715_v44, %v2715_v44  ;;  %4860 = vmatpush3.bf16.xpose.msra.mxu0 %v2973_v8  ;;  %v4809_v61 = vpop.f32.mrb[53].mxu1 }
 0x86c   : > { %v2718_v1 = vpop.f32.mrb[54].mxu1  ;;  %4871 = vmatprep.subr.bf16.mxu0 %v5909_v11 }
 0x86d   : > { %v3019_v2 = vsel %vm1848_vm3, %v2966_v0, 0  ;;  %v4810_v3 = vpop.f32.mrb[55].mxu1 }
 0x86e   : > { %4866 = vmatpush3.bf16.xpose.msra.mxu1 %v3019_v2 }
 0x86f   : > { %v2755_v9 = vpop.f32.mrb[64].mxu0  ;;  %4877 = vmatprep.subr.bf16.mxu1 %v5909_v11 }
 0x870   : > { %v2967_v12 = vpack.c.bf16 %v2755_v9, %v2755_v9  ;;  %v4817_v13 = vpop.f32.mrb[65].mxu0 }
 0x871   : > { %v2758_v20 = vpop.f32.mrb[66].mxu0 }
 0x872   : > { %v3065_v23 = vsel %vm1848_vm3, %v2967_v12, 0  ;;  %v4818_v24 = vpop.f32.mrb[67].mxu0  ;;  %4862 = vmatmul.mubr.msk.bf16.vlgmr.msra.gmra.mrb[76].mxu0 %vm1848_vm3, %v2961_v10  ;;  %v2795_v26 = vpop.f32.mrb[56].mxu1 }
 0x873   : > { %v2968_v28 = vpack.c.bf16 %v2795_v26, %v2795_v26  ;;  %4872 = vmatpush3.bf16.xpose.msra.mxu0 %v3065_v23  ;;  %v4825_v29 = vpop.f32.mrb[57].mxu1  ;;  %4873 = vmatprep.mubr.msk.bf16.mxu0 %vm5910_vm2, %v5909_v11 }
 0x874   : > { %v2798_v31 = vpop.f32.mrb[58].mxu1  ;;  %4883 = vmatprep.subr.bf16.mxu0 %v5909_v11 }
 0x875   : > { %v3111_v32 = vsel %vm1848_vm3, %v2968_v28, 0  ;;  %v4826_v33 = vpop.f32.mrb[59].mxu1  ;;  %4868 = vmatmul.mubr.msk.bf16.vlgmr.msra.gmra.mrb[68].mxu1 %vm1848_vm3, %v2962_v27 }
 0x876   : > { %4878 = vmatpush3.bf16.xpose.msra.mxu1 %v3111_v32  ;;  %4879 = vmatprep.mubr.msk.bf16.mxu1 %vm5910_vm2, %v5909_v11 }
 0x877   : > { %v2835_v35 = vpop.f32.mrb[68].mxu0  ;;  %4889 = vmatprep.subr.bf16.mxu1 %v5909_v11 }
 0x878   : > { %v3201_v37 = vpack.c.bf16 %v2835_v35, %v2835_v35  ;;  %v4833_v39 = vpop.f32.mrb[69].mxu0 }
 0x879   : > { %v2838_v40 = vpop.f32.mrb[70].mxu0  ;;  %v7124_v39 = vld [vmem:[#allocation2] sm:$0xff] }
 0x87a   : > { %v3209_v41 = vsel %vm2088_vm4, %v3201_v37, 0  ;;  %v4834_v42 = vpop.f32.mrb[71].mxu0  ;;  %4874 = vmatmul.mubr.msk.bf16.vlgmr.msra.gmra.mrb[80].mxu0 %vm1848_vm3, %v2963_v36  ;;  %v2875_v43 = vpop.f32.mrb[60].mxu1 }
 0x87b   : > { %v3202_v5 = vpack.c.bf16 %v2875_v43, %v2875_v43  ;;  %4884 = vmatpush3.bf16.msra.mxu0 %v3209_v41  ;;  %v4841_v6 = vpop.f32.mrb[61].mxu1  ;;  %4885 = vmatprep.mubr.msk.bf16.mxu0 %vm5910_vm2, %v5909_v11  ;;  %v3580_v42 = vsel %vm1110_vm1, %v7124_v39, 0.0 }
 0x87c   : > { %v2878_v63 = vpop.f32.mrb[62].mxu1  ;;  %4895 = vmatprep.subr.bf16.mxu0 %v5909_v11 }
 0x87d   : > { %v3255_v15 = vsel %vm2088_vm4, %v3202_v5, 0  ;;  %v4842_v17 = vpop.f32.mrb[63].mxu1  ;;  %4880 = vmatmul.mubr.msk.bf16.vlgmr.msra.gmra.mrb[72].mxu1 %vm1848_vm3, %v2964_v4 }
 0x87e   : > { %4890 = vmatpush3.bf16.msra.mxu1 %v3255_v15  ;;  %4891 = vmatprep.mubr.msk.bf16.mxu1 %vm5910_vm2, %v5909_v11 }
 0x87f   : > { %v7112_v19 = vpop.f32.mrb[72].mxu0  ;;  %4901 = vmatprep.subr.bf16.mxu1 %v5909_v11 }
 0x880   : > { %v4849_v16 = vpop.f32.mrb[73].mxu0  ;;  %v3203_v15 = vpack.c.bf16 %v7112_v19, %v7112_v19 }
 0x881   : > { %v2918_v21 = vpop.f32.mrb[74].mxu0 }
 0x882   : > { %v4850_v22 = vpop.f32.mrb[75].mxu0  ;;  %v7115_v46 = vpop.f32.mrb[64].mxu1 }
 0x883   : > { %v4857_v48 = vpop.f32.mrb[65].mxu1 }
 0x884   : > { %v2958_v49 = vpop.f32.mrb[66].mxu1 }
 0x885   : > { %v4858_v50 = vpop.f32.mrb[67].mxu1  ;;  %v3204_v49 = vpack.c.bf16 %v7115_v46, %v7115_v46 }
 0x887   : > { %v3347_v46 = vsel %vm2088_vm4, %v3204_v49, 0 }
 0x945   : > { %v3009_v51 = vpop.f32.mrb[76].mxu0 }
 0x946   : > { %v4863_v52 = vpop.f32.mrb[77].mxu0  ;;  %v3153_v45 = vsel %vm1848_vm3, %v3009_v51, -inf }
 0x947   : > { %3154 = vmax.xlane.f32.xlu0 %v3153_v45  ;;  %v3012_v53 = vpop.f32.mrb[78].mxu0  ;;  %v3301_v52 = vsel %vm2088_vm4, %v3203_v15, 0 }
 0x948   : > { %v4864_v56 = vpop.f32.mrb[79].mxu0  ;;  %v3055_v57 = vpop.f32.mrb[68].mxu1 }
 0x949   : > { %v4869_v58 = vpop.f32.mrb[69].mxu1  ;;  %v3156_v59 = vsel %vm1848_vm3, %v3055_v57, -inf }
 0x94a   : > { %3157 = vmax.xlane.f32.xlu1 %v3156_v59  ;;  %v3058_v60 = vpop.f32.mrb[70].mxu1 }
 0x94b   : > { %v4870_v8 = vpop.f32.mrb[71].mxu1 }
 0x94d   : > { %v3101_v62 = vpop.f32.mrb[80].mxu0 }
 0x94e   : > { %v4875_v44 = vpop.f32.mrb[81].mxu0  ;;  %v3159_v0 = vsel %vm1848_vm3, %v3101_v62, -inf }
 0x94f   : > { %3160 = vmax.xlane.f32.xlu0 %v3159_v0  ;;  %v3104_v61 = vpop.f32.mrb[82].mxu0 }
 0x950   : > { %v4876_v54 = vpop.f32.mrb[83].mxu0  ;;  %v3147_v1 = vpop.f32.mrb[72].mxu1 }
 0x951   : > { %v4881_v2 = vpop.f32.mrb[73].mxu1  ;;  %v3162_v3 = vsel %vm1848_vm3, %v3147_v1, -inf }
 0x952   : > { %3163 = vmax.xlane.f32.xlu1 %v3162_v3  ;;  %v3150_v18 = vpop.f32.mrb[74].mxu1 }
 0x953   : > { %v4882_v9 = vpop.f32.mrb[75].mxu1 }
 0x9d4   : > { %v3155_v10 = vpop.xlane.xlu0 %3154 }
 0x9d5   : > { %v3165_v12 = vsub.f32 %v3009_v51, %v3155_v10 }
 0x9d7   : > { %v3169_v13 = vmul.f32 1.442695, %v3165_v12  ;;  %v3158_v20 = vpop.xlane.xlu1 %3157 }
 0x9d8   : > { %v3166_v23 = vsub.f32 %v3055_v57, %v3158_v20 }
 0x9d9   : > { %5204 = vpow2.f32 %v3169_v13 }
 0x9da   : > { %v3171_v24 = vmul.f32 1.442695, %v3166_v23 }
 0x9dc   : > { %5206 = vpow2.f32 %v3171_v24  ;;  %v3161_v26 = vpop.xlane.xlu0 %3160 }
 0x9dd   : > { %v3167_v27 = vsub.f32 %v3101_v62, %v3161_v26 }
 0x9df   : > { %v3173_v28 = vmul.f32 1.442695, %v3167_v27  ;;  %v3164_v29 = vpop.xlane.xlu1 %3163 }
 0x9e0   : > { %v3168_v30 = vsub.f32 %v3147_v1, %v3164_v29 }
 0x9e1   : > { %5208 = vpow2.f32 %v3173_v28 }
 0x9e2   : > { %v3175_v31 = vmul.f32 1.442695, %v3168_v30 }
 0x9e3   : > { %v5205_v32 = vpop.eup %5204 }
 0x9e4   : > { %5210 = vpow2.f32 %v3175_v31  ;;  %v3177_v33 = vsel %vm1848_vm3, %v5205_v32, 0.0 }
 0x9e5   : > { %3178 = vadd.xlane.f32.xlu0 %v3177_v33 }
 0x9e6   : > { %v5207_v34 = vpop.eup %5206 }
 0x9e7   : > { %v3180_v35 = vsel %vm1848_vm3, %v5207_v34, 0.0 }
 0x9e8   : > { %3181 = vadd.xlane.f32.xlu1 %v3180_v35 }
 0x9eb   : > { %v5209_v36 = vpop.eup %5208 }
 0x9ec   : > { %v3183_v37 = vsel %vm1848_vm3, %v5209_v36, 0.0 }
 0x9ed   : > { %3184 = vadd.xlane.f32.xlu0 %v3183_v37 }
 0x9ee   : > { %v5211_v40 = vpop.eup %5210 }
 0x9ef   : > { %v3186_v41 = vsel %vm1848_vm3, %v5211_v40, 0.0 }
 0x9f0   : > { %3187 = vadd.xlane.f32.xlu1 %v3186_v41 }
 0x9f1   : > { %3581 = vadd.xlane.f32.xlu0 %v3580_v42 }
 0xa72   : > { %v3179_v43 = vpop.xlane.xlu0 %3178 }
 0xa73   : > { %5212 = vrcp.f32 %v3179_v43 }
 0xa75   : > { %v3182_v4 = vpop.xlane.xlu1 %3181 }
 0xa76   : > { %5214 = vrcp.f32 %v3182_v4 }
 0xa7a   : > { %v3185_v5 = vpop.xlane.xlu0 %3184 }
 0xa7b   : > { %5216 = vrcp.f32 %v3185_v5 }
 0xa7d   : > { %v5213_v6 = vpop.eup %5212  ;;  %v3188_v63 = vpop.xlane.xlu1 %3187 }
 0xa7e   : > { %v3193_v17 = vmul.f32 %v5213_v6, %v5205_v32  ;;  %5218 = vrcp.f32 %v3188_v63  ;;  %v3582_v16 = vpop.xlane.xlu0 %3581 }
 0xa7f   : > { %v3586_v21 = vmul.f32 0.03125, %v3582_v16 }
 0xa80   : > { %v5215_v22 = vpop.eup %5214  ;;  %v3197_v48 = vpack.c.bf16 %v3193_v17, %v3193_v17 }
 0xa81   : > { %v3194_v50 = vmul.f32 %v5215_v22, %v5207_v34  ;;  %v7134_v51 = vsub.f32 %v7124_v39, %v3586_v21 }
 0xa82   : > { %4886 = vmatmul.mubr.msk.bf16.vlgmr.msra.gmra.mrb[84].mxu0 %vm1848_vm3, %v3197_v48 }
 0xa83   : > { %4896 = vmatpush3.bf16.msra.mxu0 %v3301_v52  ;;  %v3198_v45 = vpack.c.bf16 %v3194_v50, %v3194_v50  ;;  %v3590_v19 = vmul.f32 %v7134_v51, %v7134_v51  ;;  %4897 = vmatprep.mubr.msk.bf16.mxu0 %vm5910_vm2, %v5909_v11 }
 0xa84   : > { %4907 = vmatprep.subr.bf16.mxu0 %v5909_v11 }
 0xa85   : > { %v5217_v53 = vpop.eup %5216  ;;  %4892 = vmatmul.mubr.msk.bf16.vlgmr.msra.gmra.mrb[76].mxu1 %vm1848_vm3, %v3198_v45  ;;  %v3592_v56 = vsel %vm1110_vm1, %v3590_v19, 0.0 }
 0xa86   : > { %v3195_v57 = vmul.f32 %v5217_v53, %v5209_v36  ;;  %4902 = vmatpush3.bf16.msra.mxu1 %v3347_v46  ;;  %3593 = vadd.xlane.f32.xlu0 %v3592_v56  ;;  %v5176_v46 = vld [vmem:[%s6672_s22] sm:$0xff]   ;;  %v5177_v56 = vld [vmem:[%s6672_s22 + $0x8] sm:$0xff]  }
 0xa87   : > { %4903 = vmatprep.mubr.msk.bf16.mxu1 %vm5910_vm2, %v5909_v11  ;;  %4913 = vmatprep.subr.bf16.mxu1 %v5909_v11 }
 0xa88   : > { %v5219_v58 = vpop.eup %5218  ;;  %v3199_v59 = vpack.c.bf16 %v3195_v57, %v3195_v57 }
 0xa89   : > { %v3196_v60 = vmul.f32 %v5219_v58, %v5211_v40 }
 0xa8a   : > { %4898 = vmatmul.mubr.msk.bf16.vlgmr.msra.gmra.mrb[88].mxu0 %vm1848_vm3, %v3199_v59 }
 0xa8b   : > { %v3200_v8 = vpack.c.bf16 %v3196_v60, %v3196_v60  ;;  %4908 = vmatpush3.bf16.msra.mxu0 %v6945_v7  ;;  %4909 = vmatprep.mubr.msk.bf16.mxu0 %vm5910_vm2, %v5909_v11 }
 0xa8c   : > { %4919 = vmatprep.subr.bf16.mxu0 %v5909_v11 }
 0xa8d   : > { %4904 = vmatmul.mubr.msk.bf16.vlgmr.msra.gmra.mrb[80].mxu1 %vm1848_vm3, %v3200_v8 }
 0xa8e   : > { %4914 = vmatpush3.bf16.msra.mxu1 %v6951_v14  ;;  %4915 = vmatprep.mubr.msk.bf16.mxu1 %vm5910_vm2, %v5909_v11 }
 0xa8f   : > { %4925 = vmatprep.subr.bf16.mxu1 %v5909_v11 }
 0xb13   : > { %v3594_v57 = vpop.xlane.xlu0 %3593 }
 0xb14   : > { %v3598_v58 = vmul.f32 0.03125, %v3594_v57  ;;  %v5230_v57 = vld [vmem:[#allocation29 + $0x8] sm:$0xff] (!%p4442_p11)  }
 0xb16   : > { %v3600_v59 = vadd.f32 1e-05, %v3598_v58 }
 0xb18   : > { %5220 = vrsqrt.f32 %v3600_v59 }
 0xb55   : > { %v3245_v62 = vpop.f32.mrb[84].mxu0 }
 0xb56   : > { %v3389_v44 = vpack.c.bf16 %v3245_v62, %v3245_v62  ;;  %v4887_v0 = vpop.f32.mrb[85].mxu0 }
 0xb57   : > { %v3248_v61 = vpop.f32.mrb[86].mxu0 }
 0xb58   : > { %v4888_v54 = vpop.f32.mrb[87].mxu0  ;;  %4910 = vmatmul.mubr.msk.bf16.vlgmr.msra.gmra.mrb[92].mxu0 %vm1848_vm3, %v3389_v44  ;;  %v3291_v7 = vpop.f32.mrb[76].mxu1  ;;  %v4427_v61 = vld [vmem:[%s7404_s14] ss:$0 sm:$0xff] }
 0xb59   : > { %v3390_v1 = vpack.c.bf16 %v3291_v7, %v3291_v7  ;;  %v4893_v2 = vpop.f32.mrb[77].mxu1  ;;  %4920 = vmatpush3.bf16.msra.mxu0 %v6957_v47  ;;  %4921 = vmatprep.mubr.msk.bf16.mxu0 %vm5910_vm2, %v5909_v11  ;;  %v5221_v44 = vpop.eup %5220 }
 0xb5a   : > { %v3294_v14 = vpop.f32.mrb[78].mxu1  ;;  %4931 = vmatprep.subr.bf16.mxu0 %v5909_v11  ;;  %v3604_v0 = vmul.f32 %v5221_v44, %v7134_v51  ;;  %v4428_v2 = vld [vmem:[%s7405_s28] ss:$0 sm:$0xff]  ;;  %v5179_v51 = vld [vmem:[%s6672_s22 + $0x18] sm:$0xff]  }
 0xb5b   : > { %v4894_v3 = vpop.f32.mrb[79].mxu1  ;;  %4916 = vmatmul.mubr.msk.bf16.vlgmr.msra.gmra.mrb[84].mxu1 %vm1848_vm3, %v3390_v1 }
 0xb5c   : > { %4926 = vmatpush3.bf16.msra.mxu1 %v6965_v55  ;;  %4927 = vmatprep.mubr.msk.bf16.mxu1 %vm5910_vm2, %v5909_v11  ;;  %v3612_v7 = vmul.f32 %v4427_v61, %v3604_v0 }
 0xb5d   : > { %v3337_v18 = vpop.f32.mrb[88].mxu0  ;;  %4939 = vmatprep.subr.bf16.mxu1 %v5909_v11 }
 0xb5e   : > { %v3391_v9 = vpack.c.bf16 %v3337_v18, %v3337_v18  ;;  %v4899_v10 = vpop.f32.mrb[89].mxu0  ;;  %v3620_v3 = vadd.f32 %v4428_v2, %v3612_v7 }
 0xb5f   : > { %v3340_v47 = vpop.f32.mrb[90].mxu0  ;;  %v5178_v10 = vld [vmem:[%s6672_s22 + $0x10] sm:$0xff]  }
 0xb60   : > { %v4900_v12 = vpop.f32.mrb[91].mxu0  ;;  %4922 = vmatmul.mubr.msk.bf16.vlgmr.msra.gmra.mrb[96].mxu0 %vm1848_vm3, %v3391_v9  ;;  %v3383_v13 = vpop.f32.mrb[80].mxu1  ;;  %v5180_v47 = vld [vmem:[%s6672_s22 + $0x20] sm:$0xff]  }
 0xb61   : > { %v3392_v20 = vpack.c.bf16 %v3383_v13, %v3383_v13  ;;  %v4905_v23 = vpop.f32.mrb[81].mxu1  ;;  %4935 = vmatprep.mubr.msk.bf16.mxu0 %vm5910_vm2, %v5909_v11  ;;  %v5181_v12 = vld [vmem:[%s6672_s22 + $0x28] sm:$0xff]   ;;  %v5182_v13 = vld [vmem:[%s6672_s22 + $0x30] sm:$0xff]  }
 0xb62   : > { %v3386_v24 = vpop.f32.mrb[82].mxu1  ;;  %v4429_v23 = vld [vmem:[%s960_s9] ss:$0 sm:$0xff] }
 0xb63   : > { %v4906_v55 = vpop.f32.mrb[83].mxu1  ;;  %4928 = vmatmul.mubr.msk.bf16.vlgmr.msra.gmra.mrb[88].mxu1 %vm1848_vm3, %v3392_v20  ;;  %v5183_v20 = vld [vmem:[%s6672_s22 + $0x38] sm:$0xff]  }
 0xb64   : > { %4955 = vmatprep.mubr.msk.bf16.mxu1 %vm5910_vm2, %v5909_v11  ;;  %4940 = vmatpush3.bf16.msra.mxu1 %v5176_v46  ;;  %v5229_v46 = vld [vmem:[#allocation29] sm:$0xff] (!%p4442_p11)  }
 0xb65   : > { %4941 = vmatprep.subr.bf16.mxu1 %v5909_v11 }
 0xb68   : > { %4942 = vmatpush3.bf16.msra.mxu1 %v5177_v56  ;;  %v5911_v56 = vmov (!%p4442_p11), 0.0  }
 0xb69   : > { %4943 = vmatprep.subr.bf16.mxu1 %v5909_v11 }
 0xb6c   : > { %4944 = vmatpush3.bf16.msra.mxu1 %v5178_v10 }
 0xb6d   : > { %4945 = vmatprep.subr.bf16.mxu1 %v5909_v11 }
 0xb70   : > { %4946 = vmatpush3.bf16.msra.mxu1 %v5179_v51 }
 0xb71   : > { %4947 = vmatprep.subr.bf16.mxu1 %v5909_v11 }
 0xb74   : > { %4948 = vmatpush3.bf16.msra.mxu1 %v5180_v47  ;;  %v4446_v47 = vld [vmem:[#allocation30] ss:$0 sm:$0xff] (!%p4442_p11) }
 0xb75   : > { %4949 = vmatprep.subr.bf16.mxu1 %v5909_v11 }
 0xb78   : > { %4950 = vmatpush3.bf16.msra.mxu1 %v5181_v12 }
 0xb79   : > { %4951 = vmatprep.subr.bf16.mxu1 %v5909_v11 }
 0xb7c   : > { %4952 = vmatpush3.bf16.msra.mxu1 %v5182_v13 }
 0xb7d   : > { %4953 = vmatprep.subr.bf16.mxu1 %v5909_v11 }
 0xb80   : > { %4954 = vmatpush3.bf16.msra.mxu1 %v5183_v20 }
 0xc2b   : > { %v3430_v26 = vpop.f32.mrb[92].mxu0 }
 0xc2c   : > { %v4911_v27 = vpop.f32.mrb[93].mxu0  ;;  %v3565_v31 = vsel %vm1110_vm1, %v3430_v26, 0.0 }
 0xc2d   : > { %v3433_v28 = vpop.f32.mrb[94].mxu0 }
 0xc2e   : > { %v4912_v29 = vpop.f32.mrb[95].mxu0  ;;  %v3473_v30 = vpop.f32.mrb[84].mxu1 }
 0xc2f   : > { %v3566_v32 = vsel %vm1110_vm1, %v3473_v30, 0.0  ;;  %v4917_v33 = vpop.f32.mrb[85].mxu1 }
 0xc30   : > { %v3567_v34 = vadd.f32 %v3566_v32, %v3565_v31  ;;  %v3476_v35 = vpop.f32.mrb[86].mxu1 }
 0xc31   : > { %v4918_v36 = vpop.f32.mrb[87].mxu1 }
 0xc33   : > { %v3516_v37 = vpop.f32.mrb[96].mxu0 }
 0xc34   : > { %v3568_v40 = vsel %vm1110_vm1, %v3516_v37, 0.0  ;;  %v4923_v41 = vpop.f32.mrb[97].mxu0 }
 0xc35   : > { %v3569_v42 = vadd.f32 %v3568_v40, %v3567_v34  ;;  %v3519_v43 = vpop.f32.mrb[98].mxu0 }
 0xc36   : > { %v4924_v4 = vpop.f32.mrb[99].mxu0  ;;  %v3559_v5 = vpop.f32.mrb[88].mxu1 }
 0xc37   : > { %v3570_v6 = vsel %vm1110_vm1, %v3559_v5, 0.0  ;;  %v4929_v63 = vpop.f32.mrb[89].mxu1 }
 0xc38   : > { %v3571_v15 = vadd.f32 %v3570_v6, %v3569_v42  ;;  %v3562_v17 = vpop.f32.mrb[90].mxu1  ;;  %v4433_v42 = vld [vmem:[%s977_s2] ss:$0 sm:$0xff] }
 0xc39   : > { %v4930_v16 = vpop.f32.mrb[91].mxu1 }
 0xc3a   : > { %v3572_v21 = vadd.f32 %v7084_v38, %v3571_v15  ;;  %v5174_v38 = vld [vmem:[%s6664_s25] sm:$0xff]  }
 0xc3b   : > { %4932 = vmatpush3.bf16.msra.mxu0 %v5174_v38 }
 0xc3c   : > { %v3573_v22 = vadd.f32 %v3572_v21, %v6916_v25  ;;  %v5175_v25 = vld [vmem:[%s6664_s25 + $0x8] sm:$0xff]   ;;  %4933 = vmatprep.subr.bf16.mxu0 %v5909_v11 }
 0xc3e   : > { %3575 = vst.msk [vmem:[#allocation2 + $0x8] sm:$0xff] %vm1110_vm1, %v3573_v22 }
 0xc3f   : > { %4934 = vmatpush3.bf16.msra.mxu0 %v5175_v25 }
 0xc40   : > { %4959 = vmatprep.subr.bf16.mxu0 (!%p4442_p11), %v5911_v56 }
 0xc45   : > { %v7182_v48 = vld [vmem:[#allocation2 + $0x8] sm:$0xff] }
 0xc46   : > { %v3583_v49 = vsel %vm1110_vm1, %v7182_v48, 0.0 }
 0xc47   : > { %3584 = vadd.xlane.f32.xlu1 %v3583_v49 }
 0xcd4   : > { %v3585_v50 = vpop.xlane.xlu1 %3584 }
 0xcd5   : > { %v3587_v52 = vmul.f32 0.03125, %v3585_v50 }
 0xcd7   : > { %v3589_v45 = vsub.f32 %v7182_v48, %v3587_v52 }
 0xcd9   : > { %v3591_v19 = vmul.f32 %v3589_v45, %v3589_v45 }
 0xcdb   : > { %v3595_v53 = vsel %vm1110_vm1, %v3591_v19, 0.0 }
 0xcdc   : > { %3596 = vadd.xlane.f32.xlu1 %v3595_v53 }
 0xd69   : > { %v3597_v60 = vpop.xlane.xlu1 %3596 }
 0xd6a   : > { %v3599_v8 = vmul.f32 0.03125, %v3597_v60 }
 0xd6c   : > { %v3601_v62 = vadd.f32 1e-05, %v3599_v8 }
 0xd6e   : > { %5222 = vrsqrt.f32 %v3601_v62 }
 0xd78   : > { %v5223_v54 = vpop.eup %5222 }
 0xd79   : > { %v3605_v1 = vmul.f32 %v5223_v54, %v3589_v45  ;;  %v4443_v54 = vld [vmem:[#allocation26] ss:$0 sm:$0xff] (!%p4442_p11) }
 0xd7b   : > { %v3613_v14 = vmul.f32 %v4427_v61, %v3605_v1 }
 0xd7d   : > { %v3621_v18 = vadd.f32 %v4428_v2, %v3613_v14  ;;  %v4444_v14 = vld [vmem:[#allocation27] ss:$0 sm:$0xff] (!%p4442_p11) }
 0xd7f   : > { %v3622_v9 = vpack.c.bf16 %v3621_v18, %v3620_v3 }
 0xd81   : > { %4936 = vmatmul.mubr.msk.bf16.vlgmr.msra.gmra.mrb[100].mxu0 %vm1110_vm1, %v3622_v9 }
 0xd82   : > { %4963 = vmatprep.mubr.msk.bf16.mxu0 (!%p4442_p11), %vm5912_vm6, %v5911_v56  ;;  %4960 = vmatpush3.bf16.msra.mxu0 (!%p4442_p11), %v5229_v46 }
 0xd83   : > { %4961 = vmatprep.subr.bf16.mxu0 (!%p4442_p11), %v5911_v56 }
 0xd86   : > { %4962 = vmatpush3.bf16.msra.mxu0 (!%p4442_p11), %v5230_v57 }
 0xe54   : > { %v3683_v24 = vpop.f32.mrb[100].mxu0 }
 0xe55   : > { %v3684_v55 = vadd.f32 %v4429_v23, %v3683_v24  ;;  %v4937_v26 = vpop.f32.mrb[101].mxu0 }
 0xe56   : > { %v3686_v27 = vpop.f32.mrb[102].mxu0 }
 0xe57   : > { %v3692_v28 = vmul.f32 0.70710677, %v3684_v55  ;;  %v3687_v29 = vadd.f32 %v4429_v23, %v3686_v27  ;;  %v4938_v30 = vpop.f32.mrb[103].mxu0  ;;  %v3690_v35 = vmul.f32 0.5, %v3684_v55 }
 0xe59   : > { %5224 = verf.f32 %v3692_v28  ;;  %v3693_v31 = vmul.f32 0.70710677, %v3687_v29  ;;  %v3691_v11 = vmul.f32 0.5, %v3687_v29 }
 0xe5b   : > { %5226 = verf.f32 %v3693_v31 }
 0xe63   : > { %v5225_v32 = vpop.eup %5224 }
 0xe64   : > { %v3696_v33 = vadd.f32 1.0, %v5225_v32 }
 0xe65   : > { %v5227_v34 = vpop.eup %5226 }
 0xe66   : > { %v3697_v36 = vadd.f32 1.0, %v5227_v34  ;;  %v3698_v37 = vmul.f32 %v3696_v33, %v3690_v35 }
 0xe68   : > { %v3699_v40 = vmul.f32 %v3697_v36, %v3691_v11 }
 0xe6a   : > { %v3700_v41 = vpack.c.bf16 %v3699_v40, %v3698_v37 }
 0xe6c   : > { %4956 = vmatmul.mubr.bf16.vlgmr.msra.gmra.mrb[92].mxu1 %v3700_v41 }
 0xf3f   : > { %v3806_v43 = vpop.f32.mrb[92].mxu1 }
 0xf40   : > { %v3807_v4 = vadd.f32 %v4433_v42, %v3806_v43  ;;  %v4957_v5 = vpop.f32.mrb[93].mxu1  ;;  %3820 = sbr.rel (%p4442_p11) target bundleno = 4446 (0x115e), region = 172 }
 0xf41   : > { %v3809_v6 = vpop.f32.mrb[94].mxu1 }
 0xf42   : > { %v3813_v63 = vadd.f32 %v3807_v4, %v7124_v39  ;;  %v3810_v15 = vadd.f32 %v4433_v42, %v3809_v6  ;;  %v4958_v17 = vpop.f32.mrb[95].mxu1 }
 0xf44   : > { %3815 = vst.msk [vmem:[#allocation2] sm:$0xff] %vm1110_vm1, %v3813_v63  ;;  %v3814_v16 = vadd.f32 %v3810_v15, %v7182_v48  ;;  %v3824_v21 = vsel (!%p4442_p11), %vm3823_vm5, %v3813_v63, 0.0 }
 0xf45   : > { %3825 = vadd.xlane.f32.xlu0 (!%p4442_p11), %v3824_v21 }
 0xf46   : > { %3816 = vst.msk [vmem:[#allocation2 + $0x8] sm:$0xff] %vm1110_vm1, %v3814_v16  ;;  %v3827_v22 = vsel (!%p4442_p11), %vm3823_vm5, %v3814_v16, 0.0 }
 0xf49   : > { %3828 = vadd.xlane.f32.xlu0 %v3827_v22 }
 0xfd2   : > { %v3826_v49 = vpop.xlane.xlu0 %3825 }
 0xfd3   : > { %v3830_v50 = vmul.f32 0.03125, %v3826_v49 }
 0xfd5   : > { %v3832_v52 = vsub.f32 %v3813_v63, %v3830_v50 }
 0xfd6   : > { %v3829_v39 = vpop.xlane.xlu0 %3828 }
 0xfd7   : > { %v3831_v45 = vmul.f32 0.03125, %v3829_v39  ;;  %v3834_v19 = vmul.f32 %v3832_v52, %v3832_v52 }
 0xfd9   : > { %v3833_v53 = vsub.f32 %v3814_v16, %v3831_v45  ;;  %v3836_v38 = vsel %vm3823_vm5, %v3834_v19, 0.0 }
 0xfda   : > { %3837 = vadd.xlane.f32.xlu1 %v3836_v38 }
 0xfdb   : > { %v3835_v48 = vmul.f32 %v3833_v53, %v3833_v53 }
 0xfdd   : > { %v3839_v25 = vsel %vm3823_vm5, %v3835_v48, 0.0 }
 0xfde   : > { %3840 = vadd.xlane.f32.xlu1 %v3839_v25 }
0x1067   : > { %v3838_v58 = vpop.xlane.xlu1 %3837 }
0x1068   : > { %v3842_v59 = vmul.f32 0.03125, %v3838_v58 }
0x106a   : > { %v3844_v60 = vadd.f32 1e-05, %v3842_v59 }
0x106b   : > { %v3841_v8 = vpop.xlane.xlu1 %3840 }
0x106c   : > { %5231 = vrsqrt.f32 %v3844_v60  ;;  %v3843_v62 = vmul.f32 0.03125, %v3841_v8 }
0x106e   : > { %v3845_v44 = vadd.f32 1e-05, %v3843_v62 }
0x1070   : > { %5233 = vrsqrt.f32 %v3845_v44 }
0x1076   : > { %v5232_v0 = vpop.eup %5231 }
0x1077   : > { %v3848_v61 = vmul.f32 %v5232_v0, %v3832_v52 }
0x1079   : > { %v3856_v2 = vmul.f32 %v4443_v54, %v3848_v61 }
0x107a   : > { %v5234_v7 = vpop.eup %5233 }
0x107b   : > { %v3849_v1 = vmul.f32 %v5234_v7, %v3833_v53  ;;  %v3864_v18 = vadd.f32 %v4444_v14, %v3856_v2 }
0x107d   : > { %v3857_v3 = vmul.f32 %v4443_v54, %v3849_v1 }
0x107f   : > { %v3865_v9 = vadd.f32 %v4444_v14, %v3857_v3 }
0x1081   : > { %v4445_v10 = vcombine.high %v3864_v18, %v3865_v9 }
0x1083   : > { %v3872_v51 = vpack.c.bf16 %v4445_v10, %v4445_v10 }
0x1085   : > { %4964 = vmatmul.mubr.msk.bf16.vlgmr.msra.gmra.mrb[0].mxu0 %vm1110_vm1, %v3872_v51 }
0x1158   : > { %v3933_v12 = vpop.f32.mrb[0].mxu0 }
0x1159   : > { %v3934_v13 = vadd.f32 %v4446_v47, %v3933_v12  ;;  %v4965_v20 = vpop.f32.mrb[1].mxu0 }
0x115a   : > { %v3936_v23 = vpop.f32.mrb[2].mxu0 }
0x115b   : > { %v3940_v24 = vcombine.high %v3934_v13, %v3934_v13  ;;  %3942 = vst [vmem:[#allocation32] sm:$0xf] %v3934_v13  ;;  %v4966_v55 = vpop.f32.mrb[3].mxu0 }
0x115d   : > { %3943 = vst [vmem:[#allocation32 + $0x4] sm:$0xf] %v3940_v24 }
0x115e PF: > { %s7407_s5 = sld [smem:[#allocation49_spill]]  ;;  %s5913_s1 = smov [#allocation32]  }
0x115f   : > { %s3953_s19 = sshll.u32 %s5913_s1, 4  ;;  %s3954_s19 = int_to_ptr.vmem [resolvable:$true] %s3953_s19 }
0x1160   : > { %s5765_s27 = scalar_lea.vmem %s3954_s19, 128  ;;  %p5772_p10 = scmp.lt.s32.totalorder %s3954_s19, %s3954_s19 }
0x1161   : > { %p5766_p3 = scmp.ne.s32.totalorder %s3954_s19, %s5765_s27  ;;  %p5773_p8 = scmp.lt.s32.totalorder %s5765_s27, %s5765_s27 }
0x1163   : > { %p5774_p12 = por %p5773_p8, %p5772_p10 }
0x1164   : > { %p5084_p2 = scmp.eq.s32.totalorder %s7407_s5, 1 }
0x1166   : > { %p5767_p9 = pnand %p5766_p3, %p5084_p2 }
0x1168   : > { %p5768_p13 = pneg %p5767_p9 }
0x116a   : > { %p5775_p4 = pnand %p5774_p12, %p5768_p13 }
0x116c   : > { %5778 = shalt.err (!%p5775_p4)
}
0x116d   : > { %s7408_s26 = sld [smem:[#allocation68_spill]] }
0x1173   : > { %s5779_s21 = scalar_lea.hbm %s7408_s26, 128 }
0x1174   : > { %p5780_p1 = scmp.ne.s32.totalorder %s7408_s26, %s5779_s21  ;;  %p5785_p6 = scmp.lt.u32.totalorder %s5779_s21, %s7408_s26 }
0x1176   : > { %p5781_p5 = pnand %p5780_p1, %p5084_p2 }
0x1178   : > { %p5782_p0 = pneg %p5781_p5 }
0x117a   : > { %p5787_p7 = pnand %p5785_p6, %p5782_p0 }
0x117c   : > { %5790 = shalt.err (!%p5787_p7)
}
0x117d   : > { %s5914_s25 = smov 64   ;;  %s5915_s29 = smov 4  }
0x117e   : > { %5014 = dma.vmem_to_hbm [thread:$0]  (%p5084_p2), %s3954_s19, 128, %s7408_s26, [#allocation5], %s5914_s25, %s5914_s25, %s5915_s29  }
0x117f   : > { %5860 = dma.done.wait (%p5084_p2), [#allocation5], 128  }
0x1180   : > { %5862 = vsyncadd (%p5084_p2), [#allocation5], 4294967168 }
0x1181 PF: > { %s7409_s30 = sld [smem:[#allocation48_spill]]  ;;  %s7410_s27 = sld [smem:[#allocation45_spill]] }
0x1182   : > { %s7411_s28 = sld [smem:[#allocation46_spill]]  ;;  %s7412_s29 = sld [smem:[#allocation53_spill]] }
0x1183   : > { %s7413_s14 = sld [smem:[#allocation52_spill]] }
0x1187   : > { %s53_s19 = sadd.s32 1, %s7409_s30   ;;  %s7414_s30 = smov %s5881_s0 }
0x1188   : > { %p50_p11 = scmp.ge.s32.totalorder %s53_s19, 4  }
0x1189   : > { %s7415_s0 = smov %s7413_s14 }
0x118a   :  { %52 = sbr.rel (!%p50_p11) target bundleno = 36 (0x24), region = 305 }
0x1191   :  { %3969 = vsyncpa [#allocation4], 1 }
0x1192   :  { %3971 = vsyncpa [#allocation4 + $0x1], 1 }
0x1193   :  { %3972 = vsyncpa [#allocation7], 1 }
0x1194   :  { %3974 = vsyncpa [#allocation7 + $0x1], 1 }
0x1195   :  { %3975 = vsyncpa [#allocation10], 1 }
0x1196   :  { %3977 = vsyncpa [#allocation10 + $0x1], 1 }
0x1197   :  { %3978 = vsyncpa [#allocation13], 1 }
0x1198   :  { %3980 = vsyncpa [#allocation13 + $0x1], 1 }
0x1199   :  { %3981 = vsyncpa [#allocation16], 1 }
0x119a   :  { %3983 = vsyncpa [#allocation16 + $0x1], 1 }
0x119b   :  { %3984 = vsyncpa [#allocation19], 1 }
0x119c   :  { %3986 = vsyncpa [#allocation19 + $0x1], 1 }
0x119d   :  { %3987 = vsyncpa [#allocation22], 1 }
0x119e   :  { %3989 = vsyncpa [#allocation22 + $0x1], 1 }
0x119f   :  { %3990 = vsyncpa [#allocation25], 1 }
0x11a0   :  { %3992 = vsyncpa [#allocation25 + $0x1], 1 }
0x11a1   :  { %3993 = vsyncpa [#allocation28], 1 }
0x11a2   :  { %3994 = vsyncpa [#allocation31], 1 }
0x11a3   :  { %3995 = vsyncpa [#allocation5], 1 }
0x11a4   :  { %3997 = vsyncpa [#allocation5 + $0x1], 1 }

</bundles_post_ra>
